<compile_context>
chip_gen: v6e
topology: v6e:2x2x1
jax: 0.10.0
libtpu: 0.0.40
codegen_flags: <defaults>
</compile_context>

<pallas_src>
import numpy as np
import jax
import jax.numpy as jnp
from jax.experimental import pallas as pl
from jax.experimental.pallas import tpu as pltpu

# ----------------- scaled-down CRNN configuration ------------------------------
C_IN = 3
C0, C1, C2, C3 = 8, 8, 16, 32                        # real ResNet34: 64, 64, 128, 256
LAYER_SPECS = [(3, C1, 1), (4, C2, 2), (6, C3, 2)]   # (blocks, out_ch, first_stride)
POOL_FEAT, POOL_SEQ = 64, 8                          # real: AdaptiveAvgPool2d((512, 32))
LSTM_HIDDEN, LSTM_LAYERS = 32, 2                     # real: 256, 2
CLS_HIDDEN = LSTM_HIDDEN                             # real: 256
NUM_CLASSES = 11

MM_LANE_TILE = 256                                   # lane tile for gridded conv matmul


# ----------------- fused conv (matmul + BN + bias + residual + act) ------------
_CONV_KERNELS = {}


def _get_conv_kernel(act, has_res):
    key = (act, has_res)
    if key in _CONV_KERNELS:
        return _CONV_KERNELS[key]

    def kernel(w_ref, p_ref, s_ref, sh_ref, *rest):
        if has_res:
            r_ref, o_ref = rest
        else:
            (o_ref,) = rest
        # bf16 operands, f32 accumulation, f32 epilogue (v5e-safe).
        y = jnp.dot(w_ref[...], p_ref[...], preferred_element_type=jnp.float32)
        y = y * s_ref[...] + sh_ref[...]
        if has_res:
            y = y + r_ref[...]
        if act == "relu":
            y = jnp.maximum(y, 0.0)
        o_ref[...] = y.astype(o_ref.dtype)

    _CONV_KERNELS[key] = kernel
    return kernel


def fused_conv(wT, patchesT, scale, shift, residual=None, act=None):
    """(Cout, K)bf16 @ (K, M)bf16 -> (Cout, M)f32 with fused BN/bias/residual/act."""
    Cout, K = wT.shape
    _, M = patchesT.shape
    kernel = _get_conv_kernel(act, residual is not None)
    args = [wT, patchesT, scale, shift] + ([residual] if residual is not None else [])
    out_shape = jax.ShapeDtypeStruct((Cout, M), jnp.float32)

    TM = MM_LANE_TILE
    if M >= 2 * TM and M % TM == 0:
        full = lambda i: (0, 0)
        col = lambda i: (0, i)
        in_specs = [
            pl.BlockSpec((Cout, K), full),
            pl.BlockSpec((K, TM), col),
            pl.BlockSpec((Cout, 1), full),
            pl.BlockSpec((Cout, 1), full),
        ]
        if residual is not None:
            in_specs.append(pl.BlockSpec((Cout, TM), col))
        return pl.pallas_call(
            kernel,
            out_shape=out_shape,
            grid=(M // TM,),
            in_specs=in_specs,
            out_specs=pl.BlockSpec((Cout, TM), col),
            compiler_params=pltpu.CompilerParams(dimension_semantics=("parallel",)),
        )(*args)

    # small shapes: whole-array single-block call
    return pl.pallas_call(kernel, out_shape=out_shape)(*args)


def im2col_T(x_cnhw, kh, kw, stride, pad):
    """Host-side transposed im2col: (C,B,H,W) -> patches^T (kh*kw*C, B*OH*OW) in bf16."""
    C, B, H, W = x_cnhw.shape
    OH = (H + 2 * pad - kh) // stride + 1
    OW = (W + 2 * pad - kw) // stride + 1
    xp = jnp.pad(x_cnhw, ((0, 0), (0, 0), (pad, pad), (pad, pad))).astype(jnp.bfloat16)
    taps = []
    for i in range(kh):
        for j in range(kw):
            taps.append(xp[:, :, i:i + stride * OH:stride, j:j + stride * OW:stride])
    pT = jnp.stack(taps, axis=0).reshape(kh * kw * C, B * OH * OW)
    return pT, OH, OW


def conv_bn(x_cnhw, p, stride, pad, k, act=None, residual=None):
    wT, scale, shift = p
    B = x_cnhw.shape[1]
    pT, OH, OW = im2col_T(x_cnhw, k, k, stride, pad)
    y = fused_conv(wT, pT, scale, shift, residual=residual, act=act)  # (Cout, B*OH*OW)
    return y.reshape(-1, B, OH, OW)


# ----------------- max pool 3x3 / stride 2 / pad 1 (phase decomposition) --------
def _maxpool_kernel_factory(OH, OW):
    def kernel(ph_ref, o_ref):
        r = None
        for i in range(3):
            for j in range(3):
                k = (i % 2) * 2 + (j % 2)
                v = ph_ref[k, :, :, i // 2:i // 2 + OH, j // 2:j // 2 + OW]
                r = v if r is None else jnp.maximum(r, v)
        o_ref[...] = r
    return kernel


def maxpool_3x3_s2_p1(x_cnhw):
    C, B, H, W = x_cnhw.shape
    OH = (H - 1) // 2 + 1
    OW = (W - 1) // 2 + 1
    xp = jnp.pad(x_cnhw, ((0, 0), (0, 0), (1, 1), (1, 1)), constant_values=-jnp.inf)
    # parity phases of the padded input (exact partition -> ~1x HBM traffic, no 9x stack)
    phases = jnp.stack(
        [xp[:, :, pi::2, pj::2] for pi in range(2) for pj in range(2)], axis=0
    )  # (4, C, B, (H+2)//2, (W+2)//2)
    return pl.pallas_call(
        _maxpool_kernel_factory(OH, OW),
        out_shape=jax.ShapeDtypeStruct((C, B, OH, OW), jnp.float32),
    )(phases)


# ----------------- BasicBlock ----------------------------------------------------
def basic_block(x, blk, stride):
    if blk["down"] is not None:
        identity = conv_bn(x, blk["down"], stride=stride, pad=0, k=1)
    else:
        identity = x
    out = conv_bn(x, blk["conv1"], stride=stride, pad=1, k=3, act="relu")
    out = conv_bn(out, blk["conv2"], stride=1, pad=1, k=3, act="relu",
                  residual=identity.reshape(identity.shape[0], -1))
    return out


# ----------------- adaptive average pool (fused) ---------------------------------
def adaptive_pool_matrix(in_size, out_size):
    P = np.zeros((out_size, in_size), np.float32)
    for i in range(out_size):
        s = (i * in_size) // out_size
        e = -((-(i + 1) * in_size) // out_size)  # ceil
        P[i, s:e] = 1.0 / (e - s)
    return P


def _pool_kernel_factory(B):
    def kernel(xT_ref, pc_ref, prT_ref, o_ref):
        for b in range(B):
            t1 = jnp.dot(pc_ref[...], xT_ref[b], preferred_element_type=jnp.float32)   # (T, CH)
            o_ref[b] = jnp.dot(t1, prT_ref[...], preferred_element_type=jnp.float32)   # (T, F)
    return kernel


def adaptive_pool(x_cnhw):
    C, B, H, W = x_cnhw.shape
    CH = C * H
    # PyTorch: view(b, c*h, w) then AdaptiveAvgPool2d((POOL_FEAT, POOL_SEQ)) then transpose(1,2)
    xT = jnp.transpose(x_cnhw, (1, 3, 0, 2)).reshape(B, W, CH)       # xT[b, w, c*H+h]
    Pc = jnp.asarray(adaptive_pool_matrix(W, POOL_SEQ))              # (T, W)
    PrT = jnp.asarray(adaptive_pool_matrix(CH, POOL_FEAT).T)         # (CH, F)
    out = pl.pallas_call(
        _pool_kernel_factory(B),
        out_shape=jax.ShapeDtypeStruct((B, POOL_SEQ, POOL_FEAT), jnp.float32),
    )(xT, Pc, PrT)
    return jnp.transpose(out, (1, 0, 2))                             # (T, B, F)


# ----------------- BiLSTM: one kernel per layer (both directions, unrolled T) ----
def _lstm_kernel_factory(T, B, H):
    def kernel(x_ref, wif_ref, whf_ref, bf_ref, wib_ref, whb_ref, bb_ref, o_ref):
        def cell(x_t, h, c, wih_ref, whh_ref, b_ref):
            gates = (jnp.dot(x_t, wih_ref[...], preferred_element_type=jnp.float32)
                     + jnp.dot(h.astype(jnp.bfloat16), whh_ref[...],
                               preferred_element_type=jnp.float32)
                     + b_ref[...])
            i_g = jax.nn.sigmoid(gates[:, 0:H])
            f_g = jax.nn.sigmoid(gates[:, H:2 * H])
            g_g = jnp.tanh(gates[:, 2 * H:3 * H])
            o_g = jax.nn.sigmoid(gates[:, 3 * H:4 * H])
            c_n = f_g * c + i_g * g_g
            h_n = o_g * jnp.tanh(c_n)
            return h_n, c_n

        z = jnp.zeros((B, H), jnp.float32)
        h_f, c_f, h_b, c_b = z, z, z, z
        for t in range(T):                       # fully unrolled, state stays in vregs
            h_f, c_f = cell(x_ref[t, 0], h_f, c_f, wif_ref, whf_ref, bf_ref)
            h_b, c_b = cell(x_ref[t, 1], h_b, c_b, wib_ref, whb_ref, bb_ref)
            o_ref[t, 0] = h_f
            o_ref[t, 1] = h_b
    return kernel


def bilstm(x_tbf, lstm_params, H):
    T, B, _ = x_tbf.shape
    for lp in lstm_params:
        # stack forward sequence and time-reversed sequence -> one kernel for both dirs
        x_stacked = jnp.stack([x_tbf, jnp.flip(x_tbf, axis=0)], axis=1).astype(jnp.bfloat16)
        f, b = lp["fwd"], lp["bwd"]
        h = pl.pallas_call(
            _lstm_kernel_factory(T, B, H),
            out_shape=jax.ShapeDtypeStruct((T, 2, B, H), jnp.float32),
        )(x_stacked, f["w_ihT"], f["w_hhT"], f["b"], b["w_ihT"], b["w_hhT"], b["b"])
        x_tbf = jnp.concatenate([h[:, 0], jnp.flip(h[:, 1], axis=0)], axis=-1)  # (T, B, 2H)
        # TODO(synk): nn.LSTM inter-layer dropout (p=0.1) omitted -> eval semantics.
    return x_tbf


# ----------------- classifier head + log_softmax (fused) -------------------------
def _head_kernel(x_ref, w1_ref, b1_ref, w2_ref, b2_ref, o_ref):
    h = jnp.dot(x_ref[...].astype(jnp.bfloat16), w1_ref[...],
                preferred_element_type=jnp.float32) + b1_ref[...]
    # TODO(synk): nn.GELU() default is the exact erf form; tanh approximation used
    # since erf is not guaranteed to lower in Mosaic.
    c = jnp.float32(0.7978845608028654)
    h = 0.5 * h * (1.0 + jnp.tanh(c * (h + 0.044715 * h * h * h)))
    # nn.Dropout(0.1) -> identity in eval mode.
    logits = jnp.dot(h.astype(jnp.bfloat16), w2_ref[...],
                     preferred_element_type=jnp.float32) + b2_ref[...]
    m = jnp.max(logits, axis=-1, keepdims=True)
    e = jnp.exp(logits - m)
    o_ref[...] = logits - m - jnp.log(jnp.sum(e, axis=-1, keepdims=True))


def classifier_head(x_tbf, p):
    T, B, F = x_tbf.shape
    logp = pl.pallas_call(
        _head_kernel,
        out_shape=jax.ShapeDtypeStruct((T * B, NUM_CLASSES), jnp.float32),
    )(x_tbf.reshape(T * B, F), p["w1T"], p["b1"], p["w2T"], p["b2"])
    # rows ordered (t, b) -> already the permute(1, 0, 2) layout
    return logp.reshape(T, B, NUM_CLASSES)


# ----------------- full forward ---------------------------------------------------
def crnn_forward(x_nchw, params):
    x = jnp.transpose(x_nchw, (1, 0, 2, 3))                       # NCHW -> CNHW
    # stem: Conv2d(3, C0, 7, 1, 3) + bn1 + relu + maxpool(3, 2, 1)
    x = conv_bn(x, params["stem"], stride=1, pad=3, k=7, act="relu")
    x = maxpool_3x3_s2_p1(x)
    # layer1 / layer2 / layer3 of BasicBlocks
    for (nb, _, stride), blocks in zip(LAYER_SPECS, params["layers"]):
        for i, blk in enumerate(blocks):
            x = basic_block(x, blk, stride if i == 0 else 1)
    # view(b, c*h, w) + AdaptiveAvgPool2d + transpose(1, 2)
    x = adaptive_pool(x)                                          # (T, B, feat)
    # BiLSTM(feat, hidden, 2 layers, bidirectional)
    x = bilstm(x, params["lstm"], LSTM_HIDDEN)                    # (T, B, 2H)
    # classifier + log_softmax + permute(1, 0, 2)
    return classifier_head(x, params["cls"])                      # (T, B, num_classes)


# ----------------- deterministic synthetic parameters (pre-transposed, bf16) -----
def conv_bn_params(key, cin, cout, k, conv_bias=False):
    k1, k2, k3, k4, k5, k6 = jax.random.split(key, 6)
    w = jax.random.normal(k1, (cout, cin, k, k), jnp.float32) / np.sqrt(cin * k * k)
    b = (0.05 * jax.random.normal(k2, (cout,), jnp.float32)) if conv_bias else jnp.zeros((cout,), jnp.float32)
    gamma = 1.0 + 0.1 * jax.random.normal(k3, (cout,), jnp.float32)
    beta = 0.1 * jax.random.normal(k4, (cout,), jnp.float32)
    mean = 0.05 * jax.random.normal(k5, (cout,), jnp.float32)
    var = 1.0 + 0.1 * jax.random.uniform(k6, (cout,), jnp.float32)
    scale = gamma / jnp.sqrt(var + 1e-5)
    shift = beta - mean * scale + b * scale
    # lane-dense layout: (cout, kh*kw*cin) bf16; per-row (column-vector) scale/shift
    wT = jnp.transpose(w, (0, 2, 3, 1)).reshape(cout, k * k * cin).astype(jnp.bfloat16)
    return (wT, scale[:, None], shift[:, None])


def lstm_dir_params(key, input_size, hidden):
    ks = jax.random.split(key, 4)
    s = 1.0 / np.sqrt(hidden)
    w_ih = jax.random.uniform(ks[0], (4 * hidden, input_size), jnp.float32, -s, s)
    w_hh = jax.random.uniform(ks[1], (4 * hidden, hidden), jnp.float32, -s, s)
    b_ih = jax.random.uniform(ks[2], (4 * hidden,), jnp.float32, -s, s)
    b_hh = jax.random.uniform(ks[3], (4 * hidden,), jnp.float32, -s, s)
    return dict(w_ihT=jnp.transpose(w_ih).astype(jnp.bfloat16),
                w_hhT=jnp.transpose(w_hh).astype(jnp.bfloat16),
                b=(b_ih + b_hh)[None, :])


def init_params(key):
    keys = iter(jax.random.split(key, 200))
    params = {}
    params["stem"] = conv_bn_params(next(keys), C_IN, C0, 7, conv_bias=True)
    layers = []
    in_c = C0
    for n_blocks, out_c, stride in LAYER_SPECS:
        blocks = []
        for i in range(n_blocks):
            s = stride if i == 0 else 1
            cin = in_c if i == 0 else out_c
            blk = {
                "conv1": conv_bn_params(next(keys), cin, out_c, 3),
                "conv2": conv_bn_params(next(keys), out_c, out_c, 3),
                "down": conv_bn_params(next(keys), cin, out_c, 1)
                if (s != 1 or cin != out_c) else None,
            }
            blocks.append(blk)
        layers.append(blocks)
        in_c = out_c
    params["layers"] = layers

    lstm_layers = []
    in_size = POOL_FEAT
    for _ in range(LSTM_LAYERS):
        lstm_layers.append({
            "fwd": lstm_dir_params(next(keys), in_size, LSTM_HIDDEN),
            "bwd": lstm_dir_params(next(keys), in_size, LSTM_HIDDEN),
        })
        in_size = 2 * LSTM_HIDDEN
    params["lstm"] = lstm_layers

    k1, k2, k3, k4 = jax.random.split(next(keys), 4)
    f_in = 2 * LSTM_HIDDEN
    w1 = jax.random.normal(k1, (CLS_HIDDEN, f_in), jnp.float32) / np.sqrt(f_in)
    w2 = jax.random.normal(k3, (NUM_CLASSES, CLS_HIDDEN), jnp.float32) / np.sqrt(CLS_HIDDEN)
    params["cls"] = dict(
        w1T=jnp.transpose(w1).astype(jnp.bfloat16),
        b1=(0.05 * jax.random.normal(k2, (CLS_HIDDEN,), jnp.float32))[None, :],
        w2T=jnp.transpose(w2).astype(jnp.bfloat16),
        b2=(0.05 * jax.random.normal(k4, (NUM_CLASSES,), jnp.float32))[None, :],
    )
    return params


# ----------------- main ---------------------------------------------------------
if __name__ == "__main__":
    key = jax.random.PRNGKey(0)
    kx, kp = jax.random.split(key)
    x = jax.random.normal(kx, (2, C_IN, 16, 32), jnp.float32)     # NCHW, like PyTorch
    params = init_params(kp)

    fwd = jax.jit(crnn_forward)
    out = jax.block_until_ready(fwd(x, params))

    assert out.shape == (POOL_SEQ, 2, NUM_CLASSES), out.shape
    assert bool(jnp.all(jnp.isfinite(out)))
    # log_softmax rows should exponentiate-sum to ~1
    assert bool(jnp.allclose(jnp.sum(jnp.exp(out), axis=-1), 1.0, atol=1e-4))
    print("KERNEL_OK")
</pallas_src>

<mosaic_0001>
module attributes {stable_mosaic.version = 11 : i64} {
  func.func @kernel(%arg0: i32, %arg1: memref<8x147xbf16, #tpu.memory_space<vmem>>, %arg2: memref<147x256xbf16, #tpu.memory_space<vmem>>, %arg3: memref<8x1xf32, #tpu.memory_space<vmem>>, %arg4: memref<8x1xf32, #tpu.memory_space<vmem>>, %arg5: memref<8x256xf32, #tpu.memory_space<vmem>>) attributes {dimension_semantics = [#tpu.dimension_semantics<parallel>], iteration_bounds = array<i64: 4>, scalar_prefetch = 0 : i64, scratch_operands = 0 : i64, tpu.core_type = #tpu.core_type<tc>, window_params = [{pipeline_mode = #tpu.pipeline_mode<synchronous>, transform_indices = @transform_0, window_bounds = array<i64: 8, 147>}, {transform_indices = @transform_1, window_bounds = array<i64: 147, 256>}, {pipeline_mode = #tpu.pipeline_mode<synchronous>, transform_indices = @transform_2, window_bounds = array<i64: 8, 1>}, {pipeline_mode = #tpu.pipeline_mode<synchronous>, transform_indices = @transform_3, window_bounds = array<i64: 8, 1>}, {transform_indices = @transform_4, window_bounds = array<i64: 8, 256>}]} {
    %c0 = arith.constant 0 : index
    %c0_0 = arith.constant 0 : index
    %0 = vector.load %arg1[%c0, %c0_0] : memref<8x147xbf16, #tpu.memory_space<vmem>>, vector<8x147xbf16>
    %c0_1 = arith.constant 0 : index
    %c0_2 = arith.constant 0 : index
    %1 = vector.load %arg2[%c0_1, %c0_2] : memref<147x256xbf16, #tpu.memory_space<vmem>>, vector<147x256xbf16>
    %cst = arith.constant dense<0.000000e+00> : vector<8x256xf32>
    %2 = tpu.matmul %0, %1, %cst {dimension_numbers = #tpu.dot_dimension_numbers<[1], [0], [0], [1], [0, 0, 1, 1], [], []>} : vector<8x147xbf16>, vector<147x256xbf16>, vector<8x256xf32> -> vector<8x256xf32>
    %c0_3 = arith.constant 0 : index
    %c0_4 = arith.constant 0 : index
    %3 = vector.load %arg3[%c0_3, %c0_4] : memref<8x1xf32, #tpu.memory_space<vmem>>, vector<8x1xf32>
    %4 = vector.broadcast %3 : vector<8x1xf32> to vector<8x256xf32>
    %5 = arith.mulf %2, %4 : vector<8x256xf32>
    %c0_5 = arith.constant 0 : index
    %c0_6 = arith.constant 0 : index
    %6 = vector.load %arg4[%c0_5, %c0_6] : memref<8x1xf32, #tpu.memory_space<vmem>>, vector<8x1xf32>
    %7 = vector.broadcast %6 : vector<8x1xf32> to vector<8x256xf32>
    %8 = arith.addf %5, %7 : vector<8x256xf32>
    %cst_7 = arith.constant 0.000000e+00 : f32
    %9 = vector.broadcast %cst_7 : f32 to vector<8x256xf32>
    %10 = arith.maximumf %8, %9 : vector<8x256xf32>
    %c0_8 = arith.constant 0 : index
    %c0_9 = arith.constant 0 : index
    %11 = vector.load %arg5[%c0_8, %c0_9] : memref<8x256xf32, #tpu.memory_space<vmem>>, vector<8x256xf32>
    tpu.vector_store %arg5[%c0_8, %c0_9], %10 {strides = array<i32>} : memref<8x256xf32, #tpu.memory_space<vmem>>, vector<8x256xf32>,
    return
  }
  func.func @transform_0(%arg0: i32) -> (i32, i32) {
    %c0_i32 = arith.constant 0 : i32
    %c0_i32_0 = arith.constant 0 : i32
    %c0_i32_1 = arith.constant 0 : i32
    return %c0_i32, %c0_i32_0 : i32, i32
  }
  func.func @transform_1(%arg0: i32) -> (i32, i32) {
    %c0_i32 = arith.constant 0 : i32
    %c0_i32_0 = arith.constant 0 : i32
    return %c0_i32, %arg0 : i32, i32
  }
  func.func @transform_2(%arg0: i32) -> (i32, i32) {
    %c0_i32 = arith.constant 0 : i32
    %c0_i32_0 = arith.constant 0 : i32
    %c0_i32_1 = arith.constant 0 : i32
    return %c0_i32, %c0_i32_0 : i32, i32
  }
  func.func @transform_3(%arg0: i32) -> (i32, i32) {
    %c0_i32 = arith.constant 0 : i32
    %c0_i32_0 = arith.constant 0 : i32
    %c0_i32_1 = arith.constant 0 : i32
    return %c0_i32, %c0_i32_0 : i32, i32
  }
  func.func @transform_4(%arg0: i32) -> (i32, i32) {
    %c0_i32 = arith.constant 0 : i32
    %c0_i32_0 = arith.constant 0 : i32
    return %c0_i32, %arg0 : i32, i32
  }
}

module attributes {stable_mosaic.version = 11 : i64} {
  func.func @kernel(%arg0: memref<4x8x2x9x17xf32, #tpu.memory_space<vmem>>, %arg1: memref<8x2x8x16xf32, #tpu.memory_space<vmem>>) attributes {dimension_semantics = [], scalar_prefetch = 0 : i64, scratch_operands = 0 : i64, tpu.core_type = #tpu.core_type<tc>} {
    %c0 = arith.constant 0 : index
    %c0_0 = arith.constant 0 : index
    %c0_1 = arith.constant 0 : index
    %c0_2 = arith.constant 0 : index
    %c0_3 = arith.constant 0 : index
    %0 = vector.load %arg0[%c0, %c0_0, %c0_1, %c0_2, %c0_3] : memref<4x8x2x9x17xf32, #tpu.memory_space<vmem>>, vector<1x8x2x8x16xf32>
    %1 = vector.shape_cast %0 : vector<1x8x2x8x16xf32> to vector<8x2x8x16xf32>
    %c1 = arith.constant 1 : index
    %c0_4 = arith.constant 0 : index
    %c0_5 = arith.constant 0 : index
    %c0_6 = arith.constant 0 : index
    %c0_7 = arith.constant 0 : index
    %2 = vector.load %arg0[%c1, %c0_4, %c0_5, %c0_6, %c0_7] : memref<4x8x2x9x17xf32, #tpu.memory_space<vmem>>, vector<1x8x2x8x16xf32>
    %3 = vector.shape_cast %2 : vector<1x8x2x8x16xf32> to vector<8x2x8x16xf32>
    %4 = arith.maximumf %1, %3 : vector<8x2x8x16xf32>
    %c0_8 = arith.constant 0 : index
    %c0_9 = arith.constant 0 : index
    %c0_10 = arith.constant 0 : index
    %c0_11 = arith.constant 0 : index
    %c1_12 = arith.constant 1 : index
    %5 = vector.load %arg0[%c0_8, %c0_9, %c0_10, %c0_11, %c1_12] : memref<4x8x2x9x17xf32, #tpu.memory_space<vmem>>, vector<1x8x2x8x16xf32>
    %6 = vector.shape_cast %5 : vector<1x8x2x8x16xf32> to vector<8x2x8x16xf32>
    %7 = arith.maximumf %4, %6 : vector<8x2x8x16xf32>
    %c2 = arith.constant 2 : index
    %c0_13 = arith.constant 0 : index
    %c0_14 = arith.constant 0 : index
    %c0_15 = arith.constant 0 : index
    %c0_16 = arith.constant 0 : index
    %8 = vector.load %arg0[%c2, %c0_13, %c0_14, %c0_15, %c0_16] : memref<4x8x2x9x17xf32, #tpu.memory_space<vmem>>, vector<1x8x2x8x16xf32>
    %9 = vector.shape_cast %8 : vector<1x8x2x8x16xf32> to vector<8x2x8x16xf32>
    %10 = arith.maximumf %7, %9 : vector<8x2x8x16xf32>
    %c3 = arith.constant 3 : index
    %c0_17 = arith.constant 0 : index
    %c0_18 = arith.constant 0 : index
    %c0_19 = arith.constant 0 : index
    %c0_20 = arith.constant 0 : index
    %11 = vector.load %arg0[%c3, %c0_17, %c0_18, %c0_19, %c0_20] : memref<4x8x2x9x17xf32, #tpu.memory_space<vmem>>, vector<1x8x2x8x16xf32>
    %12 = vector.shape_cast %11 : vector<1x8x2x8x16xf32> to vector<8x2x8x16xf32>
    %13 = arith.maximumf %10, %12 : vector<8x2x8x16xf32>
    %c2_21 = arith.constant 2 : index
    %c0_22 = arith.constant 0 : index
    %c0_23 = arith.constant 0 : index
    %c0_24 = arith.constant 0 : index
    %c1_25 = arith.constant 1 : index
    %14 = vector.load %arg0[%c2_21, %c0_22, %c0_23, %c0_24, %c1_25] : memref<4x8x2x9x17xf32, #tpu.memory_space<vmem>>, vector<1x8x2x8x16xf32>
    %15 = vector.shape_cast %14 : vector<1x8x2x8x16xf32> to vector<8x2x8x16xf32>
    %16 = arith.maximumf %13, %15 : vector<8x2x8x16xf32>
    %c0_26 = arith.constant 0 : index
    %c0_27 = arith.constant 0 : index
    %c0_28 = arith.constant 0 : index
    %c1_29 = arith.constant 1 : index
    %c0_30 = arith.constant 0 : index
    %17 = vector.load %arg0[%c0_26, %c0_27, %c0_28, %c1_29, %c0_30] : memref<4x8x2x9x17xf32, #tpu.memory_space<vmem>>, vector<1x8x2x8x16xf32>
    %18 = vector.shape_cast %17 : vector<1x8x2x8x16xf32> to vector<8x2x8x16xf32>
    %19 = arith.maximumf %16, %18 : vector<8x2x8x16xf32>
    %c1_31 = arith.constant 1 : index
    %c0_32 = arith.constant 0 : index
    %c0_33 = arith.constant 0 : index
    %c1_34 = arith.constant 1 : index
    %c0_35 = arith.constant 0 : index
    %20 = vector.load %arg0[%c1_31, %c0_32, %c0_33, %c1_34, %c0_35] : memref<4x8x2x9x17xf32, #tpu.memory_space<vmem>>, vector<1x8x2x8x16xf32>
    %21 = vector.shape_cast %20 : vector<1x8x2x8x16xf32> to vector<8x2x8x16xf32>
    %22 = arith.maximumf %19, %21 : vector<8x2x8x16xf32>
    %c0_36 = arith.constant 0 : index
    %c0_37 = arith.constant 0 : index
    %c0_38 = arith.constant 0 : index
    %c1_39 = arith.constant 1 : index
    %c1_40 = arith.constant 1 : index
    %23 = vector.load %arg0[%c0_36, %c0_37, %c0_38, %c1_39, %c1_40] : memref<4x8x2x9x17xf32, #tpu.memory_space<vmem>>, vector<1x8x2x8x16xf32>
    %24 = vector.shape_cast %23 : vector<1x8x2x8x16xf32> to vector<8x2x8x16xf32>
    %25 = arith.maximumf %22, %24 : vector<8x2x8x16xf32>
    %c0_41 = arith.constant 0 : index
    %c0_42 = arith.constant 0 : index
    %c0_43 = arith.constant 0 : index
    %c0_44 = arith.constant 0 : index
    %26 = vector.load %arg1[%c0_41, %c0_42, %c0_43, %c0_44] : memref<8x2x8x16xf32, #tpu.memory_space<vmem>>, vector<8x2x8x16xf32>
    tpu.vector_store %arg1[%c0_41, %c0_42, %c0_43, %c0_44], %25 {strides = array<i32>} : memref<8x2x8x16xf32, #tpu.memory_space<vmem>>, vector<8x2x8x16xf32>,
    return
  }
}

module attributes {stable_mosaic.version = 11 : i64} {
  func.func @kernel(%arg0: memref<8x72xbf16, #tpu.memory_space<vmem>>, %arg1: memref<72x256xbf16, #tpu.memory_space<vmem>>, %arg2: memref<8x1xf32, #tpu.memory_space<vmem>>, %arg3: memref<8x1xf32, #tpu.memory_space<vmem>>, %arg4: memref<8x256xf32, #tpu.memory_space<vmem>>) attributes {dimension_semantics = [], scalar_prefetch = 0 : i64, scratch_operands = 0 : i64, tpu.core_type = #tpu.core_type<tc>} {
    %c0 = arith.constant 0 : index
    %c0_0 = arith.constant 0 : index
    %0 = vector.load %arg0[%c0, %c0_0] : memref<8x72xbf16, #tpu.memory_space<vmem>>, vector<8x72xbf16>
    %c0_1 = arith.constant 0 : index
    %c0_2 = arith.constant 0 : index
    %1 = vector.load %arg1[%c0_1, %c0_2] : memref<72x256xbf16, #tpu.memory_space<vmem>>, vector<72x256xbf16>
    %cst = arith.constant dense<0.000000e+00> : vector<8x256xf32>
    %2 = tpu.matmul %0, %1, %cst {dimension_numbers = #tpu.dot_dimension_numbers<[1], [0], [0], [1], [0, 0, 1, 1], [], []>} : vector<8x72xbf16>, vector<72x256xbf16>, vector<8x256xf32> -> vector<8x256xf32>
    %c0_3 = arith.constant 0 : index
    %c0_4 = arith.constant 0 : index
    %3 = vector.load %arg2[%c0_3, %c0_4] : memref<8x1xf32, #tpu.memory_space<vmem>>, vector<8x1xf32>
    %4 = vector.broadcast %3 : vector<8x1xf32> to vector<8x256xf32>
    %5 = arith.mulf %2, %4 : vector<8x256xf32>
    %c0_5 = arith.constant 0 : index
    %c0_6 = arith.constant 0 : index
    %6 = vector.load %arg3[%c0_5, %c0_6] : memref<8x1xf32, #tpu.memory_space<vmem>>, vector<8x1xf32>
    %7 = vector.broadcast %6 : vector<8x1xf32> to vector<8x256xf32>
    %8 = arith.addf %5, %7 : vector<8x256xf32>
    %cst_7 = arith.constant 0.000000e+00 : f32
    %9 = vector.broadcast %cst_7 : f32 to vector<8x256xf32>
    %10 = arith.maximumf %8, %9 : vector<8x256xf32>
    %c0_8 = arith.constant 0 : index
    %c0_9 = arith.constant 0 : index
    %11 = vector.load %arg4[%c0_8, %c0_9] : memref<8x256xf32, #tpu.memory_space<vmem>>, vector<8x256xf32>
    tpu.vector_store %arg4[%c0_8, %c0_9], %10 {strides = array<i32>} : memref<8x256xf32, #tpu.memory_space<vmem>>, vector<8x256xf32>,
    return
  }
}

module attributes {stable_mosaic.version = 11 : i64} {
  func.func @kernel(%arg0: memref<8x72xbf16, #tpu.memory_space<vmem>>, %arg1: memref<72x256xbf16, #tpu.memory_space<vmem>>, %arg2: memref<8x1xf32, #tpu.memory_space<vmem>>, %arg3: memref<8x1xf32, #tpu.memory_space<vmem>>, %arg4: memref<8x256xf32, #tpu.memory_space<vmem>>, %arg5: memref<8x256xf32, #tpu.memory_space<vmem>>) attributes {dimension_semantics = [], scalar_prefetch = 0 : i64, scratch_operands = 0 : i64, tpu.core_type = #tpu.core_type<tc>} {
    %c0 = arith.constant 0 : index
    %c0_0 = arith.constant 0 : index
    %0 = vector.load %arg0[%c0, %c0_0] : memref<8x72xbf16, #tpu.memory_space<vmem>>, vector<8x72xbf16>
    %c0_1 = arith.constant 0 : index
    %c0_2 = arith.constant 0 : index
    %1 = vector.load %arg1[%c0_1, %c0_2] : memref<72x256xbf16, #tpu.memory_space<vmem>>, vector<72x256xbf16>
    %cst = arith.constant dense<0.000000e+00> : vector<8x256xf32>
    %2 = tpu.matmul %0, %1, %cst {dimension_numbers = #tpu.dot_dimension_numbers<[1], [0], [0], [1], [0, 0, 1, 1], [], []>} : vector<8x72xbf16>, vector<72x256xbf16>, vector<8x256xf32> -> vector<8x256xf32>
    %c0_3 = arith.constant 0 : index
    %c0_4 = arith.constant 0 : index
    %3 = vector.load %arg2[%c0_3, %c0_4] : memref<8x1xf32, #tpu.memory_space<vmem>>, vector<8x1xf32>
    %4 = vector.broadcast %3 : vector<8x1xf32> to vector<8x256xf32>
    %5 = arith.mulf %2, %4 : vector<8x256xf32>
    %c0_5 = arith.constant 0 : index
    %c0_6 = arith.constant 0 : index
    %6 = vector.load %arg3[%c0_5, %c0_6] : memref<8x1xf32, #tpu.memory_space<vmem>>, vector<8x1xf32>
    %7 = vector.broadcast %6 : vector<8x1xf32> to vector<8x256xf32>
    %8 = arith.addf %5, %7 : vector<8x256xf32>
    %c0_7 = arith.constant 0 : index
    %c0_8 = arith.constant 0 : index
    %9 = vector.load %arg4[%c0_7, %c0_8] : memref<8x256xf32, #tpu.memory_space<vmem>>, vector<8x256xf32>
    %10 = arith.addf %8, %9 : vector<8x256xf32>
    %cst_9 = arith.constant 0.000000e+00 : f32
    %11 = vector.broadcast %cst_9 : f32 to vector<8x256xf32>
    %12 = arith.maximumf %10, %11 : vector<8x256xf32>
    %c0_10 = arith.constant 0 : index
    %c0_11 = arith.constant 0 : index
    %13 = vector.load %arg5[%c0_10, %c0_11] : memref<8x256xf32, #tpu.memory_space<vmem>>, vector<8x256xf32>
    tpu.vector_store %arg5[%c0_10, %c0_11], %12 {strides = array<i32>} : memref<8x256xf32, #tpu.memory_space<vmem>>, vector<8x256xf32>,
    return
  }
}

module attributes {stable_mosaic.version = 11 : i64} {
  func.func @kernel(%arg0: memref<16x72xbf16, #tpu.memory_space<vmem>>, %arg1: memref<72x64xbf16, #tpu.memory_space<vmem>>, %arg2: memref<16x1xf32, #tpu.memory_space<vmem>>, %arg3: memref<16x1xf32, #tpu.memory_space<vmem>>, %arg4: memref<16x64xf32, #tpu.memory_space<vmem>>) attributes {dimension_semantics = [], scalar_prefetch = 0 : i64, scratch_operands = 0 : i64, tpu.core_type = #tpu.core_type<tc>} {
    %c0 = arith.constant 0 : index
    %c0_0 = arith.constant 0 : index
    %0 = vector.load %arg0[%c0, %c0_0] : memref<16x72xbf16, #tpu.memory_space<vmem>>, vector<16x72xbf16>
    %c0_1 = arith.constant 0 : index
    %c0_2 = arith.constant 0 : index
    %1 = vector.load %arg1[%c0_1, %c0_2] : memref<72x64xbf16, #tpu.memory_space<vmem>>, vector<72x64xbf16>
    %cst = arith.constant dense<0.000000e+00> : vector<16x64xf32>
    %2 = tpu.matmul %0, %1, %cst {dimension_numbers = #tpu.dot_dimension_numbers<[1], [0], [0], [1], [0, 0, 1, 1], [], []>} : vector<16x72xbf16>, vector<72x64xbf16>, vector<16x64xf32> -> vector<16x64xf32>
    %c0_3 = arith.constant 0 : index
    %c0_4 = arith.constant 0 : index
    %3 = vector.load %arg2[%c0_3, %c0_4] : memref<16x1xf32, #tpu.memory_space<vmem>>, vector<16x1xf32>
    %4 = vector.broadcast %3 : vector<16x1xf32> to vector<16x64xf32>
    %5 = arith.mulf %2, %4 : vector<16x64xf32>
    %c0_5 = arith.constant 0 : index
    %c0_6 = arith.constant 0 : index
    %6 = vector.load %arg3[%c0_5, %c0_6] : memref<16x1xf32, #tpu.memory_space<vmem>>, vector<16x1xf32>
    %7 = vector.broadcast %6 : vector<16x1xf32> to vector<16x64xf32>
    %8 = arith.addf %5, %7 : vector<16x64xf32>
    %cst_7 = arith.constant 0.000000e+00 : f32
    %9 = vector.broadcast %cst_7 : f32 to vector<16x64xf32>
    %10 = arith.maximumf %8, %9 : vector<16x64xf32>
    %c0_8 = arith.constant 0 : index
    %c0_9 = arith.constant 0 : index
    %11 = vector.load %arg4[%c0_8, %c0_9] : memref<16x64xf32, #tpu.memory_space<vmem>>, vector<16x64xf32>
    tpu.vector_store %arg4[%c0_8, %c0_9], %10 {strides = array<i32>} : memref<16x64xf32, #tpu.memory_space<vmem>>, vector<16x64xf32>,
    return
  }
}

module attributes {stable_mosaic.version = 11 : i64} {
  func.func @kernel(%arg0: memref<16x8xbf16, #tpu.memory_space<vmem>>, %arg1: memref<8x64xbf16, #tpu.memory_space<vmem>>, %arg2: memref<16x1xf32, #tpu.memory_space<vmem>>, %arg3: memref<16x1xf32, #tpu.memory_space<vmem>>, %arg4: memref<16x64xf32, #tpu.memory_space<vmem>>) attributes {dimension_semantics = [], scalar_prefetch = 0 : i64, scratch_operands = 0 : i64, tpu.core_type = #tpu.core_type<tc>} {
    %c0 = arith.constant 0 : index
    %c0_0 = arith.constant 0 : index
    %0 = vector.load %arg0[%c0, %c0_0] : memref<16x8xbf16, #tpu.memory_space<vmem>>, vector<16x8xbf16>
    %c0_1 = arith.constant 0 : index
    %c0_2 = arith.constant 0 : index
    %1 = vector.load %arg1[%c0_1, %c0_2] : memref<8x64xbf16, #tpu.memory_space<vmem>>, vector<8x64xbf16>
    %cst = arith.constant dense<0.000000e+00> : vector<16x64xf32>
    %2 = tpu.matmul %0, %1, %cst {dimension_numbers = #tpu.dot_dimension_numbers<[1], [0], [0], [1], [0, 0, 1, 1], [], []>} : vector<16x8xbf16>, vector<8x64xbf16>, vector<16x64xf32> -> vector<16x64xf32>
    %c0_3 = arith.constant 0 : index
    %c0_4 = arith.constant 0 : index
    %3 = vector.load %arg2[%c0_3, %c0_4] : memref<16x1xf32, #tpu.memory_space<vmem>>, vector<16x1xf32>
    %4 = vector.broadcast %3 : vector<16x1xf32> to vector<16x64xf32>
    %5 = arith.mulf %2, %4 : vector<16x64xf32>
    %c0_5 = arith.constant 0 : index
    %c0_6 = arith.constant 0 : index
    %6 = vector.load %arg3[%c0_5, %c0_6] : memref<16x1xf32, #tpu.memory_space<vmem>>, vector<16x1xf32>
    %7 = vector.broadcast %6 : vector<16x1xf32> to vector<16x64xf32>
    %8 = arith.addf %5, %7 : vector<16x64xf32>
    %c0_7 = arith.constant 0 : index
    %c0_8 = arith.constant 0 : index
    %9 = vector.load %arg4[%c0_7, %c0_8] : memref<16x64xf32, #tpu.memory_space<vmem>>, vector<16x64xf32>
    tpu.vector_store %arg4[%c0_7, %c0_8], %8 {strides = array<i32>} : memref<16x64xf32, #tpu.memory_space<vmem>>, vector<16x64xf32>,
    return
  }
}

module attributes {stable_mosaic.version = 11 : i64} {
  func.func @kernel(%arg0: memref<16x144xbf16, #tpu.memory_space<vmem>>, %arg1: memref<144x64xbf16, #tpu.memory_space<vmem>>, %arg2: memref<16x1xf32, #tpu.memory_space<vmem>>, %arg3: memref<16x1xf32, #tpu.memory_space<vmem>>, %arg4: memref<16x64xf32, #tpu.memory_space<vmem>>, %arg5: memref<16x64xf32, #tpu.memory_space<vmem>>) attributes {dimension_semantics = [], scalar_prefetch = 0 : i64, scratch_operands = 0 : i64, tpu.core_type = #tpu.core_type<tc>} {
    %c0 = arith.constant 0 : index
    %c0_0 = arith.constant 0 : index
    %0 = vector.load %arg0[%c0, %c0_0] : memref<16x144xbf16, #tpu.memory_space<vmem>>, vector<16x144xbf16>
    %c0_1 = arith.constant 0 : index
    %c0_2 = arith.constant 0 : index
    %1 = vector.load %arg1[%c0_1, %c0_2] : memref<144x64xbf16, #tpu.memory_space<vmem>>, vector<144x64xbf16>
    %cst = arith.constant dense<0.000000e+00> : vector<16x64xf32>
    %2 = tpu.matmul %0, %1, %cst {dimension_numbers = #tpu.dot_dimension_numbers<[1], [0], [0], [1], [0, 0, 1, 1], [], []>} : vector<16x144xbf16>, vector<144x64xbf16>, vector<16x64xf32> -> vector<16x64xf32>
    %c0_3 = arith.constant 0 : index
    %c0_4 = arith.constant 0 : index
    %3 = vector.load %arg2[%c0_3, %c0_4] : memref<16x1xf32, #tpu.memory_space<vmem>>, vector<16x1xf32>
    %4 = vector.broadcast %3 : vector<16x1xf32> to vector<16x64xf32>
    %5 = arith.mulf %2, %4 : vector<16x64xf32>
    %c0_5 = arith.constant 0 : index
    %c0_6 = arith.constant 0 : index
    %6 = vector.load %arg3[%c0_5, %c0_6] : memref<16x1xf32, #tpu.memory_space<vmem>>, vector<16x1xf32>
    %7 = vector.broadcast %6 : vector<16x1xf32> to vector<16x64xf32>
    %8 = arith.addf %5, %7 : vector<16x64xf32>
    %c0_7 = arith.constant 0 : index
    %c0_8 = arith.constant 0 : index
    %9 = vector.load %arg4[%c0_7, %c0_8] : memref<16x64xf32, #tpu.memory_space<vmem>>, vector<16x64xf32>
    %10 = arith.addf %8, %9 : vector<16x64xf32>
    %cst_9 = arith.constant 0.000000e+00 : f32
    %11 = vector.broadcast %cst_9 : f32 to vector<16x64xf32>
    %12 = arith.maximumf %10, %11 : vector<16x64xf32>
    %c0_10 = arith.constant 0 : index
    %c0_11 = arith.constant 0 : index
    %13 = vector.load %arg5[%c0_10, %c0_11] : memref<16x64xf32, #tpu.memory_space<vmem>>, vector<16x64xf32>
    tpu.vector_store %arg5[%c0_10, %c0_11], %12 {strides = array<i32>} : memref<16x64xf32, #tpu.memory_space<vmem>>, vector<16x64xf32>,
    return
  }
}

module attributes {stable_mosaic.version = 11 : i64} {
  func.func @kernel(%arg0: memref<16x144xbf16, #tpu.memory_space<vmem>>, %arg1: memref<144x64xbf16, #tpu.memory_space<vmem>>, %arg2: memref<16x1xf32, #tpu.memory_space<vmem>>, %arg3: memref<16x1xf32, #tpu.memory_space<vmem>>, %arg4: memref<16x64xf32, #tpu.memory_space<vmem>>) attributes {dimension_semantics = [], scalar_prefetch = 0 : i64, scratch_operands = 0 : i64, tpu.core_type = #tpu.core_type<tc>} {
    %c0 = arith.constant 0 : index
    %c0_0 = arith.constant 0 : index
    %0 = vector.load %arg0[%c0, %c0_0] : memref<16x144xbf16, #tpu.memory_space<vmem>>, vector<16x144xbf16>
    %c0_1 = arith.constant 0 : index
    %c0_2 = arith.constant 0 : index
    %1 = vector.load %arg1[%c0_1, %c0_2] : memref<144x64xbf16, #tpu.memory_space<vmem>>, vector<144x64xbf16>
    %cst = arith.constant dense<0.000000e+00> : vector<16x64xf32>
    %2 = tpu.matmul %0, %1, %cst {dimension_numbers = #tpu.dot_dimension_numbers<[1], [0], [0], [1], [0, 0, 1, 1], [], []>} : vector<16x144xbf16>, vector<144x64xbf16>, vector<16x64xf32> -> vector<16x64xf32>
    %c0_3 = arith.constant 0 : index
    %c0_4 = arith.constant 0 : index
    %3 = vector.load %arg2[%c0_3, %c0_4] : memref<16x1xf32, #tpu.memory_space<vmem>>, vector<16x1xf32>
    %4 = vector.broadcast %3 : vector<16x1xf32> to vector<16x64xf32>
    %5 = arith.mulf %2, %4 : vector<16x64xf32>
    %c0_5 = arith.constant 0 : index
    %c0_6 = arith.constant 0 : index
    %6 = vector.load %arg3[%c0_5, %c0_6] : memref<16x1xf32, #tpu.memory_space<vmem>>, vector<16x1xf32>
    %7 = vector.broadcast %6 : vector<16x1xf32> to vector<16x64xf32>
    %8 = arith.addf %5, %7 : vector<16x64xf32>
    %cst_7 = arith.constant 0.000000e+00 : f32
    %9 = vector.broadcast %cst_7 : f32 to vector<16x64xf32>
    %10 = arith.maximumf %8, %9 : vector<16x64xf32>
    %c0_8 = arith.constant 0 : index
    %c0_9 = arith.constant 0 : index
    %11 = vector.load %arg4[%c0_8, %c0_9] : memref<16x64xf32, #tpu.memory_space<vmem>>, vector<16x64xf32>
    tpu.vector_store %arg4[%c0_8, %c0_9], %10 {strides = array<i32>} : memref<16x64xf32, #tpu.memory_space<vmem>>, vector<16x64xf32>,
    return
  }
}

module attributes {stable_mosaic.version = 11 : i64} {
  func.func @kernel(%arg0: memref<32x144xbf16, #tpu.memory_space<vmem>>, %arg1: memref<144x16xbf16, #tpu.memory_space<vmem>>, %arg2: memref<32x1xf32, #tpu.memory_space<vmem>>, %arg3: memref<32x1xf32, #tpu.memory_space<vmem>>, %arg4: memref<32x16xf32, #tpu.memory_space<vmem>>) attributes {dimension_semantics = [], scalar_prefetch = 0 : i64, scratch_operands = 0 : i64, tpu.core_type = #tpu.core_type<tc>} {
    %c0 = arith.constant 0 : index
    %c0_0 = arith.constant 0 : index
    %0 = vector.load %arg0[%c0, %c0_0] : memref<32x144xbf16, #tpu.memory_space<vmem>>, vector<32x144xbf16>
    %c0_1 = arith.constant 0 : index
    %c0_2 = arith.constant 0 : index
    %1 = vector.load %arg1[%c0_1, %c0_2] : memref<144x16xbf16, #tpu.memory_space<vmem>>, vector<144x16xbf16>
    %cst = arith.constant dense<0.000000e+00> : vector<32x16xf32>
    %2 = tpu.matmul %0, %1, %cst {dimension_numbers = #tpu.dot_dimension_numbers<[1], [0], [0], [1], [0, 0, 1, 1], [], []>} : vector<32x144xbf16>, vector<144x16xbf16>, vector<32x16xf32> -> vector<32x16xf32>
    %c0_3 = arith.constant 0 : index
    %c0_4 = arith.constant 0 : index
    %3 = vector.load %arg2[%c0_3, %c0_4] : memref<32x1xf32, #tpu.memory_space<vmem>>, vector<32x1xf32>
    %4 = vector.broadcast %3 : vector<32x1xf32> to vector<32x16xf32>
    %5 = arith.mulf %2, %4 : vector<32x16xf32>
    %c0_5 = arith.constant 0 : index
    %c0_6 = arith.constant 0 : index
    %6 = vector.load %arg3[%c0_5, %c0_6] : memref<32x1xf32, #tpu.memory_space<vmem>>, vector<32x1xf32>
    %7 = vector.broadcast %6 : vector<32x1xf32> to vector<32x16xf32>
    %8 = arith.addf %5, %7 : vector<32x16xf32>
    %cst_7 = arith.constant 0.000000e+00 : f32
    %9 = vector.broadcast %cst_7 : f32 to vector<32x16xf32>
    %10 = arith.maximumf %8, %9 : vector<32x16xf32>
    %c0_8 = arith.constant 0 : index
    %c0_9 = arith.constant 0 : index
    %11 = vector.load %arg4[%c0_8, %c0_9] : memref<32x16xf32, #tpu.memory_space<vmem>>, vector<32x16xf32>
    tpu.vector_store %arg4[%c0_8, %c0_9], %10 {strides = array<i32>} : memref<32x16xf32, #tpu.memory_space<vmem>>, vector<32x16xf32>,
    return
  }
}

module attributes {stable_mosaic.version = 11 : i64} {
  func.func @kernel(%arg0: memref<32x16xbf16, #tpu.memory_space<vmem>>, %arg1: memref<16x16xbf16, #tpu.memory_space<vmem>>, %arg2: memref<32x1xf32, #tpu.memory_space<vmem>>, %arg3: memref<32x1xf32, #tpu.memory_space<vmem>>, %arg4: memref<32x16xf32, #tpu.memory_space<vmem>>) attributes {dimension_semantics = [], scalar_prefetch = 0 : i64, scratch_operands = 0 : i64, tpu.core_type = #tpu.core_type<tc>} {
    %c0 = arith.constant 0 : index
    %c0_0 = arith.constant 0 : index
    %0 = vector.load %arg0[%c0, %c0_0] : memref<32x16xbf16, #tpu.memory_space<vmem>>, vector<32x16xbf16>
    %c0_1 = arith.constant 0 : index
    %c0_2 = arith.constant 0 : index
    %1 = vector.load %arg1[%c0_1, %c0_2] : memref<16x16xbf16, #tpu.memory_space<vmem>>, vector<16x16xbf16>
    %cst = arith.constant dense<0.000000e+00> : vector<32x16xf32>
    %2 = tpu.matmul %0, %1, %cst {dimension_numbers = #tpu.dot_dimension_numbers<[1], [0], [0], [1], [0, 0, 1, 1], [], []>} : vector<32x16xbf16>, vector<16x16xbf16>, vector<32x16xf32> -> vector<32x16xf32>
    %c0_3 = arith.constant 0 : index
    %c0_4 = arith.constant 0 : index
    %3 = vector.load %arg2[%c0_3, %c0_4] : memref<32x1xf32, #tpu.memory_space<vmem>>, vector<32x1xf32>
    %4 = vector.broadcast %3 : vector<32x1xf32> to vector<32x16xf32>
    %5 = arith.mulf %2, %4 : vector<32x16xf32>
    %c0_5 = arith.constant 0 : index
    %c0_6 = arith.constant 0 : index
    %6 = vector.load %arg3[%c0_5, %c0_6] : memref<32x1xf32, #tpu.memory_space<vmem>>, vector<32x1xf32>
    %7 = vector.broadcast %6 : vector<32x1xf32> to vector<32x16xf32>
    %8 = arith.addf %5, %7 : vector<32x16xf32>
    %c0_7 = arith.constant 0 : index
    %c0_8 = arith.constant 0 : index
    %9 = vector.load %arg4[%c0_7, %c0_8] : memref<32x16xf32, #tpu.memory_space<vmem>>, vector<32x16xf32>
    tpu.vector_store %arg4[%c0_7, %c0_8], %8 {strides = array<i32>} : memref<32x16xf32, #tpu.memory_space<vmem>>, vector<32x16xf32>,
    return
  }
}

module attributes {stable_mosaic.version = 11 : i64} {
  func.func @kernel(%arg0: memref<32x288xbf16, #tpu.memory_space<vmem>>, %arg1: memref<288x16xbf16, #tpu.memory_space<vmem>>, %arg2: memref<32x1xf32, #tpu.memory_space<vmem>>, %arg3: memref<32x1xf32, #tpu.memory_space<vmem>>, %arg4: memref<32x16xf32, #tpu.memory_space<vmem>>, %arg5: memref<32x16xf32, #tpu.memory_space<vmem>>) attributes {dimension_semantics = [], scalar_prefetch = 0 : i64, scratch_operands = 0 : i64, tpu.core_type = #tpu.core_type<tc>} {
    %c0 = arith.constant 0 : index
    %c0_0 = arith.constant 0 : index
    %0 = vector.load %arg0[%c0, %c0_0] : memref<32x288xbf16, #tpu.memory_space<vmem>>, vector<32x288xbf16>
    %c0_1 = arith.constant 0 : index
    %c0_2 = arith.constant 0 : index
    %1 = vector.load %arg1[%c0_1, %c0_2] : memref<288x16xbf16, #tpu.memory_space<vmem>>, vector<288x16xbf16>
    %cst = arith.constant dense<0.000000e+00> : vector<32x16xf32>
    %2 = tpu.matmul %0, %1, %cst {dimension_numbers = #tpu.dot_dimension_numbers<[1], [0], [0], [1], [0, 0, 1, 1], [], []>} : vector<32x288xbf16>, vector<288x16xbf16>, vector<32x16xf32> -> vector<32x16xf32>
    %c0_3 = arith.constant 0 : index
    %c0_4 = arith.constant 0 : index
    %3 = vector.load %arg2[%c0_3, %c0_4] : memref<32x1xf32, #tpu.memory_space<vmem>>, vector<32x1xf32>
    %4 = vector.broadcast %3 : vector<32x1xf32> to vector<32x16xf32>
    %5 = arith.mulf %2, %4 : vector<32x16xf32>
    %c0_5 = arith.constant 0 : index
    %c0_6 = arith.constant 0 : index
    %6 = vector.load %arg3[%c0_5, %c0_6] : memref<32x1xf32, #tpu.memory_space<vmem>>, vector<32x1xf32>
    %7 = vector.broadcast %6 : vector<32x1xf32> to vector<32x16xf32>
    %8 = arith.addf %5, %7 : vector<32x16xf32>
    %c0_7 = arith.constant 0 : index
    %c0_8 = arith.constant 0 : index
    %9 = vector.load %arg4[%c0_7, %c0_8] : memref<32x16xf32, #tpu.memory_space<vmem>>, vector<32x16xf32>
    %10 = arith.addf %8, %9 : vector<32x16xf32>
    %cst_9 = arith.constant 0.000000e+00 : f32
    %11 = vector.broadcast %cst_9 : f32 to vector<32x16xf32>
    %12 = arith.maximumf %10, %11 : vector<32x16xf32>
    %c0_10 = arith.constant 0 : index
    %c0_11 = arith.constant 0 : index
    %13 = vector.load %arg5[%c0_10, %c0_11] : memref<32x16xf32, #tpu.memory_space<vmem>>, vector<32x16xf32>
    tpu.vector_store %arg5[%c0_10, %c0_11], %12 {strides = array<i32>} : memref<32x16xf32, #tpu.memory_space<vmem>>, vector<32x16xf32>,
    return
  }
}

module attributes {stable_mosaic.version = 11 : i64} {
  func.func @kernel(%arg0: memref<32x288xbf16, #tpu.memory_space<vmem>>, %arg1: memref<288x16xbf16, #tpu.memory_space<vmem>>, %arg2: memref<32x1xf32, #tpu.memory_space<vmem>>, %arg3: memref<32x1xf32, #tpu.memory_space<vmem>>, %arg4: memref<32x16xf32, #tpu.memory_space<vmem>>) attributes {dimension_semantics = [], scalar_prefetch = 0 : i64, scratch_operands = 0 : i64, tpu.core_type = #tpu.core_type<tc>} {
    %c0 = arith.constant 0 : index
    %c0_0 = arith.constant 0 : index
    %0 = vector.load %arg0[%c0, %c0_0] : memref<32x288xbf16, #tpu.memory_space<vmem>>, vector<32x288xbf16>
    %c0_1 = arith.constant 0 : index
    %c0_2 = arith.constant 0 : index
    %1 = vector.load %arg1[%c0_1, %c0_2] : memref<288x16xbf16, #tpu.memory_space<vmem>>, vector<288x16xbf16>
    %cst = arith.constant dense<0.000000e+00> : vector<32x16xf32>
    %2 = tpu.matmul %0, %1, %cst {dimension_numbers = #tpu.dot_dimension_numbers<[1], [0], [0], [1], [0, 0, 1, 1], [], []>} : vector<32x288xbf16>, vector<288x16xbf16>, vector<32x16xf32> -> vector<32x16xf32>
    %c0_3 = arith.constant 0 : index
    %c0_4 = arith.constant 0 : index
    %3 = vector.load %arg2[%c0_3, %c0_4] : memref<32x1xf32, #tpu.memory_space<vmem>>, vector<32x1xf32>
    %4 = vector.broadcast %3 : vector<32x1xf32> to vector<32x16xf32>
    %5 = arith.mulf %2, %4 : vector<32x16xf32>
    %c0_5 = arith.constant 0 : index
    %c0_6 = arith.constant 0 : index
    %6 = vector.load %arg3[%c0_5, %c0_6] : memref<32x1xf32, #tpu.memory_space<vmem>>, vector<32x1xf32>
    %7 = vector.broadcast %6 : vector<32x1xf32> to vector<32x16xf32>
    %8 = arith.addf %5, %7 : vector<32x16xf32>
    %cst_7 = arith.constant 0.000000e+00 : f32
    %9 = vector.broadcast %cst_7 : f32 to vector<32x16xf32>
    %10 = arith.maximumf %8, %9 : vector<32x16xf32>
    %c0_8 = arith.constant 0 : index
    %c0_9 = arith.constant 0 : index
    %11 = vector.load %arg4[%c0_8, %c0_9] : memref<32x16xf32, #tpu.memory_space<vmem>>, vector<32x16xf32>
    tpu.vector_store %arg4[%c0_8, %c0_9], %10 {strides = array<i32>} : memref<32x16xf32, #tpu.memory_space<vmem>>, vector<32x16xf32>,
    return
  }
}

module attributes {stable_mosaic.version = 11 : i64} {
  func.func @kernel(%arg0: memref<2x4x64xf32, #tpu.memory_space<vmem>>, %arg1: memref<8x4xf32, #tpu.memory_space<vmem>>, %arg2: memref<64x64xf32, #tpu.memory_space<vmem>>, %arg3: memref<2x8x64xf32, #tpu.memory_space<vmem>>) attributes {dimension_semantics = [], scalar_prefetch = 0 : i64, scratch_operands = 0 : i64, tpu.core_type = #tpu.core_type<tc>} {
    %c0 = arith.constant 0 : index
    %c0_0 = arith.constant 0 : index
    %0 = vector.load %arg1[%c0, %c0_0] : memref<8x4xf32, #tpu.memory_space<vmem>>, vector<8x4xf32>
    %c0_1 = arith.constant 0 : index
    %c0_2 = arith.constant 0 : index
    %c0_3 = arith.constant 0 : index
    %1 = vector.load %arg0[%c0_1, %c0_2, %c0_3] : memref<2x4x64xf32, #tpu.memory_space<vmem>>, vector<1x4x64xf32>
    %2 = vector.shape_cast %1 : vector<1x4x64xf32> to vector<4x64xf32>
    %cst = arith.constant dense<0.000000e+00> : vector<8x64xf32>
    %3 = tpu.matmul %0, %2, %cst {dimension_numbers = #tpu.dot_dimension_numbers<[1], [0], [0], [1], [0, 0, 1, 1], [], []>} : vector<8x4xf32>, vector<4x64xf32>, vector<8x64xf32> -> vector<8x64xf32>
    %c0_4 = arith.constant 0 : index
    %c0_5 = arith.constant 0 : index
    %4 = vector.load %arg2[%c0_4, %c0_5] : memref<64x64xf32, #tpu.memory_space<vmem>>, vector<64x64xf32>
    %cst_6 = arith.constant dense<0.000000e+00> : vector<8x64xf32>
    %5 = tpu.matmul %3, %4, %cst_6 {dimension_numbers = #tpu.dot_dimension_numbers<[1], [0], [0], [1], [0, 0, 1, 1], [], []>} : vector<8x64xf32>, vector<64x64xf32>, vector<8x64xf32> -> vector<8x64xf32>
    %c0_7 = arith.constant 0 : index
    %c0_8 = arith.constant 0 : index
    %c0_9 = arith.constant 0 : index
    %6 = vector.load %arg3[%c0_7, %c0_8, %c0_9] : memref<2x8x64xf32, #tpu.memory_space<vmem>>, vector<1x8x64xf32>
    %7 = vector.shape_cast %6 : vector<1x8x64xf32> to vector<8x64xf32>
    %8 = vector.shape_cast %5 : vector<8x64xf32> to vector<1x8x64xf32>
    tpu.vector_store %arg3[%c0_7, %c0_8, %c0_9], %8 {strides = array<i32>} : memref<2x8x64xf32, #tpu.memory_space<vmem>>, vector<1x8x64xf32>,
    %c0_10 = arith.constant 0 : index
    %c0_11 = arith.constant 0 : index
    %9 = vector.load %arg1[%c0_10, %c0_11] : memref<8x4xf32, #tpu.memory_space<vmem>>, vector<8x4xf32>
    %c1 = arith.constant 1 : index
    %c0_12 = arith.constant 0 : index
    %c0_13 = arith.constant 0 : index
    %10 = vector.load %arg0[%c1, %c0_12, %c0_13] : memref<2x4x64xf32, #tpu.memory_space<vmem>>, vector<1x4x64xf32>
    %11 = vector.shape_cast %10 : vector<1x4x64xf32> to vector<4x64xf32>
    %cst_14 = arith.constant dense<0.000000e+00> : vector<8x64xf32>
    %12 = tpu.matmul %9, %11, %cst_14 {dimension_numbers = #tpu.dot_dimension_numbers<[1], [0], [0], [1], [0, 0, 1, 1], [], []>} : vector<8x4xf32>, vector<4x64xf32>, vector<8x64xf32> -> vector<8x64xf32>
    %c0_15 = arith.constant 0 : index
    %c0_16 = arith.constant 0 : index
    %13 = vector.load %arg2[%c0_15, %c0_16] : memref<64x64xf32, #tpu.memory_space<vmem>>, vector<64x64xf32>
    %cst_17 = arith.constant dense<0.000000e+00> : vector<8x64xf32>
    %14 = tpu.matmul %12, %13, %cst_17 {dimension_numbers = #tpu.dot_dimension_numbers<[1], [0], [0], [1], [0, 0, 1, 1], [], []>} : vector<8x64xf32>, vector<64x64xf32>, vector<8x64xf32> -> vector<8x64xf32>
    %c1_18 = arith.constant 1 : index
    %c0_19 = arith.constant 0 : index
    %c0_20 = arith.constant 0 : index
    %15 = vector.load %arg3[%c1_18, %c0_19, %c0_20] : memref<2x8x64xf32, #tpu.memory_space<vmem>>, vector<1x8x64xf32>
    %16 = vector.shape_cast %15 : vector<1x8x64xf32> to vector<8x64xf32>
    %17 = vector.shape_cast %14 : vector<8x64xf32> to vector<1x8x64xf32>
    tpu.vector_store %arg3[%c1_18, %c0_19, %c0_20], %17 {strides = array<i32>} : memref<2x8x64xf32, #tpu.memory_space<vmem>>, vector<1x8x64xf32>,
    return
  }
}

module attributes {stable_mosaic.version = 11 : i64} {
  func.func @kernel(%arg0: memref<8x2x2x64xbf16, #tpu.memory_space<vmem>>, %arg1: memref<64x128xbf16, #tpu.memory_space<vmem>>, %arg2: memref<32x128xbf16, #tpu.memory_space<vmem>>, %arg3: memref<1x128xf32, #tpu.memory_space<vmem>>, %arg4: memref<64x128xbf16, #tpu.memory_space<vmem>>, %arg5: memref<32x128xbf16, #tpu.memory_space<vmem>>, %arg6: memref<1x128xf32, #tpu.memory_space<vmem>>, %arg7: memref<8x2x2x32xf32, #tpu.memory_space<vmem>>) attributes {dimension_semantics = [], scalar_prefetch = 0 : i64, scratch_operands = 0 : i64, tpu.core_type = #tpu.core_type<tc>} {
    %cst = arith.constant 0.000000e+00 : f32
    %0 = vector.broadcast %cst : f32 to vector<2x32xf32>
    %c0 = arith.constant 0 : index
    %c0_0 = arith.constant 0 : index
    %c0_1 = arith.constant 0 : index
    %c0_2 = arith.constant 0 : index
    %1 = vector.load %arg0[%c0, %c0_0, %c0_1, %c0_2] : memref<8x2x2x64xbf16, #tpu.memory_space<vmem>>, vector<1x1x2x64xbf16>
    %2 = vector.shape_cast %1 : vector<1x1x2x64xbf16> to vector<2x64xbf16>
    %c0_3 = arith.constant 0 : index
    %c0_4 = arith.constant 0 : index
    %3 = vector.load %arg1[%c0_3, %c0_4] : memref<64x128xbf16, #tpu.memory_space<vmem>>, vector<64x128xbf16>
    %cst_5 = arith.constant dense<0.000000e+00> : vector<2x128xf32>
    %4 = tpu.matmul %2, %3, %cst_5 {dimension_numbers = #tpu.dot_dimension_numbers<[1], [0], [0], [1], [0, 0, 1, 1], [], []>} : vector<2x64xbf16>, vector<64x128xbf16>, vector<2x128xf32> -> vector<2x128xf32>
    %5 = arith.truncf %0 : vector<2x32xf32> to vector<2x32xbf16>
    %c0_6 = arith.constant 0 : index
    %c0_7 = arith.constant 0 : index
    %6 = vector.load %arg2[%c0_6, %c0_7] : memref<32x128xbf16, #tpu.memory_space<vmem>>, vector<32x128xbf16>
    %cst_8 = arith.constant dense<0.000000e+00> : vector<2x128xf32>
    %7 = tpu.matmul %5, %6, %cst_8 {dimension_numbers = #tpu.dot_dimension_numbers<[1], [0], [0], [1], [0, 0, 1, 1], [], []>} : vector<2x32xbf16>, vector<32x128xbf16>, vector<2x128xf32> -> vector<2x128xf32>
    %8 = arith.addf %4, %7 : vector<2x128xf32>
    %c0_9 = arith.constant 0 : index
    %c0_10 = arith.constant 0 : index
    %9 = vector.load %arg3[%c0_9, %c0_10] : memref<1x128xf32, #tpu.memory_space<vmem>>, vector<1x128xf32>
    %10 = vector.broadcast %9 : vector<1x128xf32> to vector<2x128xf32>
    %11 = arith.addf %8, %10 : vector<2x128xf32>
    %12 = vector.extract_strided_slice %11 {offsets = [0, 0], sizes = [2, 32], strides = [1, 1]} : vector<2x128xf32> to vector<2x32xf32>
    %13 = arith.negf %12 : vector<2x32xf32>
    %14 = math.exp %13 : vector<2x32xf32>
    %cst_11 = arith.constant 1.000000e+00 : f32
    %15 = vector.broadcast %cst_11 : f32 to vector<2x32xf32>
    %16 = arith.addf %15, %14 : vector<2x32xf32>
    %17 = arith.divf %15, %16 : vector<2x32xf32>
    %18 = vector.extract_strided_slice %11 {offsets = [0, 32], sizes = [2, 32], strides = [1, 1]} : vector<2x128xf32> to vector<2x32xf32>
    %19 = arith.negf %18 : vector<2x32xf32>
    %20 = math.exp %19 : vector<2x32xf32>
    %cst_12 = arith.constant 1.000000e+00 : f32
    %21 = vector.broadcast %cst_12 : f32 to vector<2x32xf32>
    %22 = arith.addf %21, %20 : vector<2x32xf32>
    %23 = arith.divf %21, %22 : vector<2x32xf32>
    %24 = vector.extract_strided_slice %11 {offsets = [0, 64], sizes = [2, 32], strides = [1, 1]} : vector<2x128xf32> to vector<2x32xf32>
    %25 = math.tanh %24 : vector<2x32xf32>
    %26 = vector.extract_strided_slice %11 {offsets = [0, 96], sizes = [2, 32], strides = [1, 1]} : vector<2x128xf32> to vector<2x32xf32>
    %27 = arith.negf %26 : vector<2x32xf32>
    %28 = math.exp %27 : vector<2x32xf32>
    %cst_13 = arith.constant 1.000000e+00 : f32
    %29 = vector.broadcast %cst_13 : f32 to vector<2x32xf32>
    %30 = arith.addf %29, %28 : vector<2x32xf32>
    %31 = arith.divf %29, %30 : vector<2x32xf32>
    %32 = arith.mulf %23, %0 : vector<2x32xf32>
    %33 = arith.mulf %17, %25 : vector<2x32xf32>
    %34 = arith.addf %32, %33 : vector<2x32xf32>
    %35 = math.tanh %34 : vector<2x32xf32>
    %36 = arith.mulf %31, %35 : vector<2x32xf32>
    %c0_14 = arith.constant 0 : index
    %c1 = arith.constant 1 : index
    %c0_15 = arith.constant 0 : index
    %c0_16 = arith.constant 0 : index
    %37 = vector.load %arg0[%c0_14, %c1, %c0_15, %c0_16] : memref<8x2x2x64xbf16, #tpu.memory_space<vmem>>, vector<1x1x2x64xbf16>
    %38 = vector.shape_cast %37 : vector<1x1x2x64xbf16> to vector<2x64xbf16>
    %c0_17 = arith.constant 0 : index
    %c0_18 = arith.constant 0 : index
    %39 = vector.load %arg4[%c0_17, %c0_18] : memref<64x128xbf16, #tpu.memory_space<vmem>>, vector<64x128xbf16>
    %cst_19 = arith.constant dense<0.000000e+00> : vector<2x128xf32>
    %40 = tpu.matmul %38, %39, %cst_19 {dimension_numbers = #tpu.dot_dimension_numbers<[1], [0], [0], [1], [0, 0, 1, 1], [], []>} : vector<2x64xbf16>, vector<64x128xbf16>, vector<2x128xf32> -> vector<2x128xf32>
    %41 = arith.truncf %0 : vector<2x32xf32> to vector<2x32xbf16>
    %c0_20 = arith.constant 0 : index
    %c0_21 = arith.constant 0 : index
    %42 = vector.load %arg5[%c0_20, %c0_21] : memref<32x128xbf16, #tpu.memory_space<vmem>>, vector<32x128xbf16>
    %cst_22 = arith.constant dense<0.000000e+00> : vector<2x128xf32>
    %43 = tpu.matmul %41, %42, %cst_22 {dimension_numbers = #tpu.dot_dimension_numbers<[1], [0], [0], [1], [0, 0, 1, 1], [], []>} : vector<2x32xbf16>, vector<32x128xbf16>, vector<2x128xf32> -> vector<2x128xf32>
    %44 = arith.addf %40, %43 : vector<2x128xf32>
    %c0_23 = arith.constant 0 : index
    %c0_24 = arith.constant 0 : index
    %45 = vector.load %arg6[%c0_23, %c0_24] : memref<1x128xf32, #tpu.memory_space<vmem>>, vector<1x128xf32>
    %46 = vector.broadcast %45 : vector<1x128xf32> to vector<2x128xf32>
    %47 = arith.addf %44, %46 : vector<2x128xf32>
    %48 = vector.extract_strided_slice %47 {offsets = [0, 0], sizes = [2, 32], strides = [1, 1]} : vector<2x128xf32> to vector<2x32xf32>
    %49 = arith.negf %48 : vector<2x32xf32>
    %50 = math.exp %49 : vector<2x32xf32>
    %cst_25 = arith.constant 1.000000e+00 : f32
    %51 = vector.broadcast %cst_25 : f32 to vector<2x32xf32>
    %52 = arith.addf %51, %50 : vector<2x32xf32>
    %53 = arith.divf %51, %52 : vector<2x32xf32>
    %54 = vector.extract_strided_slice %47 {offsets = [0, 32], sizes = [2, 32], strides = [1, 1]} : vector<2x128xf32> to vector<2x32xf32>
    %55 = arith.negf %54 : vector<2x32xf32>
    %56 = math.exp %55 : vector<2x32xf32>
    %cst_26 = arith.constant 1.000000e+00 : f32
    %57 = vector.broadcast %cst_26 : f32 to vector<2x32xf32>
    %58 = arith.addf %57, %56 : vector<2x32xf32>
    %59 = arith.divf %57, %58 : vector<2x32xf32>
    %60 = vector.extract_strided_slice %47 {offsets = [0, 64], sizes = [2, 32], strides = [1, 1]} : vector<2x128xf32> to vector<2x32xf32>
    %61 = math.tanh %60 : vector<2x32xf32>
    %62 = vector.extract_strided_slice %47 {offsets = [0, 96], sizes = [2, 32], strides = [1, 1]} : vector<2x128xf32> to vector<2x32xf32>
    %63 = arith.negf %62 : vector<2x32xf32>
    %64 = math.exp %63 : vector<2x32xf32>
    %cst_27 = arith.constant 1.000000e+00 : f32
    %65 = vector.broadcast %cst_27 : f32 to vector<2x32xf32>
    %66 = arith.addf %65, %64 : vector<2x32xf32>
    %67 = arith.divf %65, %66 : vector<2x32xf32>
    %68 = arith.mulf %59, %0 : vector<2x32xf32>
    %69 = arith.mulf %53, %61 : vector<2x32xf32>
    %70 = arith.addf %68, %69 : vector<2x32xf32>
    %71 = math.tanh %70 : vector<2x32xf32>
    %72 = arith.mulf %67, %71 : vector<2x32xf32>
    %c0_28 = arith.constant 0 : index
    %c0_29 = arith.constant 0 : index
    %c0_30 = arith.constant 0 : index
    %c0_31 = arith.constant 0 : index
    %73 = vector.load %arg7[%c0_28, %c0_29, %c0_30, %c0_31] : memref<8x2x2x32xf32, #tpu.memory_space<vmem>>, vector<1x1x2x32xf32>
    %74 = vector.shape_cast %73 : vector<1x1x2x32xf32> to vector<2x32xf32>
    %75 = vector.shape_cast %36 : vector<2x32xf32> to vector<1x1x2x32xf32>
    tpu.vector_store %arg7[%c0_28, %c0_29, %c0_30, %c0_31], %75 {strides = array<i32>} : memref<8x2x2x32xf32, #tpu.memory_space<vmem>>, vector<1x1x2x32xf32>,
    %c0_32 = arith.constant 0 : index
    %c1_33 = arith.constant 1 : index
    %c0_34 = arith.constant 0 : index
    %c0_35 = arith.constant 0 : index
    %76 = vector.load %arg7[%c0_32, %c1_33, %c0_34, %c0_35] : memref<8x2x2x32xf32, #tpu.memory_space<vmem>>, vector<1x1x2x32xf32>
    %77 = vector.shape_cast %76 : vector<1x1x2x32xf32> to vector<2x32xf32>
    %78 = vector.shape_cast %72 : vector<2x32xf32> to vector<1x1x2x32xf32>
    tpu.vector_store %arg7[%c0_32, %c1_33, %c0_34, %c0_35], %78 {strides = array<i32>} : memref<8x2x2x32xf32, #tpu.memory_space<vmem>>, vector<1x1x2x32xf32>,
    %c1_36 = arith.constant 1 : index
    %c0_37 = arith.constant 0 : index
    %c0_38 = arith.constant 0 : index
    %c0_39 = arith.constant 0 : index
    %79 = vector.load %arg0[%c1_36, %c0_37, %c0_38, %c0_39] : memref<8x2x2x64xbf16, #tpu.memory_space<vmem>>, vector<1x1x2x64xbf16>
    %80 = vector.shape_cast %79 : vector<1x1x2x64xbf16> to vector<2x64xbf16>
    %c0_40 = arith.constant 0 : index
    %c0_41 = arith.constant 0 : index
    %81 = vector.load %arg1[%c0_40, %c0_41] : memref<64x128xbf16, #tpu.memory_space<vmem>>, vector<64x128xbf16>
    %cst_42 = arith.constant dense<0.000000e+00> : vector<2x128xf32>
    %82 = tpu.matmul %80, %81, %cst_42 {dimension_numbers = #tpu.dot_dimension_numbers<[1], [0], [0], [1], [0, 0, 1, 1], [], []>} : vector<2x64xbf16>, vector<64x128xbf16>, vector<2x128xf32> -> vector<2x128xf32>
    %83 = arith.truncf %36 : vector<2x32xf32> to vector<2x32xbf16>
    %c0_43 = arith.constant 0 : index
    %c0_44 = arith.constant 0 : index
    %84 = vector.load %arg2[%c0_43, %c0_44] : memref<32x128xbf16, #tpu.memory_space<vmem>>, vector<32x128xbf16>
    %cst_45 = arith.constant dense<0.000000e+00> : vector<2x128xf32>
    %85 = tpu.matmul %83, %84, %cst_45 {dimension_numbers = #tpu.dot_dimension_numbers<[1], [0], [0], [1], [0, 0, 1, 1], [], []>} : vector<2x32xbf16>, vector<32x128xbf16>, vector<2x128xf32> -> vector<2x128xf32>
    %86 = arith.addf %82, %85 : vector<2x128xf32>
    %c0_46 = arith.constant 0 : index
    %c0_47 = arith.constant 0 : index
    %87 = vector.load %arg3[%c0_46, %c0_47] : memref<1x128xf32, #tpu.memory_space<vmem>>, vector<1x128xf32>
    %88 = vector.broadcast %87 : vector<1x128xf32> to vector<2x128xf32>
    %89 = arith.addf %86, %88 : vector<2x128xf32>
    %90 = vector.extract_strided_slice %89 {offsets = [0, 0], sizes = [2, 32], strides = [1, 1]} : vector<2x128xf32> to vector<2x32xf32>
    %91 = arith.negf %90 : vector<2x32xf32>
    %92 = math.exp %91 : vector<2x32xf32>
    %cst_48 = arith.constant 1.000000e+00 : f32
    %93 = vector.broadcast %cst_48 : f32 to vector<2x32xf32>
    %94 = arith.addf %93, %92 : vector<2x32xf32>
    %95 = arith.divf %93, %94 : vector<2x32xf32>
    %96 = vector.extract_strided_slice %89 {offsets = [0, 32], sizes = [2, 32], strides = [1, 1]} : vector<2x128xf32> to vector<2x32xf32>
    %97 = arith.negf %96 : vector<2x32xf32>
    %98 = math.exp %97 : vector<2x32xf32>
    %cst_49 = arith.constant 1.000000e+00 : f32
    %99 = vector.broadcast %cst_49 : f32 to vector<2x32xf32>
    %100 = arith.addf %99, %98 : vector<2x32xf32>
    %101 = arith.divf %99, %100 : vector<2x32xf32>
    %102 = vector.extract_strided_slice %89 {offsets = [0, 64], sizes = [2, 32], strides = [1, 1]} : vector<2x128xf32> to vector<2x32xf32>
    %103 = math.tanh %102 : vector<2x32xf32>
    %104 = vector.extract_strided_slice %89 {offsets = [0, 96], sizes = [2, 32], strides = [1, 1]} : vector<2x128xf32> to vector<2x32xf32>
    %105 = arith.negf %104 : vector<2x32xf32>
    %106 = math.exp %105 : vector<2x32xf32>
    %cst_50 = arith.constant 1.000000e+00 : f32
    %107 = vector.broadcast %cst_50 : f32 to vector<2x32xf32>
    %108 = arith.addf %107, %106 : vector<2x32xf32>
    %109 = arith.divf %107, %108 : vector<2x32xf32>
    %110 = arith.mulf %101, %34 : vector<2x32xf32>
    %111 = arith.mulf %95, %103 : vector<2x32xf32>
    %112 = arith.addf %110, %111 : vector<2x32xf32>
    %113 = math.tanh %112 : vector<2x32xf32>
    %114 = arith.mulf %109, %113 : vector<2x32xf32>
    %c1_51 = arith.constant 1 : index
    %c1_52 = arith.constant 1 : index
    %c0_53 = arith.constant 0 : index
    %c0_54 = arith.constant 0 : index
    %115 = vector.load %arg0[%c1_51, %c1_52, %c0_53, %c0_54] : memref<8x2x2x64xbf16, #tpu.memory_space<vmem>>, vector<1x1x2x64xbf16>
    %116 = vector.shape_cast %115 : vector<1x1x2x64xbf16> to vector<2x64xbf16>
    %c0_55 = arith.constant 0 : index
    %c0_56 = arith.constant 0 : index
    %117 = vector.load %arg4[%c0_55, %c0_56] : memref<64x128xbf16, #tpu.memory_space<vmem>>, vector<64x128xbf16>
    %cst_57 = arith.constant dense<0.000000e+00> : vector<2x128xf32>
    %118 = tpu.matmul %116, %117, %cst_57 {dimension_numbers = #tpu.dot_dimension_numbers<[1], [0], [0], [1], [0, 0, 1, 1], [], []>} : vector<2x64xbf16>, vector<64x128xbf16>, vector<2x128xf32> -> vector<2x128xf32>
    %119 = arith.truncf %72 : vector<2x32xf32> to vector<2x32xbf16>
    %c0_58 = arith.constant 0 : index
    %c0_59 = arith.constant 0 : index
    %120 = vector.load %arg5[%c0_58, %c0_59] : memref<32x128xbf16, #tpu.memory_space<vmem>>, vector<32x128xbf16>
    %cst_60 = arith.constant dense<0.000000e+00> : vector<2x128xf32>
    %121 = tpu.matmul %119, %120, %cst_60 {dimension_numbers = #tpu.dot_dimension_numbers<[1], [0], [0], [1], [0, 0, 1, 1], [], []>} : vector<2x32xbf16>, vector<32x128xbf16>, vector<2x128xf32> -> vector<2x128xf32>
    %122 = arith.addf %118, %121 : vector<2x128xf32>
    %c0_61 = arith.constant 0 : index
    %c0_62 = arith.constant 0 : index
    %123 = vector.load %arg6[%c0_61, %c0_62] : memref<1x128xf32, #tpu.memory_space<vmem>>, vector<1x128xf32>
    %124 = vector.broadcast %123 : vector<1x128xf32> to vector<2x128xf32>
    %125 = arith.addf %122, %124 : vector<2x128xf32>
    %126 = vector.extract_strided_slice %125 {offsets = [0, 0], sizes = [2, 32], strides = [1, 1]} : vector<2x128xf32> to vector<2x32xf32>
    %127 = arith.negf %126 : vector<2x32xf32>
    %128 = math.exp %127 : vector<2x32xf32>
    %cst_63 = arith.constant 1.000000e+00 : f32
    %129 = vector.broadcast %cst_63 : f32 to vector<2x32xf32>
    %130 = arith.addf %129, %128 : vector<2x32xf32>
    %131 = arith.divf %129, %130 : vector<2x32xf32>
    %132 = vector.extract_strided_slice %125 {offsets = [0, 32], sizes = [2, 32], strides = [1, 1]} : vector<2x128xf32> to vector<2x32xf32>
    %133 = arith.negf %132 : vector<2x32xf32>
    %134 = math.exp %133 : vector<2x32xf32>
    %cst_64 = arith.constant 1.000000e+00 : f32
    %135 = vector.broadcast %cst_64 : f32 to vector<2x32xf32>
    %136 = arith.addf %135, %134 : vector<2x32xf32>
    %137 = arith.divf %135, %136 : vector<2x32xf32>
    %138 = vector.extract_strided_slice %125 {offsets = [0, 64], sizes = [2, 32], strides = [1, 1]} : vector<2x128xf32> to vector<2x32xf32>
    %139 = math.tanh %138 : vector<2x32xf32>
    %140 = vector.extract_strided_slice %125 {offsets = [0, 96], sizes = [2, 32], strides = [1, 1]} : vector<2x128xf32> to vector<2x32xf32>
    %141 = arith.negf %140 : vector<2x32xf32>
    %142 = math.exp %141 : vector<2x32xf32>
    %cst_65 = arith.constant 1.000000e+00 : f32
    %143 = vector.broadcast %cst_65 : f32 to vector<2x32xf32>
    %144 = arith.addf %143, %142 : vector<2x32xf32>
    %145 = arith.divf %143, %144 : vector<2x32xf32>
    %146 = arith.mulf %137, %70 : vector<2x32xf32>
    %147 = arith.mulf %131, %139 : vector<2x32xf32>
    %148 = arith.addf %146, %147 : vector<2x32xf32>
    %149 = math.tanh %148 : vector<2x32xf32>
    %150 = arith.mulf %145, %149 : vector<2x32xf32>
    %c1_66 = arith.constant 1 : index
    %c0_67 = arith.constant 0 : index
    %c0_68 = arith.constant 0 : index
    %c0_69 = arith.constant 0 : index
    %151 = vector.load %arg7[%c1_66, %c0_67, %c0_68, %c0_69] : memref<8x2x2x32xf32, #tpu.memory_space<vmem>>, vector<1x1x2x32xf32>
    %152 = vector.shape_cast %151 : vector<1x1x2x32xf32> to vector<2x32xf32>
    %153 = vector.shape_cast %114 : vector<2x32xf32> to vector<1x1x2x32xf32>
    tpu.vector_store %arg7[%c1_66, %c0_67, %c0_68, %c0_69], %153 {strides = array<i32>} : memref<8x2x2x32xf32, #tpu.memory_space<vmem>>, vector<1x1x2x32xf32>,
    %c1_70 = arith.constant 1 : index
    %c1_71 = arith.constant 1 : index
    %c0_72 = arith.constant 0 : index
    %c0_73 = arith.constant 0 : index
    %154 = vector.load %arg7[%c1_70, %c1_71, %c0_72, %c0_73] : memref<8x2x2x32xf32, #tpu.memory_space<vmem>>, vector<1x1x2x32xf32>
    %155 = vector.shape_cast %154 : vector<1x1x2x32xf32> to vector<2x32xf32>
    %156 = vector.shape_cast %150 : vector<2x32xf32> to vector<1x1x2x32xf32>
    tpu.vector_store %arg7[%c1_70, %c1_71, %c0_72, %c0_73], %156 {strides = array<i32>} : memref<8x2x2x32xf32, #tpu.memory_space<vmem>>, vector<1x1x2x32xf32>,
    %c2 = arith.constant 2 : index
    %c0_74 = arith.constant 0 : index
    %c0_75 = arith.constant 0 : index
    %c0_76 = arith.constant 0 : index
    %157 = vector.load %arg0[%c2, %c0_74, %c0_75, %c0_76] : memref<8x2x2x64xbf16, #tpu.memory_space<vmem>>, vector<1x1x2x64xbf16>
    %158 = vector.shape_cast %157 : vector<1x1x2x64xbf16> to vector<2x64xbf16>
    %c0_77 = arith.constant 0 : index
    %c0_78 = arith.constant 0 : index
    %159 = vector.load %arg1[%c0_77, %c0_78] : memref<64x128xbf16, #tpu.memory_space<vmem>>, vector<64x128xbf16>
    %cst_79 = arith.constant dense<0.000000e+00> : vector<2x128xf32>
    %160 = tpu.matmul %158, %159, %cst_79 {dimension_numbers = #tpu.dot_dimension_numbers<[1], [0], [0], [1], [0, 0, 1, 1], [], []>} : vector<2x64xbf16>, vector<64x128xbf16>, vector<2x128xf32> -> vector<2x128xf32>
    %161 = arith.truncf %114 : vector<2x32xf32> to vector<2x32xbf16>
    %c0_80 = arith.constant 0 : index
    %c0_81 = arith.constant 0 : index
    %162 = vector.load %arg2[%c0_80, %c0_81] : memref<32x128xbf16, #tpu.memory_space<vmem>>, vector<32x128xbf16>
    %cst_82 = arith.constant dense<0.000000e+00> : vector<2x128xf32>
    %163 = tpu.matmul %161, %162, %cst_82 {dimension_numbers = #tpu.dot_dimension_numbers<[1], [0], [0], [1], [0, 0, 1, 1], [], []>} : vector<2x32xbf16>, vector<32x128xbf16>, vector<2x128xf32> -> vector<2x128xf32>
    %164 = arith.addf %160, %163 : vector<2x128xf32>
    %c0_83 = arith.constant 0 : index
    %c0_84 = arith.constant 0 : index
    %165 = vector.load %arg3[%c0_83, %c0_84] : memref<1x128xf32, #tpu.memory_space<vmem>>, vector<1x128xf32>
    %166 = vector.broadcast %165 : vector<1x128xf32> to vector<2x128xf32>
    %167 = arith.addf %164, %166 : vector<2x128xf32>
    %168 = vector.extract_strided_slice %167 {offsets = [0, 0], sizes = [2, 32], strides = [1, 1]} : vector<2x128xf32> to vector<2x32xf32>
    %169 = arith.negf %168 : vector<2x32xf32>
    %170 = math.exp %169 : vector<2x32xf32>
    %cst_85 = arith.constant 1.000000e+00 : f32
    %171 = vector.broadcast %cst_85 : f32 to vector<2x32xf32>
    %172 = arith.addf %171, %170 : vector<2x32xf32>
    %173 = arith.divf %171, %172 : vector<2x32xf32>
    %174 = vector.extract_strided_slice %167 {offsets = [0, 32], sizes = [2, 32], strides = [1, 1]} : vector<2x128xf32> to vector<2x32xf32>
    %175 = arith.negf %174 : vector<2x32xf32>
    %176 = math.exp %175 : vector<2x32xf32>
    %cst_86 = arith.constant 1.000000e+00 : f32
    %177 = vector.broadcast %cst_86 : f32 to vector<2x32xf32>
    %178 = arith.addf %177, %176 : vector<2x32xf32>
    %179 = arith.divf %177, %178 : vector<2x32xf32>
    %180 = vector.extract_strided_slice %167 {offsets = [0, 64], sizes = [2, 32], strides = [1, 1]} : vector<2x128xf32> to vector<2x32xf32>
    %181 = math.tanh %180 : vector<2x32xf32>
    %182 = vector.extract_strided_slice %167 {offsets = [0, 96], sizes = [2, 32], strides = [1, 1]} : vector<2x128xf32> to vector<2x32xf32>
    %183 = arith.negf %182 : vector<2x32xf32>
    %184 = math.exp %183 : vector<2x32xf32>
    %cst_87 = arith.constant 1.000000e+00 : f32
    %185 = vector.broadcast %cst_87 : f32 to vector<2x32xf32>
    %186 = arith.addf %185, %184 : vector<2x32xf32>
    %187 = arith.divf %185, %186 : vector<2x32xf32>
    %188 = arith.mulf %179, %112 : vector<2x32xf32>
    %189 = arith.mulf %173, %181 : vector<2x32xf32>
    %190 = arith.addf %188, %189 : vector<2x32xf32>
    %191 = math.tanh %190 : vector<2x32xf32>
    %192 = arith.mulf %187, %191 : vector<2x32xf32>
    %c2_88 = arith.constant 2 : index
    %c1_89 = arith.constant 1 : index
    %c0_90 = arith.constant 0 : index
    %c0_91 = arith.constant 0 : index
    %193 = vector.load %arg0[%c2_88, %c1_89, %c0_90, %c0_91] : memref<8x2x2x64xbf16, #tpu.memory_space<vmem>>, vector<1x1x2x64xbf16>
    %194 = vector.shape_cast %193 : vector<1x1x2x64xbf16> to vector<2x64xbf16>
    %c0_92 = arith.constant 0 : index
    %c0_93 = arith.constant 0 : index
    %195 = vector.load %arg4[%c0_92, %c0_93] : memref<64x128xbf16, #tpu.memory_space<vmem>>, vector<64x128xbf16>
    %cst_94 = arith.constant dense<0.000000e+00> : vector<2x128xf32>
    %196 = tpu.matmul %194, %195, %cst_94 {dimension_numbers = #tpu.dot_dimension_numbers<[1], [0], [0], [1], [0, 0, 1, 1], [], []>} : vector<2x64xbf16>, vector<64x128xbf16>, vector<2x128xf32> -> vector<2x128xf32>
    %197 = arith.truncf %150 : vector<2x32xf32> to vector<2x32xbf16>
    %c0_95 = arith.constant 0 : index
    %c0_96 = arith.constant 0 : index
    %198 = vector.load %arg5[%c0_95, %c0_96] : memref<32x128xbf16, #tpu.memory_space<vmem>>, vector<32x128xbf16>
    %cst_97 = arith.constant dense<0.000000e+00> : vector<2x128xf32>
    %199 = tpu.matmul %197, %198, %cst_97 {dimension_numbers = #tpu.dot_dimension_numbers<[1], [0], [0], [1], [0, 0, 1, 1], [], []>} : vector<2x32xbf16>, vector<32x128xbf16>, vector<2x128xf32> -> vector<2x128xf32>
    %200 = arith.addf %196, %199 : vector<2x128xf32>
    %c0_98 = arith.constant 0 : index
    %c0_99 = arith.constant 0 : index
    %201 = vector.load %arg6[%c0_98, %c0_99] : memref<1x128xf32, #tpu.memory_space<vmem>>, vector<1x128xf32>
    %202 = vector.broadcast %201 : vector<1x128xf32> to vector<2x128xf32>
    %203 = arith.addf %200, %202 : vector<2x128xf32>
    %204 = vector.extract_strided_slice %203 {offsets = [0, 0], sizes = [2, 32], strides = [1, 1]} : vector<2x128xf32> to vector<2x32xf32>
    %205 = arith.negf %204 : vector<2x32xf32>
    %206 = math.exp %205 : vector<2x32xf32>
    %cst_100 = arith.constant 1.000000e+00 : f32
    %207 = vector.broadcast %cst_100 : f32 to vector<2x32xf32>
    %208 = arith.addf %207, %206 : vector<2x32xf32>
    %209 = arith.divf %207, %208 : vector<2x32xf32>
    %210 = vector.extract_strided_slice %203 {offsets = [0, 32], sizes = [2, 32], strides = [1, 1]} : vector<2x128xf32> to vector<2x32xf32>
    %211 = arith.negf %210 : vector<2x32xf32>
    %212 = math.exp %211 : vector<2x32xf32>
    %cst_101 = arith.constant 1.000000e+00 : f32
    %213 = vector.broadcast %cst_101 : f32 to vector<2x32xf32>
    %214 = arith.addf %213, %212 : vector<2x32xf32>
    %215 = arith.divf %213, %214 : vector<2x32xf32>
    %216 = vector.extract_strided_slice %203 {offsets = [0, 64], sizes = [2, 32], strides = [1, 1]} : vector<2x128xf32> to vector<2x32xf32>
    %217 = math.tanh %216 : vector<2x32xf32>
    %218 = vector.extract_strided_slice %203 {offsets = [0, 96], sizes = [2, 32], strides = [1, 1]} : vector<2x128xf32> to vector<2x32xf32>
    %219 = arith.negf %218 : vector<2x32xf32>
    %220 = math.exp %219 : vector<2x32xf32>
    %cst_102 = arith.constant 1.000000e+00 : f32
    %221 = vector.broadcast %cst_102 : f32 to vector<2x32xf32>
    %222 = arith.addf %221, %220 : vector<2x32xf32>
    %223 = arith.divf %221, %222 : vector<2x32xf32>
    %224 = arith.mulf %215, %148 : vector<2x32xf32>
    %225 = arith.mulf %209, %217 : vector<2x32xf32>
    %226 = arith.addf %224, %225 : vector<2x32xf32>
    %227 = math.tanh %226 : vector<2x32xf32>
    %228 = arith.mulf %223, %227 : vector<2x32xf32>
    %c2_103 = arith.constant 2 : index
    %c0_104 = arith.constant 0 : index
    %c0_105 = arith.constant 0 : index
    %c0_106 = arith.constant 0 : index
    %229 = vector.load %arg7[%c2_103, %c0_104, %c0_105, %c0_106] : memref<8x2x2x32xf32, #tpu.memory_space<vmem>>, vector<1x1x2x32xf32>
    %230 = vector.shape_cast %229 : vector<1x1x2x32xf32> to vector<2x32xf32>
    %231 = vector.shape_cast %192 : vector<2x32xf32> to vector<1x1x2x32xf32>
    tpu.vector_store %arg7[%c2_103, %c0_104, %c0_105, %c0_106], %231 {strides = array<i32>} : memref<8x2x2x32xf32, #tpu.memory_space<vmem>>, vector<1x1x2x32xf32>,
    %c2_107 = arith.constant 2 : index
    %c1_108 = arith.constant 1 : index
    %c0_109 = arith.constant 0 : index
    %c0_110 = arith.constant 0 : index
    %232 = vector.load %arg7[%c2_107, %c1_108, %c0_109, %c0_110] : memref<8x2x2x32xf32, #tpu.memory_space<vmem>>, vector<1x1x2x32xf32>
    %233 = vector.shape_cast %232 : vector<1x1x2x32xf32> to vector<2x32xf32>
    %234 = vector.shape_cast %228 : vector<2x32xf32> to vector<1x1x2x32xf32>
    tpu.vector_store %arg7[%c2_107, %c1_108, %c0_109, %c0_110], %234 {strides = array<i32>} : memref<8x2x2x32xf32, #tpu.memory_space<vmem>>, vector<1x1x2x32xf32>,
    %c3 = arith.constant 3 : index
    %c0_111 = arith.constant 0 : index
    %c0_112 = arith.constant 0 : index
    %c0_113 = arith.constant 0 : index
    %235 = vector.load %arg0[%c3, %c0_111, %c0_112, %c0_113] : memref<8x2x2x64xbf16, #tpu.memory_space<vmem>>, vector<1x1x2x64xbf16>
    %236 = vector.shape_cast %235 : vector<1x1x2x64xbf16> to vector<2x64xbf16>
    %c0_114 = arith.constant 0 : index
    %c0_115 = arith.constant 0 : index
    %237 = vector.load %arg1[%c0_114, %c0_115] : memref<64x128xbf16, #tpu.memory_space<vmem>>, vector<64x128xbf16>
    %cst_116 = arith.constant dense<0.000000e+00> : vector<2x128xf32>
    %238 = tpu.matmul %236, %237, %cst_116 {dimension_numbers = #tpu.dot_dimension_numbers<[1], [0], [0], [1], [0, 0, 1, 1], [], []>} : vector<2x64xbf16>, vector<64x128xbf16>, vector<2x128xf32> -> vector<2x128xf32>
    %239 = arith.truncf %192 : vector<2x32xf32> to vector<2x32xbf16>
    %c0_117 = arith.constant 0 : index
    %c0_118 = arith.constant 0 : index
    %240 = vector.load %arg2[%c0_117, %c0_118] : memref<32x128xbf16, #tpu.memory_space<vmem>>, vector<32x128xbf16>
    %cst_119 = arith.constant dense<0.000000e+00> : vector<2x128xf32>
    %241 = tpu.matmul %239, %240, %cst_119 {dimension_numbers = #tpu.dot_dimension_numbers<[1], [0], [0], [1], [0, 0, 1, 1], [], []>} : vector<2x32xbf16>, vector<32x128xbf16>, vector<2x128xf32> -> vector<2x128xf32>
    %242 = arith.addf %238, %241 : vector<2x128xf32>
    %c0_120 = arith.constant 0 : index
    %c0_121 = arith.constant 0 : index
    %243 = vector.load %arg3[%c0_120, %c0_121] : memref<1x128xf32, #tpu.memory_space<vmem>>, vector<1x128xf32>
    %244 = vector.broadcast %243 : vector<1x128xf32> to vector<2x128xf32>
    %245 = arith.addf %242, %244 : vector<2x128xf32>
    %246 = vector.extract_strided_slice %245 {offsets = [0, 0], sizes = [2, 32], strides = [1, 1]} : vector<2x128xf32> to vector<2x32xf32>
    %247 = arith.negf %246 : vector<2x32xf32>
    %248 = math.exp %247 : vector<2x32xf32>
    %cst_122 = arith.constant 1.000000e+00 : f32
    %249 = vector.broadcast %cst_122 : f32 to vector<2x32xf32>
    %250 = arith.addf %249, %248 : vector<2x32xf32>
    %251 = arith.divf %249, %250 : vector<2x32xf32>
    %252 = vector.extract_strided_slice %245 {offsets = [0, 32], sizes = [2, 32], strides = [1, 1]} : vector<2x128xf32> to vector<2x32xf32>
    %253 = arith.negf %252 : vector<2x32xf32>
    %254 = math.exp %253 : vector<2x32xf32>
    %cst_123 = arith.constant 1.000000e+00 : f32
    %255 = vector.broadcast %cst_123 : f32 to vector<2x32xf32>
    %256 = arith.addf %255, %254 : vector<2x32xf32>
    %257 = arith.divf %255, %256 : vector<2x32xf32>
    %258 = vector.extract_strided_slice %245 {offsets = [0, 64], sizes = [2, 32], strides = [1, 1]} : vector<2x128xf32> to vector<2x32xf32>
    %259 = math.tanh %258 : vector<2x32xf32>
    %260 = vector.extract_strided_slice %245 {offsets = [0, 96], sizes = [2, 32], strides = [1, 1]} : vector<2x128xf32> to vector<2x32xf32>
    %261 = arith.negf %260 : vector<2x32xf32>
    %262 = math.exp %261 : vector<2x32xf32>
    %cst_124 = arith.constant 1.000000e+00 : f32
    %263 = vector.broadcast %cst_124 : f32 to vector<2x32xf32>
    %264 = arith.addf %263, %262 : vector<2x32xf32>
    %265 = arith.divf %263, %264 : vector<2x32xf32>
    %266 = arith.mulf %257, %190 : vector<2x32xf32>
    %267 = arith.mulf %251, %259 : vector<2x32xf32>
    %268 = arith.addf %266, %267 : vector<2x32xf32>
    %269 = math.tanh %268 : vector<2x32xf32>
    %270 = arith.mulf %265, %269 : vector<2x32xf32>
    %c3_125 = arith.constant 3 : index
    %c1_126 = arith.constant 1 : index
    %c0_127 = arith.constant 0 : index
    %c0_128 = arith.constant 0 : index
    %271 = vector.load %arg0[%c3_125, %c1_126, %c0_127, %c0_128] : memref<8x2x2x64xbf16, #tpu.memory_space<vmem>>, vector<1x1x2x64xbf16>
    %272 = vector.shape_cast %271 : vector<1x1x2x64xbf16> to vector<2x64xbf16>
    %c0_129 = arith.constant 0 : index
    %c0_130 = arith.constant 0 : index
    %273 = vector.load %arg4[%c0_129, %c0_130] : memref<64x128xbf16, #tpu.memory_space<vmem>>, vector<64x128xbf16>
    %cst_131 = arith.constant dense<0.000000e+00> : vector<2x128xf32>
    %274 = tpu.matmul %272, %273, %cst_131 {dimension_numbers = #tpu.dot_dimension_numbers<[1], [0], [0], [1], [0, 0, 1, 1], [], []>} : vector<2x64xbf16>, vector<64x128xbf16>, vector<2x128xf32> -> vector<2x128xf32>
    %275 = arith.truncf %228 : vector<2x32xf32> to vector<2x32xbf16>
    %c0_132 = arith.constant 0 : index
    %c0_133 = arith.constant 0 : index
    %276 = vector.load %arg5[%c0_132, %c0_133] : memref<32x128xbf16, #tpu.memory_space<vmem>>, vector<32x128xbf16>
    %cst_134 = arith.constant dense<0.000000e+00> : vector<2x128xf32>
    %277 = tpu.matmul %275, %276, %cst_134 {dimension_numbers = #tpu.dot_dimension_numbers<[1], [0], [0], [1], [0, 0, 1, 1], [], []>} : vector<2x32xbf16>, vector<32x128xbf16>, vector<2x128xf32> -> vector<2x128xf32>
    %278 = arith.addf %274, %277 : vector<2x128xf32>
    %c0_135 = arith.constant 0 : index
    %c0_136 = arith.constant 0 : index
    %279 = vector.load %arg6[%c0_135, %c0_136] : memref<1x128xf32, #tpu.memory_space<vmem>>, vector<1x128xf32>
    %280 = vector.broadcast %279 : vector<1x128xf32> to vector<2x128xf32>
    %281 = arith.addf %278, %280 : vector<2x128xf32>
    %282 = vector.extract_strided_slice %281 {offsets = [0, 0], sizes = [2, 32], strides = [1, 1]} : vector<2x128xf32> to vector<2x32xf32>
    %283 = arith.negf %282 : vector<2x32xf32>
    %284 = math.exp %283 : vector<2x32xf32>
    %cst_137 = arith.constant 1.000000e+00 : f32
    %285 = vector.broadcast %cst_137 : f32 to vector<2x32xf32>
    %286 = arith.addf %285, %284 : vector<2x32xf32>
    %287 = arith.divf %285, %286 : vector<2x32xf32>
    %288 = vector.extract_strided_slice %281 {offsets = [0, 32], sizes = [2, 32], strides = [1, 1]} : vector<2x128xf32> to vector<2x32xf32>
    %289 = arith.negf %288 : vector<2x32xf32>
    %290 = math.exp %289 : vector<2x32xf32>
    %cst_138 = arith.constant 1.000000e+00 : f32
    %291 = vector.broadcast %cst_138 : f32 to vector<2x32xf32>
    %292 = arith.addf %291, %290 : vector<2x32xf32>
    %293 = arith.divf %291, %292 : vector<2x32xf32>
    %294 = vector.extract_strided_slice %281 {offsets = [0, 64], sizes = [2, 32], strides = [1, 1]} : vector<2x128xf32> to vector<2x32xf32>
    %295 = math.tanh %294 : vector<2x32xf32>
    %296 = vector.extract_strided_slice %281 {offsets = [0, 96], sizes = [2, 32], strides = [1, 1]} : vector<2x128xf32> to vector<2x32xf32>
    %297 = arith.negf %296 : vector<2x32xf32>
    %298 = math.exp %297 : vector<2x32xf32>
    %cst_139 = arith.constant 1.000000e+00 : f32
    %299 = vector.broadcast %cst_139 : f32 to vector<2x32xf32>
    %300 = arith.addf %299, %298 : vector<2x32xf32>
    %301 = arith.divf %299, %300 : vector<2x32xf32>
    %302 = arith.mulf %293, %226 : vector<2x32xf32>
    %303 = arith.mulf %287, %295 : vector<2x32xf32>
    %304 = arith.addf %302, %303 : vector<2x32xf32>
    %305 = math.tanh %304 : vector<2x32xf32>
    %306 = arith.mulf %301, %305 : vector<2x32xf32>
    %c3_140 = arith.constant 3 : index
    %c0_141 = arith.constant 0 : index
    %c0_142 = arith.constant 0 : index
    %c0_143 = arith.constant 0 : index
    %307 = vector.load %arg7[%c3_140, %c0_141, %c0_142, %c0_143] : memref<8x2x2x32xf32, #tpu.memory_space<vmem>>, vector<1x1x2x32xf32>
    %308 = vector.shape_cast %307 : vector<1x1x2x32xf32> to vector<2x32xf32>
    %309 = vector.shape_cast %270 : vector<2x32xf32> to vector<1x1x2x32xf32>
    tpu.vector_store %arg7[%c3_140, %c0_141, %c0_142, %c0_143], %309 {strides = array<i32>} : memref<8x2x2x32xf32, #tpu.memory_space<vmem>>, vector<1x1x2x32xf32>,
    %c3_144 = arith.constant 3 : index
    %c1_145 = arith.constant 1 : index
    %c0_146 = arith.constant 0 : index
    %c0_147 = arith.constant 0 : index
    %310 = vector.load %arg7[%c3_144, %c1_145, %c0_146, %c0_147] : memref<8x2x2x32xf32, #tpu.memory_space<vmem>>, vector<1x1x2x32xf32>
    %311 = vector.shape_cast %310 : vector<1x1x2x32xf32> to vector<2x32xf32>
    %312 = vector.shape_cast %306 : vector<2x32xf32> to vector<1x1x2x32xf32>
    tpu.vector_store %arg7[%c3_144, %c1_145, %c0_146, %c0_147], %312 {strides = array<i32>} : memref<8x2x2x32xf32, #tpu.memory_space<vmem>>, vector<1x1x2x32xf32>,
    %c4 = arith.constant 4 : index
    %c0_148 = arith.constant 0 : index
    %c0_149 = arith.constant 0 : index
    %c0_150 = arith.constant 0 : index
    %313 = vector.load %arg0[%c4, %c0_148, %c0_149, %c0_150] : memref<8x2x2x64xbf16, #tpu.memory_space<vmem>>, vector<1x1x2x64xbf16>
    %314 = vector.shape_cast %313 : vector<1x1x2x64xbf16> to vector<2x64xbf16>
    %c0_151 = arith.constant 0 : index
    %c0_152 = arith.constant 0 : index
    %315 = vector.load %arg1[%c0_151, %c0_152] : memref<64x128xbf16, #tpu.memory_space<vmem>>, vector<64x128xbf16>
    %cst_153 = arith.constant dense<0.000000e+00> : vector<2x128xf32>
    %316 = tpu.matmul %314, %315, %cst_153 {dimension_numbers = #tpu.dot_dimension_numbers<[1], [0], [0], [1], [0, 0, 1, 1], [], []>} : vector<2x64xbf16>, vector<64x128xbf16>, vector<2x128xf32> -> vector<2x128xf32>
    %317 = arith.truncf %270 : vector<2x32xf32> to vector<2x32xbf16>
    %c0_154 = arith.constant 0 : index
    %c0_155 = arith.constant 0 : index
    %318 = vector.load %arg2[%c0_154, %c0_155] : memref<32x128xbf16, #tpu.memory_space<vmem>>, vector<32x128xbf16>
    %cst_156 = arith.constant dense<0.000000e+00> : vector<2x128xf32>
    %319 = tpu.matmul %317, %318, %cst_156 {dimension_numbers = #tpu.dot_dimension_numbers<[1], [0], [0], [1], [0, 0, 1, 1], [], []>} : vector<2x32xbf16>, vector<32x128xbf16>, vector<2x128xf32> -> vector<2x128xf32>
    %320 = arith.addf %316, %319 : vector<2x128xf32>
    %c0_157 = arith.constant 0 : index
    %c0_158 = arith.constant 0 : index
    %321 = vector.load %arg3[%c0_157, %c0_158] : memref<1x128xf32, #tpu.memory_space<vmem>>, vector<1x128xf32>
    %322 = vector.broadcast %321 : vector<1x128xf32> to vector<2x128xf32>
    %323 = arith.addf %320, %322 : vector<2x128xf32>
    %324 = vector.extract_strided_slice %323 {offsets = [0, 0], sizes = [2, 32], strides = [1, 1]} : vector<2x128xf32> to vector<2x32xf32>
    %325 = arith.negf %324 : vector<2x32xf32>
    %326 = math.exp %325 : vector<2x32xf32>
    %cst_159 = arith.constant 1.000000e+00 : f32
    %327 = vector.broadcast %cst_159 : f32 to vector<2x32xf32>
    %328 = arith.addf %327, %326 : vector<2x32xf32>
    %329 = arith.divf %327, %328 : vector<2x32xf32>
    %330 = vector.extract_strided_slice %323 {offsets = [0, 32], sizes = [2, 32], strides = [1, 1]} : vector<2x128xf32> to vector<2x32xf32>
    %331 = arith.negf %330 : vector<2x32xf32>
    %332 = math.exp %331 : vector<2x32xf32>
    %cst_160 = arith.constant 1.000000e+00 : f32
    %333 = vector.broadcast %cst_160 : f32 to vector<2x32xf32>
    %334 = arith.addf %333, %332 : vector<2x32xf32>
    %335 = arith.divf %333, %334 : vector<2x32xf32>
    %336 = vector.extract_strided_slice %323 {offsets = [0, 64], sizes = [2, 32], strides = [1, 1]} : vector<2x128xf32> to vector<2x32xf32>
    %337 = math.tanh %336 : vector<2x32xf32>
    %338 = vector.extract_strided_slice %323 {offsets = [0, 96], sizes = [2, 32], strides = [1, 1]} : vector<2x128xf32> to vector<2x32xf32>
    %339 = arith.negf %338 : vector<2x32xf32>
    %340 = math.exp %339 : vector<2x32xf32>
    %cst_161 = arith.constant 1.000000e+00 : f32
    %341 = vector.broadcast %cst_161 : f32 to vector<2x32xf32>
    %342 = arith.addf %341, %340 : vector<2x32xf32>
    %343 = arith.divf %341, %342 : vector<2x32xf32>
    %344 = arith.mulf %335, %268 : vector<2x32xf32>
    %345 = arith.mulf %329, %337 : vector<2x32xf32>
    %346 = arith.addf %344, %345 : vector<2x32xf32>
    %347 = math.tanh %346 : vector<2x32xf32>
    %348 = arith.mulf %343, %347 : vector<2x32xf32>
    %c4_162 = arith.constant 4 : index
    %c1_163 = arith.constant 1 : index
    %c0_164 = arith.constant 0 : index
    %c0_165 = arith.constant 0 : index
    %349 = vector.load %arg0[%c4_162, %c1_163, %c0_164, %c0_165] : memref<8x2x2x64xbf16, #tpu.memory_space<vmem>>, vector<1x1x2x64xbf16>
    %350 = vector.shape_cast %349 : vector<1x1x2x64xbf16> to vector<2x64xbf16>
    %c0_166 = arith.constant 0 : index
    %c0_167 = arith.constant 0 : index
    %351 = vector.load %arg4[%c0_166, %c0_167] : memref<64x128xbf16, #tpu.memory_space<vmem>>, vector<64x128xbf16>
    %cst_168 = arith.constant dense<0.000000e+00> : vector<2x128xf32>
    %352 = tpu.matmul %350, %351, %cst_168 {dimension_numbers = #tpu.dot_dimension_numbers<[1], [0], [0], [1], [0, 0, 1, 1], [], []>} : vector<2x64xbf16>, vector<64x128xbf16>, vector<2x128xf32> -> vector<2x128xf32>
    %353 = arith.truncf %306 : vector<2x32xf32> to vector<2x32xbf16>
    %c0_169 = arith.constant 0 : index
    %c0_170 = arith.constant 0 : index
    %354 = vector.load %arg5[%c0_169, %c0_170] : memref<32x128xbf16, #tpu.memory_space<vmem>>, vector<32x128xbf16>
    %cst_171 = arith.constant dense<0.000000e+00> : vector<2x128xf32>
    %355 = tpu.matmul %353, %354, %cst_171 {dimension_numbers = #tpu.dot_dimension_numbers<[1], [0], [0], [1], [0, 0, 1, 1], [], []>} : vector<2x32xbf16>, vector<32x128xbf16>, vector<2x128xf32> -> vector<2x128xf32>
    %356 = arith.addf %352, %355 : vector<2x128xf32>
    %c0_172 = arith.constant 0 : index
    %c0_173 = arith.constant 0 : index
    %357 = vector.load %arg6[%c0_172, %c0_173] : memref<1x128xf32, #tpu.memory_space<vmem>>, vector<1x128xf32>
    %358 = vector.broadcast %357 : vector<1x128xf32> to vector<2x128xf32>
    %359 = arith.addf %356, %358 : vector<2x128xf32>
    %360 = vector.extract_strided_slice %359 {offsets = [0, 0], sizes = [2, 32], strides = [1, 1]} : vector<2x128xf32> to vector<2x32xf32>
    %361 = arith.negf %360 : vector<2x32xf32>
    %362 = math.exp %361 : vector<2x32xf32>
    %cst_174 = arith.constant 1.000000e+00 : f32
    %363 = vector.broadcast %cst_174 : f32 to vector<2x32xf32>
    %364 = arith.addf %363, %362 : vector<2x32xf32>
    %365 = arith.divf %363, %364 : vector<2x32xf32>
    %366 = vector.extract_strided_slice %359 {offsets = [0, 32], sizes = [2, 32], strides = [1, 1]} : vector<2x128xf32> to vector<2x32xf32>
    %367 = arith.negf %366 : vector<2x32xf32>
    %368 = math.exp %367 : vector<2x32xf32>
    %cst_175 = arith.constant 1.000000e+00 : f32
    %369 = vector.broadcast %cst_175 : f32 to vector<2x32xf32>
    %370 = arith.addf %369, %368 : vector<2x32xf32>
    %371 = arith.divf %369, %370 : vector<2x32xf32>
    %372 = vector.extract_strided_slice %359 {offsets = [0, 64], sizes = [2, 32], strides = [1, 1]} : vector<2x128xf32> to vector<2x32xf32>
    %373 = math.tanh %372 : vector<2x32xf32>
    %374 = vector.extract_strided_slice %359 {offsets = [0, 96], sizes = [2, 32], strides = [1, 1]} : vector<2x128xf32> to vector<2x32xf32>
    %375 = arith.negf %374 : vector<2x32xf32>
    %376 = math.exp %375 : vector<2x32xf32>
    %cst_176 = arith.constant 1.000000e+00 : f32
    %377 = vector.broadcast %cst_176 : f32 to vector<2x32xf32>
    %378 = arith.addf %377, %376 : vector<2x32xf32>
    %379 = arith.divf %377, %378 : vector<2x32xf32>
    %380 = arith.mulf %371, %304 : vector<2x32xf32>
    %381 = arith.mulf %365, %373 : vector<2x32xf32>
    %382 = arith.addf %380, %381 : vector<2x32xf32>
    %383 = math.tanh %382 : vector<2x32xf32>
    %384 = arith.mulf %379, %383 : vector<2x32xf32>
    %c4_177 = arith.constant 4 : index
    %c0_178 = arith.constant 0 : index
    %c0_179 = arith.constant 0 : index
    %c0_180 = arith.constant 0 : index
    %385 = vector.load %arg7[%c4_177, %c0_178, %c0_179, %c0_180] : memref<8x2x2x32xf32, #tpu.memory_space<vmem>>, vector<1x1x2x32xf32>
    %386 = vector.shape_cast %385 : vector<1x1x2x32xf32> to vector<2x32xf32>
    %387 = vector.shape_cast %348 : vector<2x32xf32> to vector<1x1x2x32xf32>
    tpu.vector_store %arg7[%c4_177, %c0_178, %c0_179, %c0_180], %387 {strides = array<i32>} : memref<8x2x2x32xf32, #tpu.memory_space<vmem>>, vector<1x1x2x32xf32>,
    %c4_181 = arith.constant 4 : index
    %c1_182 = arith.constant 1 : index
    %c0_183 = arith.constant 0 : index
    %c0_184 = arith.constant 0 : index
    %388 = vector.load %arg7[%c4_181, %c1_182, %c0_183, %c0_184] : memref<8x2x2x32xf32, #tpu.memory_space<vmem>>, vector<1x1x2x32xf32>
    %389 = vector.shape_cast %388 : vector<1x1x2x32xf32> to vector<2x32xf32>
    %390 = vector.shape_cast %384 : vector<2x32xf32> to vector<1x1x2x32xf32>
    tpu.vector_store %arg7[%c4_181, %c1_182, %c0_183, %c0_184], %390 {strides = array<i32>} : memref<8x2x2x32xf32, #tpu.memory_space<vmem>>, vector<1x1x2x32xf32>,
    %c5 = arith.constant 5 : index
    %c0_185 = arith.constant 0 : index
    %c0_186 = arith.constant 0 : index
    %c0_187 = arith.constant 0 : index
    %391 = vector.load %arg0[%c5, %c0_185, %c0_186, %c0_187] : memref<8x2x2x64xbf16, #tpu.memory_space<vmem>>, vector<1x1x2x64xbf16>
    %392 = vector.shape_cast %391 : vector<1x1x2x64xbf16> to vector<2x64xbf16>
    %c0_188 = arith.constant 0 : index
    %c0_189 = arith.constant 0 : index
    %393 = vector.load %arg1[%c0_188, %c0_189] : memref<64x128xbf16, #tpu.memory_space<vmem>>, vector<64x128xbf16>
    %cst_190 = arith.constant dense<0.000000e+00> : vector<2x128xf32>
    %394 = tpu.matmul %392, %393, %cst_190 {dimension_numbers = #tpu.dot_dimension_numbers<[1], [0], [0], [1], [0, 0, 1, 1], [], []>} : vector<2x64xbf16>, vector<64x128xbf16>, vector<2x128xf32> -> vector<2x128xf32>
    %395 = arith.truncf %348 : vector<2x32xf32> to vector<2x32xbf16>
    %c0_191 = arith.constant 0 : index
    %c0_192 = arith.constant 0 : index
    %396 = vector.load %arg2[%c0_191, %c0_192] : memref<32x128xbf16, #tpu.memory_space<vmem>>, vector<32x128xbf16>
    %cst_193 = arith.constant dense<0.000000e+00> : vector<2x128xf32>
    %397 = tpu.matmul %395, %396, %cst_193 {dimension_numbers = #tpu.dot_dimension_numbers<[1], [0], [0], [1], [0, 0, 1, 1], [], []>} : vector<2x32xbf16>, vector<32x128xbf16>, vector<2x128xf32> -> vector<2x128xf32>
    %398 = arith.addf %394, %397 : vector<2x128xf32>
    %c0_194 = arith.constant 0 : index
    %c0_195 = arith.constant 0 : index
    %399 = vector.load %arg3[%c0_194, %c0_195] : memref<1x128xf32, #tpu.memory_space<vmem>>, vector<1x128xf32>
    %400 = vector.broadcast %399 : vector<1x128xf32> to vector<2x128xf32>
    %401 = arith.addf %398, %400 : vector<2x128xf32>
    %402 = vector.extract_strided_slice %401 {offsets = [0, 0], sizes = [2, 32], strides = [1, 1]} : vector<2x128xf32> to vector<2x32xf32>
    %403 = arith.negf %402 : vector<2x32xf32>
    %404 = math.exp %403 : vector<2x32xf32>
    %cst_196 = arith.constant 1.000000e+00 : f32
    %405 = vector.broadcast %cst_196 : f32 to vector<2x32xf32>
    %406 = arith.addf %405, %404 : vector<2x32xf32>
    %407 = arith.divf %405, %406 : vector<2x32xf32>
    %408 = vector.extract_strided_slice %401 {offsets = [0, 32], sizes = [2, 32], strides = [1, 1]} : vector<2x128xf32> to vector<2x32xf32>
    %409 = arith.negf %408 : vector<2x32xf32>
    %410 = math.exp %409 : vector<2x32xf32>
    %cst_197 = arith.constant 1.000000e+00 : f32
    %411 = vector.broadcast %cst_197 : f32 to vector<2x32xf32>
    %412 = arith.addf %411, %410 : vector<2x32xf32>
    %413 = arith.divf %411, %412 : vector<2x32xf32>
    %414 = vector.extract_strided_slice %401 {offsets = [0, 64], sizes = [2, 32], strides = [1, 1]} : vector<2x128xf32> to vector<2x32xf32>
    %415 = math.tanh %414 : vector<2x32xf32>
    %416 = vector.extract_strided_slice %401 {offsets = [0, 96], sizes = [2, 32], strides = [1, 1]} : vector<2x128xf32> to vector<2x32xf32>
    %417 = arith.negf %416 : vector<2x32xf32>
    %418 = math.exp %417 : vector<2x32xf32>
    %cst_198 = arith.constant 1.000000e+00 : f32
    %419 = vector.broadcast %cst_198 : f32 to vector<2x32xf32>
    %420 = arith.addf %419, %418 : vector<2x32xf32>
    %421 = arith.divf %419, %420 : vector<2x32xf32>
    %422 = arith.mulf %413, %346 : vector<2x32xf32>
    %423 = arith.mulf %407, %415 : vector<2x32xf32>
    %424 = arith.addf %422, %423 : vector<2x32xf32>
    %425 = math.tanh %424 : vector<2x32xf32>
    %426 = arith.mulf %421, %425 : vector<2x32xf32>
    %c5_199 = arith.constant 5 : index
    %c1_200 = arith.constant 1 : index
    %c0_201 = arith.constant 0 : index
    %c0_202 = arith.constant 0 : index
    %427 = vector.load %arg0[%c5_199, %c1_200, %c0_201, %c0_202] : memref<8x2x2x64xbf16, #tpu.memory_space<vmem>>, vector<1x1x2x64xbf16>
    %428 = vector.shape_cast %427 : vector<1x1x2x64xbf16> to vector<2x64xbf16>
    %c0_203 = arith.constant 0 : index
    %c0_204 = arith.constant 0 : index
    %429 = vector.load %arg4[%c0_203, %c0_204] : memref<64x128xbf16, #tpu.memory_space<vmem>>, vector<64x128xbf16>
    %cst_205 = arith.constant dense<0.000000e+00> : vector<2x128xf32>
    %430 = tpu.matmul %428, %429, %cst_205 {dimension_numbers = #tpu.dot_dimension_numbers<[1], [0], [0], [1], [0, 0, 1, 1], [], []>} : vector<2x64xbf16>, vector<64x128xbf16>, vector<2x128xf32> -> vector<2x128xf32>
    %431 = arith.truncf %384 : vector<2x32xf32> to vector<2x32xbf16>
    %c0_206 = arith.constant 0 : index
    %c0_207 = arith.constant 0 : index
    %432 = vector.load %arg5[%c0_206, %c0_207] : memref<32x128xbf16, #tpu.memory_space<vmem>>, vector<32x128xbf16>
    %cst_208 = arith.constant dense<0.000000e+00> : vector<2x128xf32>
    %433 = tpu.matmul %431, %432, %cst_208 {dimension_numbers = #tpu.dot_dimension_numbers<[1], [0], [0], [1], [0, 0, 1, 1], [], []>} : vector<2x32xbf16>, vector<32x128xbf16>, vector<2x128xf32> -> vector<2x128xf32>
    %434 = arith.addf %430, %433 : vector<2x128xf32>
    %c0_209 = arith.constant 0 : index
    %c0_210 = arith.constant 0 : index
    %435 = vector.load %arg6[%c0_209, %c0_210] : memref<1x128xf32, #tpu.memory_space<vmem>>, vector<1x128xf32>
    %436 = vector.broadcast %435 : vector<1x128xf32> to vector<2x128xf32>
    %437 = arith.addf %434, %436 : vector<2x128xf32>
    %438 = vector.extract_strided_slice %437 {offsets = [0, 0], sizes = [2, 32], strides = [1, 1]} : vector<2x128xf32> to vector<2x32xf32>
    %439 = arith.negf %438 : vector<2x32xf32>
    %440 = math.exp %439 : vector<2x32xf32>
    %cst_211 = arith.constant 1.000000e+00 : f32
    %441 = vector.broadcast %cst_211 : f32 to vector<2x32xf32>
    %442 = arith.addf %441, %440 : vector<2x32xf32>
    %443 = arith.divf %441, %442 : vector<2x32xf32>
    %444 = vector.extract_strided_slice %437 {offsets = [0, 32], sizes = [2, 32], strides = [1, 1]} : vector<2x128xf32> to vector<2x32xf32>
    %445 = arith.negf %444 : vector<2x32xf32>
    %446 = math.exp %445 : vector<2x32xf32>
    %cst_212 = arith.constant 1.000000e+00 : f32
    %447 = vector.broadcast %cst_212 : f32 to vector<2x32xf32>
    %448 = arith.addf %447, %446 : vector<2x32xf32>
    %449 = arith.divf %447, %448 : vector<2x32xf32>
    %450 = vector.extract_strided_slice %437 {offsets = [0, 64], sizes = [2, 32], strides = [1, 1]} : vector<2x128xf32> to vector<2x32xf32>
    %451 = math.tanh %450 : vector<2x32xf32>
    %452 = vector.extract_strided_slice %437 {offsets = [0, 96], sizes = [2, 32], strides = [1, 1]} : vector<2x128xf32> to vector<2x32xf32>
    %453 = arith.negf %452 : vector<2x32xf32>
    %454 = math.exp %453 : vector<2x32xf32>
    %cst_213 = arith.constant 1.000000e+00 : f32
    %455 = vector.broadcast %cst_213 : f32 to vector<2x32xf32>
    %456 = arith.addf %455, %454 : vector<2x32xf32>
    %457 = arith.divf %455, %456 : vector<2x32xf32>
    %458 = arith.mulf %449, %382 : vector<2x32xf32>
    %459 = arith.mulf %443, %451 : vector<2x32xf32>
    %460 = arith.addf %458, %459 : vector<2x32xf32>
    %461 = math.tanh %460 : vector<2x32xf32>
    %462 = arith.mulf %457, %461 : vector<2x32xf32>
    %c5_214 = arith.constant 5 : index
    %c0_215 = arith.constant 0 : index
    %c0_216 = arith.constant 0 : index
    %c0_217 = arith.constant 0 : index
    %463 = vector.load %arg7[%c5_214, %c0_215, %c0_216, %c0_217] : memref<8x2x2x32xf32, #tpu.memory_space<vmem>>, vector<1x1x2x32xf32>
    %464 = vector.shape_cast %463 : vector<1x1x2x32xf32> to vector<2x32xf32>
    %465 = vector.shape_cast %426 : vector<2x32xf32> to vector<1x1x2x32xf32>
    tpu.vector_store %arg7[%c5_214, %c0_215, %c0_216, %c0_217], %465 {strides = array<i32>} : memref<8x2x2x32xf32, #tpu.memory_space<vmem>>, vector<1x1x2x32xf32>,
    %c5_218 = arith.constant 5 : index
    %c1_219 = arith.constant 1 : index
    %c0_220 = arith.constant 0 : index
    %c0_221 = arith.constant 0 : index
    %466 = vector.load %arg7[%c5_218, %c1_219, %c0_220, %c0_221] : memref<8x2x2x32xf32, #tpu.memory_space<vmem>>, vector<1x1x2x32xf32>
    %467 = vector.shape_cast %466 : vector<1x1x2x32xf32> to vector<2x32xf32>
    %468 = vector.shape_cast %462 : vector<2x32xf32> to vector<1x1x2x32xf32>
    tpu.vector_store %arg7[%c5_218, %c1_219, %c0_220, %c0_221], %468 {strides = array<i32>} : memref<8x2x2x32xf32, #tpu.memory_space<vmem>>, vector<1x1x2x32xf32>,
    %c6 = arith.constant 6 : index
    %c0_222 = arith.constant 0 : index
    %c0_223 = arith.constant 0 : index
    %c0_224 = arith.constant 0 : index
    %469 = vector.load %arg0[%c6, %c0_222, %c0_223, %c0_224] : memref<8x2x2x64xbf16, #tpu.memory_space<vmem>>, vector<1x1x2x64xbf16>
    %470 = vector.shape_cast %469 : vector<1x1x2x64xbf16> to vector<2x64xbf16>
    %c0_225 = arith.constant 0 : index
    %c0_226 = arith.constant 0 : index
    %471 = vector.load %arg1[%c0_225, %c0_226] : memref<64x128xbf16, #tpu.memory_space<vmem>>, vector<64x128xbf16>
    %cst_227 = arith.constant dense<0.000000e+00> : vector<2x128xf32>
    %472 = tpu.matmul %470, %471, %cst_227 {dimension_numbers = #tpu.dot_dimension_numbers<[1], [0], [0], [1], [0, 0, 1, 1], [], []>} : vector<2x64xbf16>, vector<64x128xbf16>, vector<2x128xf32> -> vector<2x128xf32>
    %473 = arith.truncf %426 : vector<2x32xf32> to vector<2x32xbf16>
    %c0_228 = arith.constant 0 : index
    %c0_229 = arith.constant 0 : index
    %474 = vector.load %arg2[%c0_228, %c0_229] : memref<32x128xbf16, #tpu.memory_space<vmem>>, vector<32x128xbf16>
    %cst_230 = arith.constant dense<0.000000e+00> : vector<2x128xf32>
    %475 = tpu.matmul %473, %474, %cst_230 {dimension_numbers = #tpu.dot_dimension_numbers<[1], [0], [0], [1], [0, 0, 1, 1], [], []>} : vector<2x32xbf16>, vector<32x128xbf16>, vector<2x128xf32> -> vector<2x128xf32>
    %476 = arith.addf %472, %475 : vector<2x128xf32>
    %c0_231 = arith.constant 0 : index
    %c0_232 = arith.constant 0 : index
    %477 = vector.load %arg3[%c0_231, %c0_232] : memref<1x128xf32, #tpu.memory_space<vmem>>, vector<1x128xf32>
    %478 = vector.broadcast %477 : vector<1x128xf32> to vector<2x128xf32>
    %479 = arith.addf %476, %478 : vector<2x128xf32>
    %480 = vector.extract_strided_slice %479 {offsets = [0, 0], sizes = [2, 32], strides = [1, 1]} : vector<2x128xf32> to vector<2x32xf32>
    %481 = arith.negf %480 : vector<2x32xf32>
    %482 = math.exp %481 : vector<2x32xf32>
    %cst_233 = arith.constant 1.000000e+00 : f32
    %483 = vector.broadcast %cst_233 : f32 to vector<2x32xf32>
    %484 = arith.addf %483, %482 : vector<2x32xf32>
    %485 = arith.divf %483, %484 : vector<2x32xf32>
    %486 = vector.extract_strided_slice %479 {offsets = [0, 32], sizes = [2, 32], strides = [1, 1]} : vector<2x128xf32> to vector<2x32xf32>
    %487 = arith.negf %486 : vector<2x32xf32>
    %488 = math.exp %487 : vector<2x32xf32>
    %cst_234 = arith.constant 1.000000e+00 : f32
    %489 = vector.broadcast %cst_234 : f32 to vector<2x32xf32>
    %490 = arith.addf %489, %488 : vector<2x32xf32>
    %491 = arith.divf %489, %490 : vector<2x32xf32>
    %492 = vector.extract_strided_slice %479 {offsets = [0, 64], sizes = [2, 32], strides = [1, 1]} : vector<2x128xf32> to vector<2x32xf32>
    %493 = math.tanh %492 : vector<2x32xf32>
    %494 = vector.extract_strided_slice %479 {offsets = [0, 96], sizes = [2, 32], strides = [1, 1]} : vector<2x128xf32> to vector<2x32xf32>
    %495 = arith.negf %494 : vector<2x32xf32>
    %496 = math.exp %495 : vector<2x32xf32>
    %cst_235 = arith.constant 1.000000e+00 : f32
    %497 = vector.broadcast %cst_235 : f32 to vector<2x32xf32>
    %498 = arith.addf %497, %496 : vector<2x32xf32>
    %499 = arith.divf %497, %498 : vector<2x32xf32>
    %500 = arith.mulf %491, %424 : vector<2x32xf32>
    %501 = arith.mulf %485, %493 : vector<2x32xf32>
    %502 = arith.addf %500, %501 : vector<2x32xf32>
    %503 = math.tanh %502 : vector<2x32xf32>
    %504 = arith.mulf %499, %503 : vector<2x32xf32>
    %c6_236 = arith.constant 6 : index
    %c1_237 = arith.constant 1 : index
    %c0_238 = arith.constant 0 : index
    %c0_239 = arith.constant 0 : index
    %505 = vector.load %arg0[%c6_236, %c1_237, %c0_238, %c0_239] : memref<8x2x2x64xbf16, #tpu.memory_space<vmem>>, vector<1x1x2x64xbf16>
    %506 = vector.shape_cast %505 : vector<1x1x2x64xbf16> to vector<2x64xbf16>
    %c0_240 = arith.constant 0 : index
    %c0_241 = arith.constant 0 : index
    %507 = vector.load %arg4[%c0_240, %c0_241] : memref<64x128xbf16, #tpu.memory_space<vmem>>, vector<64x128xbf16>
    %cst_242 = arith.constant dense<0.000000e+00> : vector<2x128xf32>
    %508 = tpu.matmul %506, %507, %cst_242 {dimension_numbers = #tpu.dot_dimension_numbers<[1], [0], [0], [1], [0, 0, 1, 1], [], []>} : vector<2x64xbf16>, vector<64x128xbf16>, vector<2x128xf32> -> vector<2x128xf32>
    %509 = arith.truncf %462 : vector<2x32xf32> to vector<2x32xbf16>
    %c0_243 = arith.constant 0 : index
    %c0_244 = arith.constant 0 : index
    %510 = vector.load %arg5[%c0_243, %c0_244] : memref<32x128xbf16, #tpu.memory_space<vmem>>, vector<32x128xbf16>
    %cst_245 = arith.constant dense<0.000000e+00> : vector<2x128xf32>
    %511 = tpu.matmul %509, %510, %cst_245 {dimension_numbers = #tpu.dot_dimension_numbers<[1], [0], [0], [1], [0, 0, 1, 1], [], []>} : vector<2x32xbf16>, vector<32x128xbf16>, vector<2x128xf32> -> vector<2x128xf32>
    %512 = arith.addf %508, %511 : vector<2x128xf32>
    %c0_246 = arith.constant 0 : index
    %c0_247 = arith.constant 0 : index
    %513 = vector.load %arg6[%c0_246, %c0_247] : memref<1x128xf32, #tpu.memory_space<vmem>>, vector<1x128xf32>
    %514 = vector.broadcast %513 : vector<1x128xf32> to vector<2x128xf32>
    %515 = arith.addf %512, %514 : vector<2x128xf32>
    %516 = vector.extract_strided_slice %515 {offsets = [0, 0], sizes = [2, 32], strides = [1, 1]} : vector<2x128xf32> to vector<2x32xf32>
    %517 = arith.negf %516 : vector<2x32xf32>
    %518 = math.exp %517 : vector<2x32xf32>
    %cst_248 = arith.constant 1.000000e+00 : f32
    %519 = vector.broadcast %cst_248 : f32 to vector<2x32xf32>
    %520 = arith.addf %519, %518 : vector<2x32xf32>
    %521 = arith.divf %519, %520 : vector<2x32xf32>
    %522 = vector.extract_strided_slice %515 {offsets = [0, 32], sizes = [2, 32], strides = [1, 1]} : vector<2x128xf32> to vector<2x32xf32>
    %523 = arith.negf %522 : vector<2x32xf32>
    %524 = math.exp %523 : vector<2x32xf32>
    %cst_249 = arith.constant 1.000000e+00 : f32
    %525 = vector.broadcast %cst_249 : f32 to vector<2x32xf32>
    %526 = arith.addf %525, %524 : vector<2x32xf32>
    %527 = arith.divf %525, %526 : vector<2x32xf32>
    %528 = vector.extract_strided_slice %515 {offsets = [0, 64], sizes = [2, 32], strides = [1, 1]} : vector<2x128xf32> to vector<2x32xf32>
    %529 = math.tanh %528 : vector<2x32xf32>
    %530 = vector.extract_strided_slice %515 {offsets = [0, 96], sizes = [2, 32], strides = [1, 1]} : vector<2x128xf32> to vector<2x32xf32>
    %531 = arith.negf %530 : vector<2x32xf32>
    %532 = math.exp %531 : vector<2x32xf32>
    %cst_250 = arith.constant 1.000000e+00 : f32
    %533 = vector.broadcast %cst_250 : f32 to vector<2x32xf32>
    %534 = arith.addf %533, %532 : vector<2x32xf32>
    %535 = arith.divf %533, %534 : vector<2x32xf32>
    %536 = arith.mulf %527, %460 : vector<2x32xf32>
    %537 = arith.mulf %521, %529 : vector<2x32xf32>
    %538 = arith.addf %536, %537 : vector<2x32xf32>
    %539 = math.tanh %538 : vector<2x32xf32>
    %540 = arith.mulf %535, %539 : vector<2x32xf32>
    %c6_251 = arith.constant 6 : index
    %c0_252 = arith.constant 0 : index
    %c0_253 = arith.constant 0 : index
    %c0_254 = arith.constant 0 : index
    %541 = vector.load %arg7[%c6_251, %c0_252, %c0_253, %c0_254] : memref<8x2x2x32xf32, #tpu.memory_space<vmem>>, vector<1x1x2x32xf32>
    %542 = vector.shape_cast %541 : vector<1x1x2x32xf32> to vector<2x32xf32>
    %543 = vector.shape_cast %504 : vector<2x32xf32> to vector<1x1x2x32xf32>
    tpu.vector_store %arg7[%c6_251, %c0_252, %c0_253, %c0_254], %543 {strides = array<i32>} : memref<8x2x2x32xf32, #tpu.memory_space<vmem>>, vector<1x1x2x32xf32>,
    %c6_255 = arith.constant 6 : index
    %c1_256 = arith.constant 1 : index
    %c0_257 = arith.constant 0 : index
    %c0_258 = arith.constant 0 : index
    %544 = vector.load %arg7[%c6_255, %c1_256, %c0_257, %c0_258] : memref<8x2x2x32xf32, #tpu.memory_space<vmem>>, vector<1x1x2x32xf32>
    %545 = vector.shape_cast %544 : vector<1x1x2x32xf32> to vector<2x32xf32>
    %546 = vector.shape_cast %540 : vector<2x32xf32> to vector<1x1x2x32xf32>
    tpu.vector_store %arg7[%c6_255, %c1_256, %c0_257, %c0_258], %546 {strides = array<i32>} : memref<8x2x2x32xf32, #tpu.memory_space<vmem>>, vector<1x1x2x32xf32>,
    %c7 = arith.constant 7 : index
    %c0_259 = arith.constant 0 : index
    %c0_260 = arith.constant 0 : index
    %c0_261 = arith.constant 0 : index
    %547 = vector.load %arg0[%c7, %c0_259, %c0_260, %c0_261] : memref<8x2x2x64xbf16, #tpu.memory_space<vmem>>, vector<1x1x2x64xbf16>
    %548 = vector.shape_cast %547 : vector<1x1x2x64xbf16> to vector<2x64xbf16>
    %c0_262 = arith.constant 0 : index
    %c0_263 = arith.constant 0 : index
    %549 = vector.load %arg1[%c0_262, %c0_263] : memref<64x128xbf16, #tpu.memory_space<vmem>>, vector<64x128xbf16>
    %cst_264 = arith.constant dense<0.000000e+00> : vector<2x128xf32>
    %550 = tpu.matmul %548, %549, %cst_264 {dimension_numbers = #tpu.dot_dimension_numbers<[1], [0], [0], [1], [0, 0, 1, 1], [], []>} : vector<2x64xbf16>, vector<64x128xbf16>, vector<2x128xf32> -> vector<2x128xf32>
    %551 = arith.truncf %504 : vector<2x32xf32> to vector<2x32xbf16>
    %c0_265 = arith.constant 0 : index
    %c0_266 = arith.constant 0 : index
    %552 = vector.load %arg2[%c0_265, %c0_266] : memref<32x128xbf16, #tpu.memory_space<vmem>>, vector<32x128xbf16>
    %cst_267 = arith.constant dense<0.000000e+00> : vector<2x128xf32>
    %553 = tpu.matmul %551, %552, %cst_267 {dimension_numbers = #tpu.dot_dimension_numbers<[1], [0], [0], [1], [0, 0, 1, 1], [], []>} : vector<2x32xbf16>, vector<32x128xbf16>, vector<2x128xf32> -> vector<2x128xf32>
    %554 = arith.addf %550, %553 : vector<2x128xf32>
    %c0_268 = arith.constant 0 : index
    %c0_269 = arith.constant 0 : index
    %555 = vector.load %arg3[%c0_268, %c0_269] : memref<1x128xf32, #tpu.memory_space<vmem>>, vector<1x128xf32>
    %556 = vector.broadcast %555 : vector<1x128xf32> to vector<2x128xf32>
    %557 = arith.addf %554, %556 : vector<2x128xf32>
    %558 = vector.extract_strided_slice %557 {offsets = [0, 0], sizes = [2, 32], strides = [1, 1]} : vector<2x128xf32> to vector<2x32xf32>
    %559 = arith.negf %558 : vector<2x32xf32>
    %560 = math.exp %559 : vector<2x32xf32>
    %cst_270 = arith.constant 1.000000e+00 : f32
    %561 = vector.broadcast %cst_270 : f32 to vector<2x32xf32>
    %562 = arith.addf %561, %560 : vector<2x32xf32>
    %563 = arith.divf %561, %562 : vector<2x32xf32>
    %564 = vector.extract_strided_slice %557 {offsets = [0, 32], sizes = [2, 32], strides = [1, 1]} : vector<2x128xf32> to vector<2x32xf32>
    %565 = arith.negf %564 : vector<2x32xf32>
    %566 = math.exp %565 : vector<2x32xf32>
    %cst_271 = arith.constant 1.000000e+00 : f32
    %567 = vector.broadcast %cst_271 : f32 to vector<2x32xf32>
    %568 = arith.addf %567, %566 : vector<2x32xf32>
    %569 = arith.divf %567, %568 : vector<2x32xf32>
    %570 = vector.extract_strided_slice %557 {offsets = [0, 64], sizes = [2, 32], strides = [1, 1]} : vector<2x128xf32> to vector<2x32xf32>
    %571 = math.tanh %570 : vector<2x32xf32>
    %572 = vector.extract_strided_slice %557 {offsets = [0, 96], sizes = [2, 32], strides = [1, 1]} : vector<2x128xf32> to vector<2x32xf32>
    %573 = arith.negf %572 : vector<2x32xf32>
    %574 = math.exp %573 : vector<2x32xf32>
    %cst_272 = arith.constant 1.000000e+00 : f32
    %575 = vector.broadcast %cst_272 : f32 to vector<2x32xf32>
    %576 = arith.addf %575, %574 : vector<2x32xf32>
    %577 = arith.divf %575, %576 : vector<2x32xf32>
    %578 = arith.mulf %569, %502 : vector<2x32xf32>
    %579 = arith.mulf %563, %571 : vector<2x32xf32>
    %580 = arith.addf %578, %579 : vector<2x32xf32>
    %581 = math.tanh %580 : vector<2x32xf32>
    %582 = arith.mulf %577, %581 : vector<2x32xf32>
    %c7_273 = arith.constant 7 : index
    %c1_274 = arith.constant 1 : index
    %c0_275 = arith.constant 0 : index
    %c0_276 = arith.constant 0 : index
    %583 = vector.load %arg0[%c7_273, %c1_274, %c0_275, %c0_276] : memref<8x2x2x64xbf16, #tpu.memory_space<vmem>>, vector<1x1x2x64xbf16>
    %584 = vector.shape_cast %583 : vector<1x1x2x64xbf16> to vector<2x64xbf16>
    %c0_277 = arith.constant 0 : index
    %c0_278 = arith.constant 0 : index
    %585 = vector.load %arg4[%c0_277, %c0_278] : memref<64x128xbf16, #tpu.memory_space<vmem>>, vector<64x128xbf16>
    %cst_279 = arith.constant dense<0.000000e+00> : vector<2x128xf32>
    %586 = tpu.matmul %584, %585, %cst_279 {dimension_numbers = #tpu.dot_dimension_numbers<[1], [0], [0], [1], [0, 0, 1, 1], [], []>} : vector<2x64xbf16>, vector<64x128xbf16>, vector<2x128xf32> -> vector<2x128xf32>
    %587 = arith.truncf %540 : vector<2x32xf32> to vector<2x32xbf16>
    %c0_280 = arith.constant 0 : index
    %c0_281 = arith.constant 0 : index
    %588 = vector.load %arg5[%c0_280, %c0_281] : memref<32x128xbf16, #tpu.memory_space<vmem>>, vector<32x128xbf16>
    %cst_282 = arith.constant dense<0.000000e+00> : vector<2x128xf32>
    %589 = tpu.matmul %587, %588, %cst_282 {dimension_numbers = #tpu.dot_dimension_numbers<[1], [0], [0], [1], [0, 0, 1, 1], [], []>} : vector<2x32xbf16>, vector<32x128xbf16>, vector<2x128xf32> -> vector<2x128xf32>
    %590 = arith.addf %586, %589 : vector<2x128xf32>
    %c0_283 = arith.constant 0 : index
    %c0_284 = arith.constant 0 : index
    %591 = vector.load %arg6[%c0_283, %c0_284] : memref<1x128xf32, #tpu.memory_space<vmem>>, vector<1x128xf32>
    %592 = vector.broadcast %591 : vector<1x128xf32> to vector<2x128xf32>
    %593 = arith.addf %590, %592 : vector<2x128xf32>
    %594 = vector.extract_strided_slice %593 {offsets = [0, 0], sizes = [2, 32], strides = [1, 1]} : vector<2x128xf32> to vector<2x32xf32>
    %595 = arith.negf %594 : vector<2x32xf32>
    %596 = math.exp %595 : vector<2x32xf32>
    %cst_285 = arith.constant 1.000000e+00 : f32
    %597 = vector.broadcast %cst_285 : f32 to vector<2x32xf32>
    %598 = arith.addf %597, %596 : vector<2x32xf32>
    %599 = arith.divf %597, %598 : vector<2x32xf32>
    %600 = vector.extract_strided_slice %593 {offsets = [0, 32], sizes = [2, 32], strides = [1, 1]} : vector<2x128xf32> to vector<2x32xf32>
    %601 = arith.negf %600 : vector<2x32xf32>
    %602 = math.exp %601 : vector<2x32xf32>
    %cst_286 = arith.constant 1.000000e+00 : f32
    %603 = vector.broadcast %cst_286 : f32 to vector<2x32xf32>
    %604 = arith.addf %603, %602 : vector<2x32xf32>
    %605 = arith.divf %603, %604 : vector<2x32xf32>
    %606 = vector.extract_strided_slice %593 {offsets = [0, 64], sizes = [2, 32], strides = [1, 1]} : vector<2x128xf32> to vector<2x32xf32>
    %607 = math.tanh %606 : vector<2x32xf32>
    %608 = vector.extract_strided_slice %593 {offsets = [0, 96], sizes = [2, 32], strides = [1, 1]} : vector<2x128xf32> to vector<2x32xf32>
    %609 = arith.negf %608 : vector<2x32xf32>
    %610 = math.exp %609 : vector<2x32xf32>
    %cst_287 = arith.constant 1.000000e+00 : f32
    %611 = vector.broadcast %cst_287 : f32 to vector<2x32xf32>
    %612 = arith.addf %611, %610 : vector<2x32xf32>
    %613 = arith.divf %611, %612 : vector<2x32xf32>
    %614 = arith.mulf %605, %538 : vector<2x32xf32>
    %615 = arith.mulf %599, %607 : vector<2x32xf32>
    %616 = arith.addf %614, %615 : vector<2x32xf32>
    %617 = math.tanh %616 : vector<2x32xf32>
    %618 = arith.mulf %613, %617 : vector<2x32xf32>
    %c7_288 = arith.constant 7 : index
    %c0_289 = arith.constant 0 : index
    %c0_290 = arith.constant 0 : index
    %c0_291 = arith.constant 0 : index
    %619 = vector.load %arg7[%c7_288, %c0_289, %c0_290, %c0_291] : memref<8x2x2x32xf32, #tpu.memory_space<vmem>>, vector<1x1x2x32xf32>
    %620 = vector.shape_cast %619 : vector<1x1x2x32xf32> to vector<2x32xf32>
    %621 = vector.shape_cast %582 : vector<2x32xf32> to vector<1x1x2x32xf32>
    tpu.vector_store %arg7[%c7_288, %c0_289, %c0_290, %c0_291], %621 {strides = array<i32>} : memref<8x2x2x32xf32, #tpu.memory_space<vmem>>, vector<1x1x2x32xf32>,
    %c7_292 = arith.constant 7 : index
    %c1_293 = arith.constant 1 : index
    %c0_294 = arith.constant 0 : index
    %c0_295 = arith.constant 0 : index
    %622 = vector.load %arg7[%c7_292, %c1_293, %c0_294, %c0_295] : memref<8x2x2x32xf32, #tpu.memory_space<vmem>>, vector<1x1x2x32xf32>
    %623 = vector.shape_cast %622 : vector<1x1x2x32xf32> to vector<2x32xf32>
    %624 = vector.shape_cast %618 : vector<2x32xf32> to vector<1x1x2x32xf32>
    tpu.vector_store %arg7[%c7_292, %c1_293, %c0_294, %c0_295], %624 {strides = array<i32>} : memref<8x2x2x32xf32, #tpu.memory_space<vmem>>, vector<1x1x2x32xf32>,
    return
  }
}

module attributes {stable_mosaic.version = 11 : i64} {
  func.func @_head_kernel(%arg0: memref<16x64xf32, #tpu.memory_space<vmem>>, %arg1: memref<64x32xbf16, #tpu.memory_space<vmem>>, %arg2: memref<1x32xf32, #tpu.memory_space<vmem>>, %arg3: memref<32x11xbf16, #tpu.memory_space<vmem>>, %arg4: memref<1x11xf32, #tpu.memory_space<vmem>>, %arg5: memref<16x11xf32, #tpu.memory_space<vmem>>) attributes {dimension_semantics = [], scalar_prefetch = 0 : i64, scratch_operands = 0 : i64, tpu.core_type = #tpu.core_type<tc>} {
    %c0 = arith.constant 0 : index
    %c0_0 = arith.constant 0 : index
    %0 = vector.load %arg0[%c0, %c0_0] : memref<16x64xf32, #tpu.memory_space<vmem>>, vector<16x64xf32>
    %1 = arith.truncf %0 : vector<16x64xf32> to vector<16x64xbf16>
    %c0_1 = arith.constant 0 : index
    %c0_2 = arith.constant 0 : index
    %2 = vector.load %arg1[%c0_1, %c0_2] : memref<64x32xbf16, #tpu.memory_space<vmem>>, vector<64x32xbf16>
    %cst = arith.constant dense<0.000000e+00> : vector<16x32xf32>
    %3 = tpu.matmul %1, %2, %cst {dimension_numbers = #tpu.dot_dimension_numbers<[1], [0], [0], [1], [0, 0, 1, 1], [], []>} : vector<16x64xbf16>, vector<64x32xbf16>, vector<16x32xf32> -> vector<16x32xf32>
    %c0_3 = arith.constant 0 : index
    %c0_4 = arith.constant 0 : index
    %4 = vector.load %arg2[%c0_3, %c0_4] : memref<1x32xf32, #tpu.memory_space<vmem>>, vector<1x32xf32>
    %5 = vector.broadcast %4 : vector<1x32xf32> to vector<16x32xf32>
    %6 = arith.addf %3, %5 : vector<16x32xf32>
    %cst_5 = arith.constant 5.000000e-01 : f32
    %7 = vector.broadcast %cst_5 : f32 to vector<16x32xf32>
    %8 = arith.mulf %7, %6 : vector<16x32xf32>
    %cst_6 = arith.constant 4.471500e-02 : f32
    %9 = vector.broadcast %cst_6 : f32 to vector<16x32xf32>
    %10 = arith.mulf %9, %6 : vector<16x32xf32>
    %11 = arith.mulf %10, %6 : vector<16x32xf32>
    %12 = arith.mulf %11, %6 : vector<16x32xf32>
    %13 = arith.addf %6, %12 : vector<16x32xf32>
    %cst_7 = arith.constant 0.797884583 : f32
    %14 = vector.broadcast %cst_7 : f32 to vector<16x32xf32>
    %15 = arith.mulf %14, %13 : vector<16x32xf32>
    %16 = math.tanh %15 : vector<16x32xf32>
    %cst_8 = arith.constant 1.000000e+00 : f32
    %17 = vector.broadcast %cst_8 : f32 to vector<16x32xf32>
    %18 = arith.addf %17, %16 : vector<16x32xf32>
    %19 = arith.mulf %8, %18 : vector<16x32xf32>
    %20 = arith.truncf %19 : vector<16x32xf32> to vector<16x32xbf16>
    %c0_9 = arith.constant 0 : index
    %c0_10 = arith.constant 0 : index
    %21 = vector.load %arg3[%c0_9, %c0_10] : memref<32x11xbf16, #tpu.memory_space<vmem>>, vector<32x11xbf16>
    %cst_11 = arith.constant dense<0.000000e+00> : vector<16x11xf32>
    %22 = tpu.matmul %20, %21, %cst_11 {dimension_numbers = #tpu.dot_dimension_numbers<[1], [0], [0], [1], [0, 0, 1, 1], [], []>} : vector<16x32xbf16>, vector<32x11xbf16>, vector<16x11xf32> -> vector<16x11xf32>
    %c0_12 = arith.constant 0 : index
    %c0_13 = arith.constant 0 : index
    %23 = vector.load %arg4[%c0_12, %c0_13] : memref<1x11xf32, #tpu.memory_space<vmem>>, vector<1x11xf32>
    %24 = vector.broadcast %23 : vector<1x11xf32> to vector<16x11xf32>
    %25 = arith.addf %22, %24 : vector<16x11xf32>
    %cst_14 = arith.constant dense<0xFF800000> : vector<16xf32>
    %26 = vector.multi_reduction <maximumf>, %25, %cst_14 [1] : vector<16x11xf32> to vector<16xf32>
    %27 = vector.shape_cast %26 : vector<16xf32> to vector<16x1xf32>
    %28 = vector.broadcast %27 : vector<16x1xf32> to vector<16x11xf32>
    %29 = arith.subf %25, %28 : vector<16x11xf32>
    %30 = math.exp %29 : vector<16x11xf32>
    %31 = vector.broadcast %27 : vector<16x1xf32> to vector<16x11xf32>
    %32 = arith.subf %25, %31 : vector<16x11xf32>
    %cst_15 = arith.constant dense<0.000000e+00> : vector<16xf32>
    %33 = vector.multi_reduction <add>, %30, %cst_15 [1] : vector<16x11xf32> to vector<16xf32>
    %34 = vector.shape_cast %33 : vector<16xf32> to vector<16x1xf32>
    %35 = math.log %34 : vector<16x1xf32>
    %36 = vector.broadcast %35 : vector<16x1xf32> to vector<16x11xf32>
    %37 = arith.subf %32, %36 : vector<16x11xf32>
    %c0_16 = arith.constant 0 : index
    %c0_17 = arith.constant 0 : index
    %38 = vector.load %arg5[%c0_16, %c0_17] : memref<16x11xf32, #tpu.memory_space<vmem>>, vector<16x11xf32>
    tpu.vector_store %arg5[%c0_16, %c0_17], %37 {strides = array<i32>} : memref<16x11xf32, #tpu.memory_space<vmem>>, vector<16x11xf32>,
    return
  }
}

</mosaic_0001>

<bundles_post_ra>
// kernel: crnn_forward.34
= control target key start
LH: loop header
LB: loop body
LE: loop exit
PB: predicated region body
PF: predicated region fallthrough
CT: control target
= control target key end

     0   :  { %s713_s15 = smov 0   ;;  %s715_s16 = smov 0   ;;  %s837_s0 = inlined_call_operand.vmem [shape: bf16[8,147], index: 0, kind: input, shape index: {}]   ;;  %s838_s1 = inlined_call_operand.vmem [shape: bf16[147,1024], index: 1, kind: input, shape index: {}]   ;;  %s839_s2 = inlined_call_operand.vmem [shape: f32[8,1], index: 2, kind: input, shape index: {}]   ;;  %s840_s3 = inlined_call_operand.vmem [shape: f32[8,1], index: 3, kind: input, shape index: {}]   ;;  %s841_s4 = inlined_call_operand.vmem [shape: f32[8,1024], index: 4, kind: output, shape index: {}]  }
   0x1   :  { %s717_s17 = smov 0  }
   0x2 LB: > { %s567_s18 = sadd.s32 4294967295, %s684_s17   ;;  %s730_s19 = sadd.s32 1, %s684_s17   ;;  %s684_s17 = sphi %s717_s17, %s844_s17   ;;  %s680_s16 = sphi %s715_s16, %s843_s16   ;;  %s676_s15 = sphi %s713_s15, %s842_s15  }
   0x3   : > { %s39_s20 = ssub.s32 %s684_s17, %s730_s19  ;;  %s42_s21 = sadd.s32 1, %s680_s16 }
   0x4   : > { %p40_p0 = scmp.eq.s32.totalorder %s39_s20, 0  ;;  %p49_p1 = scmp.ne.s32.totalorder %s680_s16, %s676_s15 }
   0x5   : > { %p50_p2 = scmp.eq.s32.totalorder %s684_s17, 0  ;;  %p570_p4 = scmp.ge.s32.totalorder %s684_s17, 4 }
   0x6   : > { %s739_s22 = scalar_select %p40_p0, %s680_s16, %s42_s21  }
   0x7   : > { %p51_p3 = por %p50_p2, %p49_p1  ;;  %152 = sbr.rel (%p570_p4) target bundleno = 35 (0x23), region = 28 }
   0xc   : > { %155 = sbr.rel (!%p51_p3) target bundleno = 35 (0x23), region = 32  ;;  %s157_s23 = sand.u32 (%p51_p3), 1, %s680_s16  }
   0xd   : > { %s601_s24 = sshll.u32 (%p51_p3), %s684_s17, 3  ;;  %s602_s25 = smul.u32 (%p51_p3), 152, %s157_s23 }
   0xe   : > { %s747_s28 = scalar_lea.vmem (%p51_p3), %s838_s1, %s601_s24 }
   0xf   : > { %v227_v0 = vld [vmem:[%s747_s28] sm:$0xff] (%p51_p3)  ;;  %s755_s29 = scalar_lea.vmem (%p51_p3), [#allocation2], %s602_s25 }
  0x10   : > { %v229_v1 = vld [vmem:[%s747_s28 + $0x20] sm:$0xff] (%p51_p3)  ;;  %228 = vst [vmem:[%s755_s29] sm:$0xff] (%p51_p3), %v227_v0 }
  0x11   : > { %v231_v2 = vld [vmem:[%s747_s28 + $0x40] sm:$0xff]  ;;  %230 = vst [vmem:[%s755_s29 + $0x8] sm:$0xff] %v229_v1 }
  0x12   : > { %v233_v3 = vld [vmem:[%s747_s28 + $0x60] sm:$0xff]  ;;  %232 = vst [vmem:[%s755_s29 + $0x10] sm:$0xff] %v231_v2 }
  0x13   : > { %v235_v4 = vld [vmem:[%s747_s28 + $0x80] sm:$0xff]  ;;  %234 = vst [vmem:[%s755_s29 + $0x18] sm:$0xff] %v233_v3 }
  0x14   : > { %v237_v5 = vld [vmem:[%s747_s28 + $0xa0] sm:$0xff]  ;;  %236 = vst [vmem:[%s755_s29 + $0x20] sm:$0xff] %v235_v4 }
  0x15   : > { %238 = vst [vmem:[%s755_s29 + $0x28] sm:$0xff] %v237_v5  ;;  %v239_v6 = vld [vmem:[%s747_s28 + $0xc0] sm:$0xff] }
  0x16   : > { %v241_v7 = vld [vmem:[%s747_s28 + $0xe0] sm:$0xff]  ;;  %240 = vst [vmem:[%s755_s29 + $0x30] sm:$0xff] %v239_v6 }
  0x17   : > { %v243_v8 = vld [vmem:[%s747_s28 + $0x100] sm:$0xff]  ;;  %242 = vst [vmem:[%s755_s29 + $0x38] sm:$0xff] %v241_v7 }
  0x18   : > { %244 = vst [vmem:[%s755_s29 + $0x40] sm:$0xff] %v243_v8  ;;  %v245_v9 = vld [vmem:[%s747_s28 + $0x120] sm:$0xff] }
  0x19   : > { %v247_v10 = vld [vmem:[%s747_s28 + $0x140] sm:$0xff]  ;;  %246 = vst [vmem:[%s755_s29 + $0x48] sm:$0xff] %v245_v9 }
  0x1a   : > { %v249_v11 = vld [vmem:[%s747_s28 + $0x160] sm:$0xff]  ;;  %248 = vst [vmem:[%s755_s29 + $0x50] sm:$0xff] %v247_v10 }
  0x1b   : > { %250 = vst [vmem:[%s755_s29 + $0x58] sm:$0xff] %v249_v11  ;;  %v251_v12 = vld [vmem:[%s747_s28 + $0x180] sm:$0xff] }
  0x1c   : > { %v253_v13 = vld [vmem:[%s747_s28 + $0x1a0] sm:$0xff]  ;;  %252 = vst [vmem:[%s755_s29 + $0x60] sm:$0xff] %v251_v12 }
  0x1d   : > { %v255_v14 = vld [vmem:[%s747_s28 + $0x1c0] sm:$0xff]  ;;  %254 = vst [vmem:[%s755_s29 + $0x68] sm:$0xff] %v253_v13 }
  0x1e   : > { %256 = vst [vmem:[%s755_s29 + $0x70] sm:$0xff] %v255_v14  ;;  %v257_v15 = vld [vmem:[%s747_s28 + $0x1e0] sm:$0xff] }
  0x1f   : > { %v259_v16 = vld [vmem:[%s747_s28 + $0x200] sm:$0xff]  ;;  %258 = vst [vmem:[%s755_s29 + $0x78] sm:$0xff] %v257_v15 }
  0x20   : > { %v261_v17 = vld [vmem:[%s747_s28 + $0x220] sm:$0xff]  ;;  %260 = vst [vmem:[%s755_s29 + $0x80] sm:$0xff] %v259_v16 }
  0x21   : > { %262 = vst [vmem:[%s755_s29 + $0x88] sm:$0xff] %v261_v17  ;;  %v263_v18 = vld [vmem:[%s747_s28 + $0x240] sm:$0xff] }
  0x22   : > { %264 = vst [vmem:[%s755_s29 + $0x90] sm:$0xff] %v263_v18 }
  0x23 PF: > { %p573_p5 = scmp.ge.s32.totalorder %s684_s17, 1  ;;  %p269_p6 = scmp.lt.s32.totalorder %s684_s17, 5 }
  0x25   : > { %p270_p7 = pnand %p573_p5, %p269_p6 }
  0x26   : > { %s276_s30 = sand.u32 (!%p270_p7), 1, %s676_s15   ;;  %s574_s13 = sshll.u32 (!%p270_p7), %s567_s18, 1 }
  0x27   : > { %273 = sbr.rel (%p270_p7) target bundleno = 287 (0x11f), region = 70  ;;  %p303_p8 = scmp.lt.s32.totalorder (!%p270_p7), %s574_s13, 7 }
  0x28   : > { %s603_s7 = smul.u32 (!%p270_p7), 152, %s276_s30 }
  0x2a   : > { %s801_s12 = scalar_lea.vmem (!%p270_p7), [#allocation2], %s603_s7 }
  0x2c   : > { %v309_v19 = vld [vmem:[%s837_s0] sm:$0xff]  ;;  %vm430_vm0 = vcmask 154624   ;;  %v686_v22 = vmov 0   ;;  %v631_v24 = vld [vmem:[%s801_s12 + $0x74] ss:$8 sps:$4 sm:$0xff]   ;;  %vm434_vm1 = vcmask 1040384  }
  0x2d   : > { %v577_v20 = vcombine.high %v309_v19, %v309_v19  ;;  %v485_v21 = vld [vmem:[%s839_s2] sm:$0xff]  ;;  %630 = vset.pattern.permute.xlu0 %v686_v22  ;;  %v633_v25 = vld [vmem:[%s801_s12 + $0x70] ss:$8 sps:$4 sm:$0xff]   ;;  %444 = vmatprep.subr.bf16.mxu0 %v631_v24  ;;  %v637_v28 = vld [vmem:[%s801_s12 + $0x54] ss:$8 sps:$4 sm:$0xff]   ;;  %vm435_vm2 = vcmask 1041408   ;;  %v576_v50 = vcombine.low %v309_v19, %v309_v19 }
  0x2e   : > { %488 = vperm.xlu0 %630, %v485_v21   ;;  %v493_v23 = vld [vmem:[%s840_s3] sm:$0xff]  ;;  %445 = vmatpush1.bf16.msra.mxu0 %v633_v25  ;;  %v639_v29 = vld [vmem:[%s801_s12 + $0x50] ss:$8 sps:$4 sm:$0xff]   ;;  %v643_v32 = vld [vmem:[%s801_s12 + $0x34] ss:$8 sps:$4 sm:$0xff]   ;;  %v687_v38 = vmov 65535  }
  0x2f   : > { %598 = vmatprep.mubr.msk.bf16.mxu0 %vm430_vm0, %v577_v20  ;;  %v634_v26 = vld [vmem:[%s801_s12 + $0x64] ss:$8 sps:$4 sm:$0xff]   ;;  %v636_v27 = vld [vmem:[%s801_s12 + $0x60] ss:$8 sps:$4 sm:$0xff]   ;;  %v645_v33 = vld [vmem:[%s801_s12 + $0x30] ss:$8 sps:$4 sm:$0xff]  }
  0x30   : > { %446 = vmatprep.subr.bf16.mxu0 %v634_v26  ;;  %v640_v30 = vld [vmem:[%s801_s12 + $0x44] ss:$8 sps:$4 sm:$0xff]   ;;  %v642_v31 = vld [vmem:[%s801_s12 + $0x40] ss:$8 sps:$4 sm:$0xff]   ;;  %v649_v36 = vld [vmem:[%s801_s12 + $0x14] ss:$8 sps:$4 sm:$0xff]  }
  0x31   : > { %v646_v34 = vld [vmem:[%s801_s12 + $0x24] ss:$8 sps:$4 sm:$0xff]   ;;  %v648_v35 = vld [vmem:[%s801_s12 + $0x20] ss:$8 sps:$4 sm:$0xff]   ;;  %v328_v37 = vld [vmem:[%s801_s12 + $0x90] sm:$0x33] }
  0x32   : > { %496 = vperm.xlu0 %630, %v493_v23   ;;  %447 = vmatpush1.bf16.msra.mxu0 %v636_v27  ;;  %v436_v39 = vsel %vm434_vm1, 4294967295, %v687_v38  ;;  %v651_v40 = vld [vmem:[%s801_s12 + $0x10] ss:$8 sps:$4 sm:$0xff]   ;;  %v652_v41 = vld [vmem:[%s801_s12 + $0x4] ss:$8 sps:$4 sm:$0xff]   ;;  %v597_v42 = vcombine.high %v328_v37, %v328_v37  ;;  %v596_v45 = vcombine.low %v328_v37, %v328_v37  ;;  %s846_s13 = smov (!%p303_p8, %s574_s13), 7 }
  0x33   : > { %448 = vmatprep.subr.bf16.mxu0 %v637_v28  ;;  %v437_v43 = vsel %vm435_vm2, %v436_v39, 0  ;;  %v654_v44 = vld [vmem:[%s801_s12] ss:$8 sps:$4 sm:$0xff]   ;;  %v657_v48 = vld [vmem:[%s801_s12 + $0x84] ss:$8 sps:$4 sm:$0xff]   ;;  %s575_s14 = sshll.u32 %s846_s13, 3 }
  0x34   : > { %v442_v46 = vand.u32 %v597_v42, %v437_v43  ;;  %v439_v47 = vand.u32 %v596_v45, %v437_v43  ;;  %v659_v49 = vld [vmem:[%s801_s12 + $0x80] ss:$8 sps:$4 sm:$0xff]   ;;  %s306_s21 = scalar_lea.vmem %s841_s4, %s575_s14 }
  0x36   : > { %449 = vmatpush1.bf16.msra.mxu0 %v639_v29 }
  0x37   : > { %450 = vmatprep.subr.bf16.mxu0 %v640_v30 }
  0x3a   : > { %451 = vmatpush1.bf16.msra.mxu0 %v642_v31 }
  0x3b   : > { %452 = vmatprep.subr.bf16.mxu0 %v643_v32 }
  0x3e   : > { %453 = vmatpush1.bf16.msra.mxu0 %v645_v33 }
  0x3f   : > { %454 = vmatprep.subr.bf16.mxu0 %v646_v34 }
  0x42   : > { %455 = vmatpush1.bf16.msra.mxu0 %v648_v35 }
  0x43   : > { %456 = vmatprep.subr.bf16.mxu0 %v649_v36 }
  0x46   : > { %457 = vmatpush1.bf16.msra.mxu0 %v651_v40 }
  0x47   : > { %458 = vmatprep.subr.bf16.mxu0 %v652_v41 }
  0x4a   : > { %459 = vmatpush1.bf16.msra.mxu0 %v654_v44 }
  0x4b   : > { %472 = vmatprep.subr.bf16.mxu0 %v442_v46 }
  0x4e   : > { %473 = vmatpush2.bf16.msra.mxu0 %v439_v47 }
  0x4f   : > { %474 = vmatprep.subr.bf16.mxu0 %v657_v48 }
  0x52   : > { %475 = vmatpush2.bf16.msra.mxu0 %v659_v49 }
  0x55   : > { %477 = vmatmul.mubr.bf16.vlgmr.msra.gmra.mxu0 %v576_v50 }
  0xa9   : > { %v489_v51 = vpop.permute.xlu0 %488 }
  0xad   : > { %v497_v54 = vpop.permute.xlu0 %496 }
 0x115   : > { %v478_v52 = vpop.f32.mrf.mxu0 }
 0x116   : > { %v491_v53 = vmul.f32 %v489_v51, %v478_v52 }
 0x117   : > { %v480_v55 = vpop.f32.mrf.mxu0 }
 0x118   : > { %v499_v56 = vadd.f32 %v497_v54, %v491_v53  ;;  %v492_v57 = vmul.f32 %v489_v51, %v480_v55 }
 0x119   : > { %v482_v58 = vpop.f32.mrf.mxu0 }
 0x11a   : > { %v501_v59 = vmax.f32 %v499_v56, 0.0  ;;  %v500_v60 = vadd.f32 %v497_v54, %v492_v57 }
 0x11b   : > { %v483_v61 = vpop.f32.mrf.mxu0 }
 0x11c   : > { %503 = vst [vmem:[%s306_s21] sm:$0xff] %v501_v59  ;;  %v502_v62 = vmax.f32 %v500_v60, 0.0 }
 0x11e   : > { %504 = vst [vmem:[%s306_s21 + $0x8] sm:$0xff] %v502_v62 }
 0x11f PF: > { %p11_p9 = scmp.ge.s32.totalorder %s730_s19, 6   ;;  %s842_s15 = smov %s680_s16 }
 0x120   : > { %s843_s16 = smov %s739_s22  ;;  %s844_s17 = smov %s730_s19 }
 0x121   :  { %13 = sbr.rel (!%p11_p9) target bundleno = 2 (0x2), region = 109 }

// kernel: crnn_forward.35
= control target key start
LH: loop header
LB: loop body
LE: loop exit
PB: predicated region body
PF: predicated region fallthrough
CT: control target
= control target key end

     0   :  { %s513_s12 = smov 127   ;;  %vm427_vm0 = vcmask 130048   ;;  %s1338_s0 = inlined_call_operand.vmem [shape: f32[4,8,2,9,17], index: 0, kind: input, shape index: {}]   ;;  %s1339_s1 = inlined_call_operand.vmem [shape: f32[8,2,8,16], index: 1, kind: output, shape index: {}]  }
   0x1   :  { %v527_v0 = vld [vmem:[%s1338_s0 + $0x20] sm:$0xff]  ;;  %v555_v6 = vld [vmem:[%s1338_s0 + $0x30] sm:$0xff] }
   0x2   :  { %v532_v1 = vld [vmem:[%s1338_s0 + $0x120] sm:$0xff]  ;;  %77 = vrot.lane.b32.xlu1 %v527_v0, %s513_s12  ;;  %v560_v7 = vld [vmem:[%s1338_s0 + $0x10] sm:$0xff] }
   0x3   :  { %v537_v2 = vld [vmem:[%s1338_s0] sm:$0xff]  ;;  %v569_v8 = vld [vmem:[%s1338_s0 + $0x50] sm:$0xff] }
   0x4   :  { %v546_v4 = vld [vmem:[%s1338_s0 + $0x100] sm:$0xff]  ;;  %73 = vrot.lane.b32.xlu0 %v537_v2, %s513_s12  ;;  %v583_v10 = vld [vmem:[%s1338_s0 + $0x70] sm:$0xff] }
   0x5   :  { %v574_v9 = vld [vmem:[%s1338_s0 + $0x40] sm:$0xff]  ;;  %v597_v12 = vld [vmem:[%s1338_s0 + $0x90] sm:$0xff] }
   0x6   :  { %79 = vrot.lane.b32.xlu1 %v555_v6, %s513_s12  ;;  %v588_v11 = vld [vmem:[%s1338_s0 + $0x60] sm:$0xff]  ;;  %v611_v14 = vld [vmem:[%s1338_s0 + $0xb0] sm:$0xff] }
   0x7   :  { %v602_v13 = vld [vmem:[%s1338_s0 + $0x80] sm:$0xff]  ;;  %v621_v16 = vld [vmem:[%s1338_s0 + $0x130] sm:$0xff] }
   0x8   :  { %75 = vrot.lane.b32.xlu0 %v560_v7, %s513_s12  ;;  %v616_v15 = vld [vmem:[%s1338_s0 + $0xa0] sm:$0xff]  ;;  %v626_v17 = vld [vmem:[%s1338_s0 + $0x110] sm:$0xff] }
   0x9   :  { %v635_v20 = vld [vmem:[%s1338_s0 + $0x150] sm:$0xff]  ;;  %v640_v21 = vld [vmem:[%s1338_s0 + $0x140] sm:$0xff] }
   0xa   :  { %83 = vrot.lane.b32.xlu1 %v569_v8, %s513_s12  ;;  %v645_v22 = vld [vmem:[%s1338_s0 + $0x170] sm:$0xff]  ;;  %v655_v24 = vld [vmem:[%s1338_s0 + $0xc0] sm:$0xff] }
   0xb   :  { %v650_v23 = vld [vmem:[%s1338_s0 + $0xd0] sm:$0xff]  ;;  %v671_v29 = vld [vmem:[%s1338_s0 + $0x160] sm:$0xff] }
   0xc   :  { %81 = vrot.lane.b32.xlu0 %v574_v9, %s513_s12  ;;  %v660_v25 = vld [vmem:[%s1338_s0 + $0xf0] sm:$0xff]  ;;  %v681_v31 = vld [vmem:[%s1338_s0 + $0x180] sm:$0xff] }
   0xd   :  { %v676_v30 = vld [vmem:[%s1338_s0 + $0x190] sm:$0xff]  ;;  %v701_v36 = vld [vmem:[%s1338_s0 + $0x1a0] sm:$0xff] }
   0xe   :  { %87 = vrot.lane.b32.xlu1 %v583_v10, %s513_s12  ;;  %v696_v35 = vld [vmem:[%s1338_s0 + $0x1b0] sm:$0xff]  ;;  %v715_v40 = vld [vmem:[%s1338_s0 + $0x1c0] sm:$0xff] }
   0xf   :  { %v710_v39 = vld [vmem:[%s1338_s0 + $0x1d0] sm:$0xff]  ;;  %v725_v42 = vld [vmem:[%s1338_s0 + $0xe0] sm:$0xff] }
  0x10   :  { %85 = vrot.lane.b32.xlu0 %v588_v11, %s513_s12  ;;  %v720_v41 = vld [vmem:[%s1338_s0 + $0x1f0] sm:$0xff]  ;;  %v736_v46 = vld [vmem:[%s1338_s0 + $0x1e0] sm:$0xff] }
  0x11   :  { %v751_v48 = vld [vmem:[%s1338_s0 + $0x210] sm:$0xff]  ;;  %v756_v49 = vld [vmem:[%s1338_s0 + $0x200] sm:$0xff] }
  0x12   :  { %91 = vrot.lane.b32.xlu1 %v597_v12, %s513_s12  ;;  %v765_v50 = vld [vmem:[%s1338_s0 + $0x230] sm:$0xff]  ;;  %v770_v51 = vld [vmem:[%s1338_s0 + $0x220] sm:$0xff] }
  0x13   :  { %v779_v52 = vld [vmem:[%s1338_s0 + $0x250] sm:$0xff]  ;;  %v784_v53 = vld [vmem:[%s1338_s0 + $0x240] sm:$0xff] }
  0x14   :  { %89 = vrot.lane.b32.xlu0 %v602_v13, %s513_s12  ;;  %v793_v54 = vld [vmem:[%s1338_s0 + $0x270] sm:$0xff]  ;;  %v798_v55 = vld [vmem:[%s1338_s0 + $0x260] sm:$0xff] }
  0x15   :  { %v807_v56 = vld [vmem:[%s1338_s0 + $0x290] sm:$0xff]  ;;  %v812_v57 = vld [vmem:[%s1338_s0 + $0x280] sm:$0xff] }
  0x16   :  { %95 = vrot.lane.b32.xlu1 %v611_v14, %s513_s12  ;;  %v821_v58 = vld [vmem:[%s1338_s0 + $0x2b0] sm:$0xff]  ;;  %v826_v59 = vld [vmem:[%s1338_s0 + $0x2a0] sm:$0xff] }
  0x17   :  { %v835_v60 = vld [vmem:[%s1338_s0 + $0x2d0] sm:$0xff]  ;;  %v840_v61 = vld [vmem:[%s1338_s0 + $0x2c0] sm:$0xff] }
  0x18   :  { %93 = vrot.lane.b32.xlu0 %v616_v15, %s513_s12  ;;  %v849_v62 = vld [vmem:[%s1338_s0 + $0x2f0] sm:$0xff]  ;;  %v854_v63 = vld [vmem:[%s1338_s0 + $0x2e0] sm:$0xff] }
  0x19   :  { %v863_v47 = vld [vmem:[%s1338_s0 + $0x11] sm:$0xff]  ;;  %v868_v45 = vld [vmem:[%s1338_s0 + $0x1] sm:$0xff] }
  0x1a   :  { %99 = vrot.lane.b32.xlu1 %v650_v23, %s513_s12  ;;  %v877_v44 = vld [vmem:[%s1338_s0 + $0x31] sm:$0xff]  ;;  %v882_v43 = vld [vmem:[%s1338_s0 + $0x21] sm:$0xff] }
  0x1b   :  { %v891_v38 = vld [vmem:[%s1338_s0 + $0x51] sm:$0xff]  ;;  %v896_v37 = vld [vmem:[%s1338_s0 + $0x41] sm:$0xff] }
  0x1c   :  { %97 = vrot.lane.b32.xlu0 %v655_v24, %s513_s12  ;;  %1352 = vst [vmem:[#allocation2_spill] sm:$0xff] %v891_v38  ;;  %1353 = vst [vmem:[#allocation3_spill] sm:$0xff] %v896_v37  ;;  %v905_v34 = vld [vmem:[%s1338_s0 + $0x71] sm:$0xff]  ;;  %v910_v33 = vld [vmem:[%s1338_s0 + $0x61] sm:$0xff] }
  0x1d   :  { %1354 = vst [vmem:[#allocation4_spill] sm:$0xff] %v905_v34  ;;  %1355 = vst [vmem:[#allocation5_spill] sm:$0xff] %v910_v33  ;;  %v919_v32 = vld [vmem:[%s1338_s0 + $0x91] sm:$0xff]  ;;  %v924_v28 = vld [vmem:[%s1338_s0 + $0x81] sm:$0xff] }
  0x1e   :  { %103 = vrot.lane.b32.xlu1 %v660_v25, %s513_s12  ;;  %1356 = vst [vmem:[#allocation6_spill] sm:$0xff] %v919_v32  ;;  %1357 = vst [vmem:[#allocation7_spill] sm:$0xff] %v924_v28  ;;  %v933_v27 = vld [vmem:[%s1338_s0 + $0xb1] sm:$0xff]  ;;  %v938_v26 = vld [vmem:[%s1338_s0 + $0xa1] sm:$0xff] }
  0x1f   :  { %1358 = vst [vmem:[#allocation8_spill] sm:$0xff] %v933_v27  ;;  %1359 = vst [vmem:[#allocation9_spill] sm:$0xff] %v938_v26  ;;  %v947_v19 = vld [vmem:[%s1338_s0 + $0xd1] sm:$0xff]  ;;  %v952_v18 = vld [vmem:[%s1338_s0 + $0xc1] sm:$0xff] }
  0x20   :  { %101 = vrot.lane.b32.xlu0 %v725_v42, %s513_s12  ;;  %1360 = vst [vmem:[#allocation10_spill] sm:$0xff] %v947_v19  ;;  %1361 = vst [vmem:[#allocation11_spill] sm:$0xff] %v952_v18  ;;  %v961_v5 = vld [vmem:[%s1338_s0 + $0xf1] sm:$0xff]  ;;  %v966_v3 = vld [vmem:[%s1338_s0 + $0xe1] sm:$0xff] }
  0x21   :  { %1362 = vst [vmem:[#allocation12_spill] sm:$0xff] %v961_v5  ;;  %1363 = vst [vmem:[#allocation13_spill] sm:$0xff] %v966_v3 }
  0x22   :  { %221 = vrot.lane.b32.xlu1 %v751_v48, %s513_s12 }
  0x24   :  { %219 = vrot.lane.b32.xlu0 %v756_v49, %s513_s12 }
  0x26   :  { %225 = vrot.lane.b32.xlu1 %v765_v50, %s513_s12 }
  0x28   :  { %223 = vrot.lane.b32.xlu0 %v770_v51, %s513_s12 }
  0x2a   :  { %229 = vrot.lane.b32.xlu1 %v779_v52, %s513_s12 }
  0x2c   :  { %227 = vrot.lane.b32.xlu0 %v784_v53, %s513_s12 }
  0x2e   :  { %233 = vrot.lane.b32.xlu1 %v793_v54, %s513_s12 }
  0x30   :  { %231 = vrot.lane.b32.xlu0 %v798_v55, %s513_s12 }
  0x32   :  { %237 = vrot.lane.b32.xlu1 %v807_v56, %s513_s12 }
  0x34   :  { %235 = vrot.lane.b32.xlu0 %v812_v57, %s513_s12 }
  0x36   :  { %241 = vrot.lane.b32.xlu1 %v821_v58, %s513_s12 }
  0x38   :  { %239 = vrot.lane.b32.xlu0 %v826_v59, %s513_s12 }
  0x3a   :  { %245 = vrot.lane.b32.xlu1 %v835_v60, %s513_s12 }
  0x3c   :  { %243 = vrot.lane.b32.xlu0 %v840_v61, %s513_s12 }
  0x3e   :  { %249 = vrot.lane.b32.xlu1 %v849_v62, %s513_s12 }
  0x40   :  { %247 = vrot.lane.b32.xlu0 %v854_v63, %s513_s12 }
  0x42   :  { %365 = vrot.lane.b32.xlu1 %v863_v47, %s513_s12 }
  0x44   :  { %363 = vrot.lane.b32.xlu0 %v868_v45, %s513_s12 }
  0x46   :  { %369 = vrot.lane.b32.xlu1 %v877_v44, %s513_s12 }
  0x48   :  { %367 = vrot.lane.b32.xlu0 %v882_v43, %s513_s12 }
  0x4a   :  { %373 = vrot.lane.b32.xlu1 %v891_v38, %s513_s12 }
  0x4c   :  { %371 = vrot.lane.b32.xlu0 %v896_v37, %s513_s12 }
  0x4e   :  { %377 = vrot.lane.b32.xlu1 %v905_v34, %s513_s12 }
  0x50   :  { %375 = vrot.lane.b32.xlu0 %v910_v33, %s513_s12  ;;  %v480_v33 = vld [vmem:[%s1338_s0 + $0x300] sm:$0xff] }
  0x52   :  { %381 = vrot.lane.b32.xlu1 %v919_v32, %s513_s12 }
  0x54   :  { %379 = vrot.lane.b32.xlu0 %v924_v28, %s513_s12  ;;  %v1365_v28 = vmax.f32 %v537_v2, %v546_v4  ;;  %v1367_v2 = vmax.f32 %v560_v7, %v626_v17  ;;  %v1368_v7 = vmax.f32 %v569_v8, %v635_v20 }
  0x56   :  { %385 = vrot.lane.b32.xlu1 %v933_v27, %s513_s12 }
  0x58   :  { %383 = vrot.lane.b32.xlu0 %v938_v26, %s513_s12 }
  0x5a   :  { %389 = vrot.lane.b32.xlu1 %v947_v19, %s513_s12 }
  0x5c   :  { %387 = vrot.lane.b32.xlu0 %v952_v18, %s513_s12  ;;  %v1364_v18 = vmax.f32 %v527_v0, %v532_v1  ;;  %v1366_v0 = vmax.f32 %v555_v6, %v621_v16 }
  0x5e   :  { %393 = vrot.lane.b32.xlu1 %v961_v5, %s513_s12  ;;  %v482_v5 = vld [vmem:[%s1338_s0 + $0x320] sm:$0xff] }
  0x60   :  { %391 = vrot.lane.b32.xlu0 %v966_v3, %s513_s12 }
  0x74   :  { %v78_v19 = vpop.permute.xlu1 %77 }
  0x75   :  { %v123_v27 = vmax.f32 %v1364_v18, %v78_v19 }
  0x76   :  { %v74_v26 = vpop.permute.xlu0 %73 }
  0x77   :  { %v121_v32 = vmax.f32 %v1365_v28, %v74_v26  ;;  %v156_v3 = vmax.f32 %v123_v27, %v770_v51  ;;  %v481_v26 = vld [vmem:[%s1338_s0 + $0x310] sm:$0xff] }
  0x78   :  { %v80_v37 = vpop.permute.xlu1 %79  ;;  %v483_v27 = vld [vmem:[%s1338_s0 + $0x330] sm:$0xff] }
  0x79   :  { %v154_v34 = vmax.f32 %v121_v32, %v756_v49  ;;  %v124_v1 = vmax.f32 %v1366_v0, %v80_v37  ;;  %v994_v19 = vmax.f32 %v156_v3, %v482_v5  ;;  %v1369_v3 = vmax.f32 %v574_v9, %v640_v21  ;;  %v485_v37 = vld [vmem:[%s1338_s0 + $0x350] sm:$0xff] }
  0x7a   :  { %v76_v38 = vpop.permute.xlu0 %75  ;;  %v1370_v9 = vmax.f32 %v583_v10, %v645_v22 }
  0x7b   :  { %v122_v4 = vmax.f32 %v1367_v2, %v76_v38  ;;  %v992_v18 = vmax.f32 %v154_v34, %v480_v33  ;;  %v157_v28 = vmax.f32 %v124_v1, %v765_v50  ;;  %v484_v38 = vld [vmem:[%s1338_s0 + $0x340] sm:$0xff]  ;;  %v1371_v50 = vmax.f32 %v588_v11, %v671_v29 }
  0x7c   :  { %v84_v16 = vpop.permute.xlu1 %83  ;;  %v1372_v11 = vmax.f32 %v597_v12, %v676_v30 }
  0x7d   :  { %v155_v6 = vmax.f32 %v122_v4, %v751_v48  ;;  %v126_v17 = vmax.f32 %v1368_v7, %v84_v16  ;;  %v1012_v34 = vmax.f32 %v157_v28, %v483_v27  ;;  %v1375_v7 = vmax.f32 %v616_v15, %v701_v36 }
  0x7e   :  { %v82_v32 = vpop.permute.xlu0 %81  ;;  %v1376_v15 = vmax.f32 %v650_v23, %v710_v39 }
  0x7f   :  { %v125_v5 = vmax.f32 %v1369_v3, %v82_v32  ;;  %v1010_v33 = vmax.f32 %v155_v6, %v481_v26  ;;  %v159_v48 = vmax.f32 %v126_v17, %v779_v52  ;;  %v487_v52 = vld [vmem:[%s1338_s0 + $0x370] sm:$0xff]  ;;  %v1373_v26 = vmax.f32 %v602_v13, %v681_v31 }
  0x80   :  { %v88_v20 = vpop.permute.xlu1 %87  ;;  %v1374_v13 = vmax.f32 %v611_v14, %v696_v35 }
  0x81   :  { %v158_v8 = vmax.f32 %v125_v5, %v784_v53  ;;  %v128_v21 = vmax.f32 %v1370_v9, %v88_v20  ;;  %v1028_v0 = vmax.f32 %v159_v48, %v485_v37  ;;  %v486_v53 = vld [vmem:[%s1338_s0 + $0x360] sm:$0xff]  ;;  %v1377_v48 = vmax.f32 %v655_v24, %v715_v40 }
  0x82   :  { %v86_v49 = vpop.permute.xlu0 %85  ;;  %v1378_v24 = vmax.f32 %v660_v25, %v720_v41 }
  0x83   :  { %v127_v51 = vmax.f32 %v1371_v50, %v86_v49  ;;  %v1030_v1 = vmax.f32 %v158_v8, %v484_v38  ;;  %v161_v2 = vmax.f32 %v128_v21, %v793_v54  ;;  %v489_v54 = vld [vmem:[%s1338_s0 + $0x390] sm:$0xff]  ;;  %v1379_v50 = vmax.f32 %v725_v42, %v736_v46 }
  0x84   :  { %v92_v22 = vpop.permute.xlu1 %91 }
  0x85   :  { %v160_v10 = vmax.f32 %v127_v51, %v798_v55  ;;  %v130_v29 = vmax.f32 %v1372_v11, %v92_v22  ;;  %v1046_v28 = vmax.f32 %v161_v2, %v487_v52  ;;  %v488_v55 = vld [vmem:[%s1338_s0 + $0x380] sm:$0xff]  ;;  %v1121_v11 = vld [vmem:[%s1338_s0 + $0x111] sm:$0xff] }
  0x86   :  { %v90_v4 = vpop.permute.xlu0 %89 }
  0x87   :  { %v129_v27 = vmax.f32 %v1373_v26, %v90_v4  ;;  %v1048_v6 = vmax.f32 %v160_v10, %v486_v53  ;;  %v163_v16 = vmax.f32 %v130_v29, %v807_v56  ;;  %v491_v56 = vld [vmem:[%s1338_s0 + $0x3b0] sm:$0xff] }
  0x88   :  { %v96_v30 = vpop.permute.xlu1 %95 }
  0x89   :  { %v162_v12 = vmax.f32 %v129_v27, %v812_v57  ;;  %v132_v31 = vmax.f32 %v1374_v13, %v96_v30  ;;  %v1064_v3 = vmax.f32 %v163_v16, %v489_v54  ;;  %v490_v57 = vld [vmem:[%s1338_s0 + $0x3a0] sm:$0xff] }
  0x8a   :  { %v94_v32 = vpop.permute.xlu0 %93 }
  0x8b   :  { %v131_v17 = vmax.f32 %v1375_v7, %v94_v32  ;;  %v1066_v5 = vmax.f32 %v162_v12, %v488_v55  ;;  %v165_v37 = vmax.f32 %v132_v31, %v821_v58  ;;  %v493_v58 = vld [vmem:[%s1338_s0 + $0x3d0] sm:$0xff]  ;;  %v1380_v7 = vld [vmem:[#allocation2_spill] sm:$0xff] }
  0x8c   :  { %v100_v35 = vpop.permute.xlu1 %99 }
  0x8d   :  { %v164_v14 = vmax.f32 %v131_v17, %v826_v59  ;;  %v134_v36 = vmax.f32 %v1376_v15, %v100_v35  ;;  %v1082_v20 = vmax.f32 %v165_v37, %v491_v56  ;;  %v492_v59 = vld [vmem:[%s1338_s0 + $0x3c0] sm:$0xff]  ;;  %v1187_v15 = vld [vmem:[%s1338_s0 + $0x171] sm:$0xff] }
  0x8e   :  { %v98_v38 = vpop.permute.xlu0 %97 }
  0x8f   :  { %v133_v8 = vmax.f32 %v1377_v48, %v98_v38  ;;  %v1084_v49 = vmax.f32 %v164_v14, %v490_v57  ;;  %v167_v9 = vmax.f32 %v134_v36, %v835_v60  ;;  %v495_v60 = vld [vmem:[%s1338_s0 + $0x3f0] sm:$0xff]  ;;  %v1192_v36 = vld [vmem:[%s1338_s0 + $0x161] sm:$0xff] }
  0x90   :  { %v104_v39 = vpop.permute.xlu1 %103  ;;  %v1382_v48 = vld [vmem:[#allocation4_spill] sm:$0xff] }
  0x91   :  { %v166_v23 = vmax.f32 %v133_v8, %v840_v61  ;;  %v136_v40 = vmax.f32 %v1378_v24, %v104_v39  ;;  %v1100_v52 = vmax.f32 %v167_v9, %v493_v58  ;;  %v494_v61 = vld [vmem:[%s1338_s0 + $0x3e0] sm:$0xff]  ;;  %v1209_v24 = vld [vmem:[%s1338_s0 + $0x191] sm:$0xff] }
  0x92   :  { %v102_v21 = vpop.permute.xlu0 %101 }
  0x93   :  { %v135_v51 = vmax.f32 %v1379_v50, %v102_v21  ;;  %v1102_v53 = vmax.f32 %v166_v23, %v492_v59  ;;  %v169_v2 = vmax.f32 %v136_v40, %v849_v62  ;;  %v1126_v62 = vld [vmem:[%s1338_s0 + $0x101] sm:$0xff] }
  0x94   :  { %v222_v41 = vpop.permute.xlu1 %221  ;;  %v1214_v40 = vld [vmem:[%s1338_s0 + $0x181] sm:$0xff] }
  0x95   :  { %v168_v25 = vmax.f32 %v135_v51, %v854_v63  ;;  %v268_v42 = vmax.f32 %v1010_v33, %v222_v41  ;;  %v1114_v22 = vmax.f32 %v169_v2, %v495_v60  ;;  %v1384_v50 = vld [vmem:[#allocation6_spill] sm:$0xff] }
  0x96   :  { %v220_v10 = vpop.permute.xlu0 %219 }
  0x97   :  { %v267_v46 = vmax.f32 %v992_v18, %v220_v10  ;;  %v1116_v4 = vmax.f32 %v168_v25, %v494_v61  ;;  %v1129_v63 = vmax.f32 %v268_v42, %v863_v47  ;;  %v1143_v47 = vld [vmem:[%s1338_s0 + $0x131] sm:$0xff] }
  0x98   :  { %v226_v18 = vpop.permute.xlu1 %225  ;;  %v507_v42 = vld [vmem:[%s1338_s0 + $0x1b1] sm:$0xff] }
  0x99   :  { %v1132_v33 = vmax.f32 %v267_v46, %v868_v45  ;;  %v270_v26 = vmax.f32 %v1012_v34, %v226_v18  ;;  %v332_v54 = vmax.f32 %v1129_v63, %v1121_v11  ;;  %v1148_v45 = vld [vmem:[%s1338_s0 + $0x121] sm:$0xff]  ;;  %v1386_v18 = vld [vmem:[#allocation8_spill] sm:$0xff] }
  0x9a   :  { %v224_v29 = vpop.permute.xlu0 %223  ;;  %v506_v46 = vld [vmem:[%s1338_s0 + $0x1a1] sm:$0xff] }
  0x9b   :  { %v269_v27 = vmax.f32 %v994_v19, %v224_v29  ;;  %v331_v55 = vmax.f32 %v1132_v33, %v1126_v62  ;;  %v1151_v34 = vmax.f32 %v270_v26, %v877_v44  ;;  %v1165_v44 = vld [vmem:[%s1338_s0 + $0x151] sm:$0xff] }
  0x9c   :  { %v230_v16 = vpop.permute.xlu1 %229  ;;  %v1387_v26 = vld [vmem:[#allocation9_spill] sm:$0xff] }
  0x9d   :  { %v1154_v19 = vmax.f32 %v269_v27, %v882_v43  ;;  %v272_v30 = vmax.f32 %v1028_v0, %v230_v16  ;;  %v334_v13 = vmax.f32 %v1151_v34, %v1143_v47  ;;  %v1170_v43 = vld [vmem:[%s1338_s0 + $0x141] sm:$0xff] }
  0x9e   :  { %v228_v12 = vpop.permute.xlu0 %227 }
  0x9f   :  { %v271_v32 = vmax.f32 %v1030_v1, %v228_v12  ;;  %v333_v31 = vmax.f32 %v1154_v19, %v1148_v45  ;;  %v1173_v0 = vmax.f32 %v272_v30, %v1380_v7  ;;  %v1381_v1 = vld [vmem:[#allocation3_spill] sm:$0xff]  ;;  %v509_v7 = vld [vmem:[%s1338_s0 + $0x1d1] sm:$0xff] }
  0xa0   :  { %v234_v56 = vpop.permute.xlu1 %233 }
  0xa1   :  { %v1176_v17 = vmax.f32 %v271_v32, %v1381_v1  ;;  %v274_v37 = vmax.f32 %v1046_v28, %v234_v56  ;;  %v336_v35 = vmax.f32 %v1173_v0, %v1165_v44  ;;  %v508_v1 = vld [vmem:[%s1338_s0 + $0x1c1] sm:$0xff] }
  0xa2   :  { %v232_v57 = vpop.permute.xlu0 %231  ;;  %v1388_v56 = vld [vmem:[#allocation10_spill] sm:$0xff] }
  0xa3   :  { %v273_v14 = vmax.f32 %v1048_v6, %v232_v57  ;;  %v335_v38 = vmax.f32 %v1176_v17, %v1170_v43  ;;  %v1195_v28 = vmax.f32 %v274_v37, %v1382_v48  ;;  %v1383_v6 = vld [vmem:[#allocation5_spill] sm:$0xff]  ;;  %v1389_v37 = vld [vmem:[#allocation11_spill] sm:$0xff] }
  0xa4   :  { %v238_v58 = vpop.permute.xlu1 %237 }
  0xa5   :  { %v1198_v8 = vmax.f32 %v273_v14, %v1383_v6  ;;  %v276_v9 = vmax.f32 %v1064_v3, %v238_v58  ;;  %v338_v39 = vmax.f32 %v1195_v28, %v1187_v15  ;;  %v511_v6 = vld [vmem:[%s1338_s0 + $0x1f1] sm:$0xff] }
  0xa6   :  { %v236_v59 = vpop.permute.xlu0 %235  ;;  %v1390_v58 = vld [vmem:[#allocation12_spill] sm:$0xff] }
  0xa7   :  { %v275_v23 = vmax.f32 %v1066_v5, %v236_v59  ;;  %v337_v21 = vmax.f32 %v1198_v8, %v1192_v36  ;;  %v1217_v3 = vmax.f32 %v276_v9, %v1384_v50  ;;  %v1385_v5 = vld [vmem:[#allocation7_spill] sm:$0xff]  ;;  %v1391_v9 = vld [vmem:[#allocation13_spill] sm:$0xff] }
  0xa8   :  { %v242_v60 = vpop.permute.xlu1 %241  ;;  %v510_v8 = vld [vmem:[%s1338_s0 + $0x1e1] sm:$0xff] }
  0xa9   :  { %v1220_v51 = vmax.f32 %v275_v23, %v1385_v5  ;;  %v278_v2 = vmax.f32 %v1082_v20, %v242_v60  ;;  %v340_v41 = vmax.f32 %v1217_v3, %v1209_v24 }
  0xaa   :  { %v240_v61 = vpop.permute.xlu0 %239 }
  0xab   :  { %v277_v25 = vmax.f32 %v1084_v49, %v240_v61  ;;  %v339_v10 = vmax.f32 %v1220_v51, %v1214_v40  ;;  %v310_v29 = vmax.f32 %v278_v2, %v1386_v18 }
  0xac   :  { %v246_v27 = vpop.permute.xlu1 %245 }
  0xad   :  { %v309_v20 = vmax.f32 %v277_v25, %v1387_v26  ;;  %v280_v16 = vmax.f32 %v1100_v52, %v246_v27  ;;  %v342_v30 = vmax.f32 %v310_v29, %v507_v42 }
  0xae   :  { %v244_v49 = vpop.permute.xlu0 %243 }
  0xaf   :  { %v279_v12 = vmax.f32 %v1102_v53, %v244_v49  ;;  %v341_v32 = vmax.f32 %v309_v20, %v506_v46  ;;  %v312_v57 = vmax.f32 %v280_v16, %v1388_v56 }
  0xb0   :  { %v250_v15 = vpop.permute.xlu1 %249 }
  0xb1   :  { %v311_v14 = vmax.f32 %v279_v12, %v1389_v37  ;;  %v282_v52 = vmax.f32 %v1114_v22, %v250_v15  ;;  %v344_v48 = vmax.f32 %v312_v57, %v509_v7 }
  0xb2   :  { %v248_v36 = vpop.permute.xlu0 %247 }
  0xb3   :  { %v281_v53 = vmax.f32 %v1116_v4, %v248_v36  ;;  %v343_v28 = vmax.f32 %v311_v14, %v508_v1  ;;  %v314_v59 = vmax.f32 %v282_v52, %v1390_v58 }
  0xb4   :  { %v366_v24 = vpop.permute.xlu1 %365 }
  0xb5   :  { %v313_v23 = vmax.f32 %v281_v53, %v1391_v9  ;;  %v412_v22 = vmax.f32 %v332_v54, %v366_v24  ;;  %v346_v50 = vmax.f32 %v314_v59, %v511_v6 }
  0xb6   :  { %v364_v40 = vpop.permute.xlu0 %363 }
  0xb7   :  { %v411_v4 = vmax.f32 %v331_v55, %v364_v40  ;;  %v345_v3 = vmax.f32 %v313_v23, %v510_v8  ;;  %429 = vst.msk [vmem:[%s1339_s1 + $0x8] sm:$0xff] %vm427_vm0, %v412_v22 }
  0xb8   :  { %v370_v5 = vpop.permute.xlu1 %369 }
  0xb9   :  { %428 = vst.msk [vmem:[%s1339_s1] sm:$0xff] %vm427_vm0, %v411_v4  ;;  %v414_v11 = vmax.f32 %v334_v13, %v370_v5 }
  0xba   :  { %v368_v51 = vpop.permute.xlu0 %367 }
  0xbb   :  { %v413_v62 = vmax.f32 %v333_v31, %v368_v51  ;;  %431 = vst.msk [vmem:[%s1339_s1 + $0x18] sm:$0xff] %vm427_vm0, %v414_v11 }
  0xbc   :  { %v374_v63 = vpop.permute.xlu1 %373 }
  0xbd   :  { %430 = vst.msk [vmem:[%s1339_s1 + $0x10] sm:$0xff] %vm427_vm0, %v413_v62  ;;  %v416_v54 = vmax.f32 %v336_v35, %v374_v63 }
  0xbe   :  { %v372_v33 = vpop.permute.xlu0 %371 }
  0xbf   :  { %v415_v55 = vmax.f32 %v335_v38, %v372_v33  ;;  %433 = vst.msk [vmem:[%s1339_s1 + $0x28] sm:$0xff] %vm427_vm0, %v416_v54 }
  0xc0   :  { %v378_v47 = vpop.permute.xlu1 %377 }
  0xc1   :  { %432 = vst.msk [vmem:[%s1339_s1 + $0x20] sm:$0xff] %vm427_vm0, %v415_v55  ;;  %v418_v34 = vmax.f32 %v338_v39, %v378_v47 }
  0xc2   :  { %v376_v45 = vpop.permute.xlu0 %375 }
  0xc3   :  { %v417_v19 = vmax.f32 %v337_v21, %v376_v45  ;;  %435 = vst.msk [vmem:[%s1339_s1 + $0x38] sm:$0xff] %vm427_vm0, %v418_v34 }
  0xc4   :  { %v382_v13 = vpop.permute.xlu1 %381 }
  0xc5   :  { %434 = vst.msk [vmem:[%s1339_s1 + $0x30] sm:$0xff] %vm427_vm0, %v417_v19  ;;  %v420_v44 = vmax.f32 %v340_v41, %v382_v13 }
  0xc6   :  { %v380_v31 = vpop.permute.xlu0 %379 }
  0xc7   :  { %v419_v43 = vmax.f32 %v339_v10, %v380_v31  ;;  %437 = vst.msk [vmem:[%s1339_s1 + $0x48] sm:$0xff] %vm427_vm0, %v420_v44 }
  0xc8   :  { %v386_v0 = vpop.permute.xlu1 %385 }
  0xc9   :  { %436 = vst.msk [vmem:[%s1339_s1 + $0x40] sm:$0xff] %vm427_vm0, %v419_v43  ;;  %v422_v35 = vmax.f32 %v342_v30, %v386_v0 }
  0xca   :  { %v384_v17 = vpop.permute.xlu0 %383 }
  0xcb   :  { %v421_v38 = vmax.f32 %v341_v32, %v384_v17  ;;  %439 = vst.msk [vmem:[%s1339_s1 + $0x58] sm:$0xff] %vm427_vm0, %v422_v35 }
  0xcc   :  { %v390_v39 = vpop.permute.xlu1 %389 }
  0xcd   :  { %438 = vst.msk [vmem:[%s1339_s1 + $0x50] sm:$0xff] %vm427_vm0, %v421_v38  ;;  %v424_v60 = vmax.f32 %v344_v48, %v390_v39 }
  0xce   :  { %v388_v21 = vpop.permute.xlu0 %387 }
  0xcf   :  { %v423_v61 = vmax.f32 %v343_v28, %v388_v21  ;;  %441 = vst.msk [vmem:[%s1339_s1 + $0x68] sm:$0xff] %vm427_vm0, %v424_v60 }
  0xd0   :  { %v394_v2 = vpop.permute.xlu1 %393 }
  0xd1   :  { %440 = vst.msk [vmem:[%s1339_s1 + $0x60] sm:$0xff] %vm427_vm0, %v423_v61  ;;  %v426_v41 = vmax.f32 %v346_v50, %v394_v2 }
  0xd2   :  { %v392_v25 = vpop.permute.xlu0 %391 }
  0xd3   :  { %v425_v10 = vmax.f32 %v345_v3, %v392_v25  ;;  %443 = vst.msk [vmem:[%s1339_s1 + $0x78] sm:$0xff] %vm427_vm0, %v426_v41 }
  0xd5   :  { %442 = vst.msk [vmem:[%s1339_s1 + $0x70] sm:$0xff] %vm427_vm0, %v425_v10 }

// kernel: crnn_forward.36
= control target key start
LH: loop header
LB: loop body
LE: loop exit
PB: predicated region body
PF: predicated region fallthrough
CT: control target
= control target key end

     0   :  { %vm77_vm0 = vcmask 1043456   ;;  %v177_v1 = vmov 0   ;;  %vm73_vm1 = vcmask 588800   ;;  %s245_s1 = inlined_call_operand.vmem [shape: bf16[72,256], index: 1, kind: input, shape index: {}]   ;;  %s246_s2 = inlined_call_operand.vmem [shape: f32[8,1], index: 2, kind: input, shape index: {}]   ;;  %s247_s3 = inlined_call_operand.vmem [shape: f32[8,1], index: 3, kind: input, shape index: {}]   ;;  %s248_s0 = inlined_call_operand.vmem [shape: bf16[8,72], index: 0, kind: input, shape index: {}]   ;;  %s249_s4 = inlined_call_operand.vmem [shape: f32[8,256], index: 4, kind: output, shape index: {}]  }
   0x1   :  { %v27_v0 = vld [vmem:[%s245_s1 + $0x40] sm:$0xff]  ;;  %116 = vmatprep.mubr.bf16.mxu0 %v177_v1  ;;  %162 = vset.pattern.permute.xlu0 %v177_v1  ;;  %v165_v4 = vld [vmem:[%s245_s1 + $0x34] ss:$8 sps:$4 sm:$0xff]   ;;  %v167_v6 = vld [vmem:[%s245_s1 + $0x30] ss:$8 sps:$4 sm:$0xff]  }
   0x2   :  { %v158_v2 = vcombine.high %v27_v0, %v27_v0  ;;  %v157_v3 = vcombine.low %v27_v0, %v27_v0  ;;  %v168_v7 = vld [vmem:[%s245_s1 + $0x24] ss:$8 sps:$4 sm:$0xff]   ;;  %v170_v9 = vld [vmem:[%s245_s1 + $0x20] ss:$8 sps:$4 sm:$0xff]   ;;  %v171_v11 = vld [vmem:[%s245_s1 + $0x14] ss:$8 sps:$4 sm:$0xff]  }
   0x3   :  { %v125_v8 = vld [vmem:[%s246_s2] sm:$0xff]  ;;  %v173_v12 = vld [vmem:[%s245_s1 + $0x10] ss:$8 sps:$4 sm:$0xff]  }
   0x4   :  { %159 = vmatprep.subr.msk.bf16.mxu0 %vm77_vm0, %v158_v2  ;;  %v79_v5 = vsel %vm77_vm0, %v157_v3, 0  ;;  %128 = vperm.xlu0 %162, %v125_v8   ;;  %v133_v10 = vld [vmem:[%s247_s3] sm:$0xff] }
   0x5   :  { %91 = vmatpush1.bf16.msra.mxu0 %v79_v5  ;;  %v174_v13 = vld [vmem:[%s245_s1 + $0x4] ss:$8 sps:$4 sm:$0xff]   ;;  %v176_v14 = vld [vmem:[%s245_s1] ss:$8 sps:$4 sm:$0xff]  }
   0x6   :  { %92 = vmatprep.subr.bf16.mxu0 %v165_v4  ;;  %v18_v15 = vld [vmem:[%s248_s0] sm:$0xf] }
   0x8   :  { %136 = vperm.xlu0 %162, %v133_v10  }
   0x9   :  { %93 = vmatpush1.bf16.msra.mxu0 %v167_v6 }
   0xa   :  { %94 = vmatprep.subr.bf16.mxu0 %v168_v7 }
   0xd   :  { %95 = vmatpush1.bf16.msra.mxu0 %v170_v9 }
   0xe   :  { %96 = vmatprep.subr.bf16.mxu0 %v171_v11 }
  0x11   :  { %97 = vmatpush1.bf16.msra.mxu0 %v173_v12 }
  0x12   :  { %98 = vmatprep.subr.bf16.mxu0 %v174_v13 }
  0x15   :  { %99 = vmatpush1.bf16.msra.mxu0 %v176_v14 }
  0x18   :  { %160 = vmatmul.mubr.msk.bf16.vlgmr.msra.gmra.mxu0 %vm73_vm1, %v18_v15 }
  0x7f   :  { %v129_v16 = vpop.permute.xlu0 %128 }
  0x83   :  { %v137_v19 = vpop.permute.xlu0 %136 }
  0xd8   :  { %v118_v17 = vpop.f32.mrf.mxu0 }
  0xd9   :  { %v131_v18 = vmul.f32 %v129_v16, %v118_v17 }
  0xda   :  { %v120_v20 = vpop.f32.mrf.mxu0 }
  0xdb   :  { %v139_v21 = vadd.f32 %v137_v19, %v131_v18  ;;  %v132_v22 = vmul.f32 %v129_v16, %v120_v20 }
  0xdc   :  { %v122_v23 = vpop.f32.mrf.mxu0 }
  0xdd   :  { %v141_v24 = vmax.f32 %v139_v21, 0.0  ;;  %v140_v25 = vadd.f32 %v137_v19, %v132_v22 }
  0xde   :  { %v123_v26 = vpop.f32.mrf.mxu0 }
  0xdf   :  { %143 = vst [vmem:[%s249_s4] sm:$0xff] %v141_v24  ;;  %v142_v27 = vmax.f32 %v140_v25, 0.0 }
  0xe1   :  { %144 = vst [vmem:[%s249_s4 + $0x8] sm:$0xff] %v142_v27 }

// kernel: crnn_forward.37
= control target key start
LH: loop header
LB: loop body
LE: loop exit
PB: predicated region body
PF: predicated region fallthrough
CT: control target
= control target key end

     0   :  { %vm80_vm0 = vcmask 1043456   ;;  %v184_v1 = vmov 0   ;;  %vm76_vm1 = vcmask 588800   ;;  %s263_s1 = inlined_call_operand.vmem [shape: bf16[72,256], index: 1, kind: input, shape index: {}]   ;;  %s264_s2 = inlined_call_operand.vmem [shape: f32[8,1], index: 2, kind: input, shape index: {}]   ;;  %s265_s3 = inlined_call_operand.vmem [shape: f32[8,1], index: 3, kind: input, shape index: {}]   ;;  %s266_s0 = inlined_call_operand.vmem [shape: bf16[8,72], index: 0, kind: input, shape index: {}]   ;;  %s267_s4 = inlined_call_operand.vmem [shape: f32[8,256], index: 4, kind: input, shape index: {}]   ;;  %s268_s5 = inlined_call_operand.vmem [shape: f32[8,256], index: 5, kind: output, shape index: {}]  }
   0x1   :  { %v30_v0 = vld [vmem:[%s263_s1 + $0x40] sm:$0xff]  ;;  %119 = vmatprep.mubr.bf16.mxu0 %v184_v1  ;;  %169 = vset.pattern.permute.xlu0 %v184_v1  ;;  %v172_v4 = vld [vmem:[%s263_s1 + $0x34] ss:$8 sps:$4 sm:$0xff]   ;;  %v174_v6 = vld [vmem:[%s263_s1 + $0x30] ss:$8 sps:$4 sm:$0xff]  }
   0x2   :  { %v165_v2 = vcombine.high %v30_v0, %v30_v0  ;;  %v164_v3 = vcombine.low %v30_v0, %v30_v0  ;;  %v175_v7 = vld [vmem:[%s263_s1 + $0x24] ss:$8 sps:$4 sm:$0xff]   ;;  %v177_v9 = vld [vmem:[%s263_s1 + $0x20] ss:$8 sps:$4 sm:$0xff]   ;;  %v178_v11 = vld [vmem:[%s263_s1 + $0x14] ss:$8 sps:$4 sm:$0xff]  }
   0x3   :  { %v128_v8 = vld [vmem:[%s264_s2] sm:$0xff]  ;;  %v180_v12 = vld [vmem:[%s263_s1 + $0x10] ss:$8 sps:$4 sm:$0xff]   ;;  %v145_v24 = vld [vmem:[%s267_s4 + $0x8] sm:$0xff] }
   0x4   :  { %166 = vmatprep.subr.msk.bf16.mxu0 %vm80_vm0, %v165_v2  ;;  %v82_v5 = vsel %vm80_vm0, %v164_v3, 0  ;;  %131 = vperm.xlu0 %169, %v128_v8   ;;  %v136_v10 = vld [vmem:[%s265_s3] sm:$0xff] }
   0x5   :  { %94 = vmatpush1.bf16.msra.mxu0 %v82_v5  ;;  %v181_v13 = vld [vmem:[%s263_s1 + $0x4] ss:$8 sps:$4 sm:$0xff]   ;;  %v183_v14 = vld [vmem:[%s263_s1] ss:$8 sps:$4 sm:$0xff]  }
   0x6   :  { %95 = vmatprep.subr.bf16.mxu0 %v172_v4  ;;  %v21_v15 = vld [vmem:[%s266_s0] sm:$0xf] }
   0x7   :  { %v144_v20 = vld [vmem:[%s267_s4] sm:$0xff] }
   0x8   :  { %139 = vperm.xlu0 %169, %v136_v10  }
   0x9   :  { %96 = vmatpush1.bf16.msra.mxu0 %v174_v6 }
   0xa   :  { %97 = vmatprep.subr.bf16.mxu0 %v175_v7 }
   0xd   :  { %98 = vmatpush1.bf16.msra.mxu0 %v177_v9 }
   0xe   :  { %99 = vmatprep.subr.bf16.mxu0 %v178_v11 }
  0x11   :  { %100 = vmatpush1.bf16.msra.mxu0 %v180_v12 }
  0x12   :  { %101 = vmatprep.subr.bf16.mxu0 %v181_v13 }
  0x15   :  { %102 = vmatpush1.bf16.msra.mxu0 %v183_v14 }
  0x18   :  { %167 = vmatmul.mubr.msk.bf16.vlgmr.msra.gmra.mxu0 %vm76_vm1, %v21_v15 }
  0x7f   :  { %v132_v16 = vpop.permute.xlu0 %131 }
  0x83   :  { %v140_v19 = vpop.permute.xlu0 %139 }
  0xd8   :  { %v121_v17 = vpop.f32.mrf.mxu0 }
  0xd9   :  { %v134_v18 = vmul.f32 %v132_v16, %v121_v17 }
  0xda   :  { %v123_v21 = vpop.f32.mrf.mxu0 }
  0xdb   :  { %v142_v22 = vadd.f32 %v140_v19, %v134_v18  ;;  %v135_v23 = vmul.f32 %v132_v16, %v123_v21 }
  0xdc   :  { %v125_v25 = vpop.f32.mrf.mxu0 }
  0xdd   :  { %v146_v26 = vadd.f32 %v144_v20, %v142_v22  ;;  %v143_v27 = vadd.f32 %v140_v19, %v135_v23 }
  0xde   :  { %v126_v28 = vpop.f32.mrf.mxu0 }
  0xdf   :  { %v148_v29 = vmax.f32 %v146_v26, 0.0  ;;  %v147_v30 = vadd.f32 %v145_v24, %v143_v27 }
  0xe1   :  { %150 = vst [vmem:[%s268_s5] sm:$0xff] %v148_v29  ;;  %v149_v31 = vmax.f32 %v147_v30, 0.0 }
  0xe3   :  { %151 = vst [vmem:[%s268_s5 + $0x8] sm:$0xff] %v149_v31 }

// kernel: crnn_forward.43
= control target key start
LH: loop header
LB: loop body
LE: loop exit
PB: predicated region body
PF: predicated region fallthrough
CT: control target
= control target key end

     0   :  { %vm65_vm0 = vcmask 1043456   ;;  %v185_v0 = vmov 0.0   ;;  %vm186_vm1 = vmmov 0   ;;  %v187_v3 = vmov 0   ;;  %s249_s1 = inlined_call_operand.vmem [shape: bf16[72,64], index: 1, kind: input, shape index: {}]   ;;  %s250_s2 = inlined_call_operand.vmem [shape: f32[16,1], index: 2, kind: input, shape index: {}]   ;;  %s251_s0 = inlined_call_operand.vmem [shape: bf16[16,72], index: 0, kind: input, shape index: {}]   ;;  %s252_s3 = inlined_call_operand.vmem [shape: f32[16,1], index: 3, kind: input, shape index: {}]   ;;  %s253_s4 = inlined_call_operand.vmem [shape: f32[16,64], index: 4, kind: output, shape index: {}]  }
   0x1   :  { %160 = vmatprep.subr.bf16.mxu0 %v185_v0  ;;  %v179_v1 = vld [vmem:[%s249_s1 + $0x20] ss:$0 sps:$4 sm:$0xff]   ;;  %170 = vmatprep.mubr.msk.bf16.mxu0 %vm186_vm1, %v185_v0  ;;  %v180_v4 = vld [vmem:[%s249_s1 + $0x18] sm:$0xff]   ;;  %v181_v7 = vld [vmem:[%s249_s1 + $0x10] sm:$0xff]   ;;  %vm61_vm2 = vcmask 588800   ;;  %vm140_vm3 = vcmask 523264  }
   0x2   :  { %v67_v2 = vsel %vm65_vm0, %v179_v1, 0  ;;  %177 = vset.pattern.permute.xlu0 %v187_v3  ;;  %178 = vset.pattern.permute.xlu1 %v187_v3  ;;  %v110_v5 = vld [vmem:[%s250_s2] sm:$0xff]  ;;  %v111_v8 = vld [vmem:[%s250_s2 + $0x8] sm:$0xff] }
   0x3   :  { %161 = vmatpush3.bf16.msra.mxu0 %v67_v2  ;;  %114 = vperm.xlu0 %177, %v110_v5   ;;  %v124_v6 = vld [vmem:[%s252_s3] sm:$0xff]  ;;  %v125_v9 = vld [vmem:[%s252_s3 + $0x8] sm:$0xff] }
   0x4   :  { %162 = vmatprep.subr.bf16.mxu0 %v185_v0  ;;  %128 = vperm.xlu1 %178, %v124_v6   ;;  %v182_v10 = vld [vmem:[%s249_s1 + $0x8] sm:$0xff]   ;;  %v183_v11 = vld [vmem:[%s249_s1] sm:$0xff]  }
   0x5   :  { %v184_v12 = vld [vmem:[%s251_s0] sm:$0xff]  }
   0x7   :  { %163 = vmatpush3.bf16.msra.mxu0 %v180_v4  ;;  %119 = vperm.xlu0 %177, %v111_v8  }
   0x8   :  { %164 = vmatprep.subr.bf16.mxu0 %v185_v0  ;;  %133 = vperm.xlu1 %178, %v125_v9  }
   0xb   :  { %165 = vmatpush3.bf16.msra.mxu0 %v181_v7 }
   0xc   :  { %166 = vmatprep.subr.bf16.mxu0 %v185_v0 }
   0xf   :  { %167 = vmatpush3.bf16.msra.mxu0 %v182_v10 }
  0x10   :  { %168 = vmatprep.subr.bf16.mxu0 %v185_v0 }
  0x13   :  { %169 = vmatpush3.bf16.msra.mxu0 %v183_v11 }
  0x16   :  { %171 = vmatmul.mubr.msk.bf16.vlgmr.msra.gmra.mxu0 %vm61_vm2, %v184_v12 }
  0x7e   :  { %v115_v13 = vpop.permute.xlu0 %114 }
  0x7f   :  { %v129_v14 = vpop.permute.xlu1 %128 }
  0x82   :  { %v120_v19 = vpop.permute.xlu0 %119 }
  0x83   :  { %v134_v23 = vpop.permute.xlu1 %133 }
  0xd6   :  { %v103_v15 = vpop.f32.mrf.mxu0 }
  0xd7   :  { %v122_v16 = vmul.f32 %v115_v13, %v103_v15 }
  0xd8   :  { %v172_v17 = vpop.f32.mrf.mxu0 }
  0xd9   :  { %v136_v18 = vadd.f32 %v129_v14, %v122_v16 }
  0xda   :  { %v106_v20 = vpop.f32.mrf.mxu0 }
  0xdb   :  { %v138_v21 = vmax.f32 %v136_v18, 0.0  ;;  %v123_v22 = vmul.f32 %v120_v19, %v106_v20 }
  0xdc   :  { %v173_v24 = vpop.f32.mrf.mxu0 }
  0xdd   :  { %141 = vst.msk [vmem:[%s253_s4] sm:$0xff] %vm140_vm3, %v138_v21  ;;  %v137_v25 = vadd.f32 %v134_v23, %v123_v22 }
  0xdf   :  { %v139_v26 = vmax.f32 %v137_v25, 0.0 }
  0xe1   :  { %142 = vst.msk [vmem:[%s253_s4 + $0x8] sm:$0xff] %vm140_vm3, %v139_v26 }

// kernel: crnn_forward.42
= control target key start
LH: loop header
LB: loop body
LE: loop exit
PB: predicated region body
PF: predicated region fallthrough
CT: control target
= control target key end

     0   :  { %vm30_vm0 = vcmask 1043456   ;;  %v126_v0 = vmov 0.0   ;;  %vm127_vm1 = vmmov 0   ;;  %vm26_vm2 = vcmask 64512   ;;  %s178_s1 = inlined_call_operand.vmem [shape: bf16[8,64], index: 1, kind: input, shape index: {}]   ;;  %s179_s0 = inlined_call_operand.vmem [shape: bf16[16,8], index: 0, kind: input, shape index: {}]   ;;  %s180_s2 = inlined_call_operand.vmem [shape: f32[16,1], index: 2, kind: input, shape index: {}]   ;;  %s181_s3 = inlined_call_operand.vmem [shape: f32[16,1], index: 3, kind: input, shape index: {}]   ;;  %s182_s4 = inlined_call_operand.vmem [shape: f32[16,64], index: 4, kind: output, shape index: {}]  }
   0x1   :  { %114 = vmatprep.subr.bf16.mxu0 %v126_v0  ;;  %v20_v1 = vld [vmem:[%s178_s1] sm:$0xf]  ;;  %116 = vmatprep.mubr.msk.bf16.mxu0 %vm127_vm1, %v126_v0  ;;  %v128_v6 = vmov 0   ;;  %v76_v7 = vld [vmem:[%s180_s2 + $0x8] sm:$0xff]  ;;  %vm103_vm3 = vcmask 523264  }
   0x2   :  { %v32_v2 = vsel %vm30_vm0, %v20_v1, 0  ;;  %v125_v3 = vld [vmem:[%s179_s0] sm:$0xff]   ;;  %123 = vset.pattern.permute.xlu0 %v128_v6  ;;  %124 = vset.pattern.permute.xlu1 %v128_v6  ;;  %v90_v8 = vld [vmem:[%s181_s3 + $0x8] sm:$0xff] }
   0x3   :  { %v75_v4 = vld [vmem:[%s180_s2] sm:$0xff]  ;;  %115 = vmatpush3.bf16.msra.mxu0 %v32_v2 }
   0x4   :  { %v89_v5 = vld [vmem:[%s181_s3] sm:$0xff]  ;;  %79 = vperm.xlu0 %123, %v75_v4  }
   0x5   :  { %93 = vperm.xlu1 %124, %v89_v5  }
   0x6   :  { %117 = vmatmul.mubr.msk.bf16.vlgmr.msra.gmra.mxu0 %vm26_vm2, %v125_v3 }
   0x8   :  { %84 = vperm.xlu0 %123, %v76_v7  }
   0x9   :  { %98 = vperm.xlu1 %124, %v90_v8  }
  0x7f   :  { %v80_v9 = vpop.permute.xlu0 %79 }
  0x80   :  { %v94_v10 = vpop.permute.xlu1 %93 }
  0x83   :  { %v85_v15 = vpop.permute.xlu0 %84 }
  0x84   :  { %v99_v18 = vpop.permute.xlu1 %98 }
  0xc6   :  { %v68_v11 = vpop.f32.mrf.mxu0 }
  0xc7   :  { %v87_v12 = vmul.f32 %v80_v9, %v68_v11 }
  0xc8   :  { %v118_v13 = vpop.f32.mrf.mxu0 }
  0xc9   :  { %v101_v14 = vadd.f32 %v94_v10, %v87_v12 }
  0xca   :  { %v71_v16 = vpop.f32.mrf.mxu0 }
  0xcb   :  { %104 = vst.msk [vmem:[%s182_s4] sm:$0xff] %vm103_vm3, %v101_v14  ;;  %v88_v17 = vmul.f32 %v85_v15, %v71_v16 }
  0xcc   :  { %v119_v19 = vpop.f32.mrf.mxu0 }
  0xcd   :  { %v102_v20 = vadd.f32 %v99_v18, %v88_v17 }
  0xcf   :  { %105 = vst.msk [vmem:[%s182_s4 + $0x8] sm:$0xff] %vm103_vm3, %v102_v20 }

// kernel: crnn_forward.44
= control target key start
LH: loop header
LB: loop body
LE: loop exit
PB: predicated region body
PF: predicated region fallthrough
CT: control target
= control target key end

     0   :  { %v217_v0 = vmov 0   ;;  %vm104_vm0 = vcmask 130048   ;;  %vm183_vm1 = vcmask 523264   ;;  %s305_s1 = inlined_call_operand.vmem [shape: bf16[144,64], index: 1, kind: input, shape index: {}]   ;;  %s306_s0 = inlined_call_operand.vmem [shape: bf16[16,144], index: 0, kind: input, shape index: {}]   ;;  %s307_s2 = inlined_call_operand.vmem [shape: f32[16,1], index: 2, kind: input, shape index: {}]   ;;  %s308_s3 = inlined_call_operand.vmem [shape: f32[16,1], index: 3, kind: input, shape index: {}]   ;;  %s309_s4 = inlined_call_operand.vmem [shape: f32[16,64], index: 4, kind: input, shape index: {}]   ;;  %s310_s5 = inlined_call_operand.vmem [shape: f32[16,64], index: 5, kind: output, shape index: {}]  }
   0x1   :  { %108 = vmatprep.subr.bf16.mxu0 %v217_v0  ;;  %v205_v1 = vld [vmem:[%s305_s1 + $0x38] sm:$0xff]   ;;  %203 = vset.pattern.permute.xlu0 %v217_v0  ;;  %v206_v2 = vld [vmem:[%s305_s1 + $0x30] sm:$0xff]   ;;  %v207_v3 = vld [vmem:[%s305_s1 + $0x28] sm:$0xff]  }
   0x2   :  { %204 = vset.pattern.permute.xlu1 %v217_v0  ;;  %109 = vmatpush1.bf16.msra.mxu0 %v205_v1  ;;  %v208_v4 = vld [vmem:[%s305_s1 + $0x20] sm:$0xff]   ;;  %v150_v8 = vld [vmem:[%s307_s2 + $0x8] sm:$0xff]  ;;  %v209_v10 = vld [vmem:[%s305_s1 + $0x18] sm:$0xff]  }
   0x3   :  { %110 = vmatprep.subr.bf16.mxu0 %v217_v0  ;;  %v216_v5 = vld [vmem:[%s306_s0 + $0x4] ss:$8 sps:$4 sm:$0xff]   ;;  %v210_v11 = vld [vmem:[%s305_s1 + $0x10] sm:$0xff]   ;;  %v214_v15 = vld [vmem:[%s306_s0] ss:$8 sps:$4 sm:$0xff]  }
   0x4   :  { %v149_v6 = vld [vmem:[%s307_s2] sm:$0xff]  ;;  %201 = vmatprep.mubr.msk.bf16.mxu0 %vm104_vm0, %v216_v5  ;;  %v164_v9 = vld [vmem:[%s308_s3 + $0x8] sm:$0xff] }
   0x5   :  { %v163_v7 = vld [vmem:[%s308_s3] sm:$0xff]  ;;  %153 = vperm.xlu0 %203, %v149_v6   ;;  %v211_v12 = vld [vmem:[%s305_s1 + $0x8] sm:$0xff]  }
   0x6   :  { %111 = vmatpush1.bf16.msra.mxu0 %v206_v2  ;;  %167 = vperm.xlu1 %204, %v163_v7   ;;  %v212_v13 = vld [vmem:[%s305_s1] sm:$0xff]   ;;  %v178_v28 = vld [vmem:[%s309_s4 + $0x8] sm:$0xff] }
   0x7   :  { %112 = vmatprep.subr.bf16.mxu0 %v217_v0  ;;  %v213_v14 = vld [vmem:[%s305_s1 + $0x40] sm:$0xff]  }
   0x8   :  { %v177_v20 = vld [vmem:[%s309_s4] sm:$0xff] }
   0x9   :  { %158 = vperm.xlu0 %203, %v150_v8  }
   0xa   :  { %113 = vmatpush1.bf16.msra.mxu0 %v207_v3  ;;  %172 = vperm.xlu1 %204, %v164_v9  }
   0xb   :  { %114 = vmatprep.subr.bf16.mxu0 %v217_v0 }
   0xe   :  { %115 = vmatpush1.bf16.msra.mxu0 %v208_v4 }
   0xf   :  { %116 = vmatprep.subr.bf16.mxu0 %v217_v0 }
  0x12   :  { %117 = vmatpush1.bf16.msra.mxu0 %v209_v10 }
  0x13   :  { %118 = vmatprep.subr.bf16.mxu0 %v217_v0 }
  0x16   :  { %119 = vmatpush1.bf16.msra.mxu0 %v210_v11 }
  0x17   :  { %120 = vmatprep.subr.bf16.mxu0 %v217_v0 }
  0x1a   :  { %121 = vmatpush1.bf16.msra.mxu0 %v211_v12 }
  0x1b   :  { %122 = vmatprep.subr.bf16.mxu0 %v217_v0 }
  0x1e   :  { %123 = vmatpush1.bf16.msra.mxu0 %v212_v13 }
  0x1f   :  { %138 = vmatprep.subr.bf16.mxu0 %v217_v0 }
  0x22   :  { %139 = vmatpush2.bf16.msra.mxu0 %v213_v14 }
  0x25   :  { %141 = vmatmul.mubr.bf16.vlgmr.msra.gmra.mxu0 %v214_v15 }
  0x80   :  { %v154_v16 = vpop.permute.xlu0 %153 }
  0x81   :  { %v168_v17 = vpop.permute.xlu1 %167 }
  0x84   :  { %v159_v23 = vpop.permute.xlu0 %158 }
  0x85   :  { %v173_v27 = vpop.permute.xlu1 %172 }
  0xe5   :  { %v142_v18 = vpop.f32.mrf.mxu0 }
  0xe6   :  { %v161_v19 = vmul.f32 %v154_v16, %v142_v18 }
  0xe7   :  { %v144_v21 = vpop.f32.mrf.mxu0 }
  0xe8   :  { %v175_v22 = vadd.f32 %v168_v17, %v161_v19 }
  0xe9   :  { %v145_v24 = vpop.f32.mrf.mxu0 }
  0xea   :  { %v179_v25 = vadd.f32 %v177_v20, %v175_v22  ;;  %v162_v26 = vmul.f32 %v159_v23, %v145_v24 }
  0xeb   :  { %v147_v29 = vpop.f32.mrf.mxu0 }
  0xec   :  { %v181_v30 = vmax.f32 %v179_v25, 0.0  ;;  %v176_v31 = vadd.f32 %v173_v27, %v162_v26 }
  0xee   :  { %184 = vst.msk [vmem:[%s310_s5] sm:$0xff] %vm183_vm1, %v181_v30  ;;  %v180_v32 = vadd.f32 %v178_v28, %v176_v31 }
  0xf0   :  { %v182_v33 = vmax.f32 %v180_v32, 0.0 }
  0xf2   :  { %185 = vst.msk [vmem:[%s310_s5 + $0x8] sm:$0xff] %vm183_vm1, %v182_v33 }

// kernel: crnn_forward.45
= control target key start
LH: loop header
LB: loop body
LE: loop exit
PB: predicated region body
PF: predicated region fallthrough
CT: control target
= control target key end

     0   :  { %v210_v0 = vmov 0   ;;  %vm101_vm0 = vcmask 130048   ;;  %vm176_vm1 = vcmask 523264   ;;  %s287_s1 = inlined_call_operand.vmem [shape: bf16[144,64], index: 1, kind: input, shape index: {}]   ;;  %s288_s0 = inlined_call_operand.vmem [shape: bf16[16,144], index: 0, kind: input, shape index: {}]   ;;  %s289_s2 = inlined_call_operand.vmem [shape: f32[16,1], index: 2, kind: input, shape index: {}]   ;;  %s290_s3 = inlined_call_operand.vmem [shape: f32[16,1], index: 3, kind: input, shape index: {}]   ;;  %s291_s4 = inlined_call_operand.vmem [shape: f32[16,64], index: 4, kind: output, shape index: {}]  }
   0x1   :  { %105 = vmatprep.subr.bf16.mxu0 %v210_v0  ;;  %v198_v1 = vld [vmem:[%s287_s1 + $0x38] sm:$0xff]   ;;  %196 = vset.pattern.permute.xlu0 %v210_v0  ;;  %v199_v2 = vld [vmem:[%s287_s1 + $0x30] sm:$0xff]   ;;  %v200_v3 = vld [vmem:[%s287_s1 + $0x28] sm:$0xff]  }
   0x2   :  { %197 = vset.pattern.permute.xlu1 %v210_v0  ;;  %106 = vmatpush1.bf16.msra.mxu0 %v198_v1  ;;  %v201_v4 = vld [vmem:[%s287_s1 + $0x20] sm:$0xff]   ;;  %v147_v8 = vld [vmem:[%s289_s2 + $0x8] sm:$0xff]  ;;  %v202_v10 = vld [vmem:[%s287_s1 + $0x18] sm:$0xff]  }
   0x3   :  { %107 = vmatprep.subr.bf16.mxu0 %v210_v0  ;;  %v209_v5 = vld [vmem:[%s288_s0 + $0x4] ss:$8 sps:$4 sm:$0xff]   ;;  %v203_v11 = vld [vmem:[%s287_s1 + $0x10] sm:$0xff]   ;;  %v207_v15 = vld [vmem:[%s288_s0] ss:$8 sps:$4 sm:$0xff]  }
   0x4   :  { %v146_v6 = vld [vmem:[%s289_s2] sm:$0xff]  ;;  %194 = vmatprep.mubr.msk.bf16.mxu0 %vm101_vm0, %v209_v5  ;;  %v161_v9 = vld [vmem:[%s290_s3 + $0x8] sm:$0xff] }
   0x5   :  { %v160_v7 = vld [vmem:[%s290_s3] sm:$0xff]  ;;  %150 = vperm.xlu0 %196, %v146_v6   ;;  %v204_v12 = vld [vmem:[%s287_s1 + $0x8] sm:$0xff]  }
   0x6   :  { %108 = vmatpush1.bf16.msra.mxu0 %v199_v2  ;;  %164 = vperm.xlu1 %197, %v160_v7   ;;  %v205_v13 = vld [vmem:[%s287_s1] sm:$0xff]  }
   0x7   :  { %109 = vmatprep.subr.bf16.mxu0 %v210_v0  ;;  %v206_v14 = vld [vmem:[%s287_s1 + $0x40] sm:$0xff]  }
   0x9   :  { %155 = vperm.xlu0 %196, %v147_v8  }
   0xa   :  { %110 = vmatpush1.bf16.msra.mxu0 %v200_v3  ;;  %169 = vperm.xlu1 %197, %v161_v9  }
   0xb   :  { %111 = vmatprep.subr.bf16.mxu0 %v210_v0 }
   0xe   :  { %112 = vmatpush1.bf16.msra.mxu0 %v201_v4 }
   0xf   :  { %113 = vmatprep.subr.bf16.mxu0 %v210_v0 }
  0x12   :  { %114 = vmatpush1.bf16.msra.mxu0 %v202_v10 }
  0x13   :  { %115 = vmatprep.subr.bf16.mxu0 %v210_v0 }
  0x16   :  { %116 = vmatpush1.bf16.msra.mxu0 %v203_v11 }
  0x17   :  { %117 = vmatprep.subr.bf16.mxu0 %v210_v0 }
  0x1a   :  { %118 = vmatpush1.bf16.msra.mxu0 %v204_v12 }
  0x1b   :  { %119 = vmatprep.subr.bf16.mxu0 %v210_v0 }
  0x1e   :  { %120 = vmatpush1.bf16.msra.mxu0 %v205_v13 }
  0x1f   :  { %135 = vmatprep.subr.bf16.mxu0 %v210_v0 }
  0x22   :  { %136 = vmatpush2.bf16.msra.mxu0 %v206_v14 }
  0x25   :  { %138 = vmatmul.mubr.bf16.vlgmr.msra.gmra.mxu0 %v207_v15 }
  0x80   :  { %v151_v16 = vpop.permute.xlu0 %150 }
  0x81   :  { %v165_v17 = vpop.permute.xlu1 %164 }
  0x84   :  { %v156_v22 = vpop.permute.xlu0 %155 }
  0x85   :  { %v170_v26 = vpop.permute.xlu1 %169 }
  0xe5   :  { %v139_v18 = vpop.f32.mrf.mxu0 }
  0xe6   :  { %v158_v19 = vmul.f32 %v151_v16, %v139_v18 }
  0xe7   :  { %v141_v20 = vpop.f32.mrf.mxu0 }
  0xe8   :  { %v172_v21 = vadd.f32 %v165_v17, %v158_v19 }
  0xe9   :  { %v142_v23 = vpop.f32.mrf.mxu0 }
  0xea   :  { %v174_v24 = vmax.f32 %v172_v21, 0.0  ;;  %v159_v25 = vmul.f32 %v156_v22, %v142_v23 }
  0xeb   :  { %v144_v27 = vpop.f32.mrf.mxu0 }
  0xec   :  { %177 = vst.msk [vmem:[%s291_s4] sm:$0xff] %vm176_vm1, %v174_v24  ;;  %v173_v28 = vadd.f32 %v170_v26, %v159_v25 }
  0xee   :  { %v175_v29 = vmax.f32 %v173_v28, 0.0 }
  0xf0   :  { %178 = vst.msk [vmem:[%s291_s4 + $0x8] sm:$0xff] %vm176_vm1, %v175_v29 }

// kernel: crnn_forward.52
= control target key start
LH: loop header
LB: loop body
LE: loop exit
PB: predicated region body
PF: predicated region fallthrough
CT: control target
= control target key end

     0   :  { %v287_v0 = vmov 0   ;;  %vm112_vm0 = vcmask 130048   ;;  %s414_s1 = inlined_call_operand.vmem [shape: bf16[144,16], index: 1, kind: input, shape index: {}]   ;;  %s415_s0 = inlined_call_operand.vmem [shape: bf16[32,144], index: 0, kind: input, shape index: {}]   ;;  %s416_s2 = inlined_call_operand.vmem [shape: f32[32,1], index: 2, kind: input, shape index: {}]   ;;  %s417_s3 = inlined_call_operand.vmem [shape: f32[32,1], index: 3, kind: input, shape index: {}]   ;;  %s418_s4 = inlined_call_operand.vmem [shape: f32[32,16], index: 4, kind: output, shape index: {}]  }
   0x1   :  { %119 = vmatprep.subr.bf16.mxu0 %v287_v0  ;;  %251 = vmatprep.subr.bf16.mxu1 %v287_v0  ;;  %v272_v1 = vld [vmem:[%s414_s1 + $0x38] sm:$0xff]   ;;  %v273_v2 = vld [vmem:[%s414_s1 + $0x30] sm:$0xff]   ;;  %v274_v3 = vld [vmem:[%s414_s1 + $0x28] sm:$0xff]  }
   0x2   :  { %271 = vset.pattern.permute.xlu1 %v287_v0  ;;  %270 = vset.pattern.permute.xlu0 %v287_v0  ;;  %v275_v4 = vld [vmem:[%s414_s1 + $0x20] sm:$0xff]   ;;  %v286_v6 = vld [vmem:[%s415_s0 + $0x14] ss:$8 sps:$4 sm:$0xff]   ;;  %v169_v11 = vld [vmem:[%s416_s2 + $0x8] sm:$0xff] }
   0x3   :  { %120 = vmatpush1.bf16.msra.mxu0 %v272_v1  ;;  %260 = vmatpush1.bf16.msra.mxu1 %v272_v1  ;;  %v283_v5 = vld [vmem:[%s415_s0 + $0x4] ss:$8 sps:$4 sm:$0xff]   ;;  %v170_v7 = vld [vmem:[%s416_s2 + $0x10] sm:$0xff]  ;;  %v171_v9 = vld [vmem:[%s416_s2 + $0x18] sm:$0xff] }
   0x4   :  { %121 = vmatprep.subr.bf16.mxu0 %v287_v0  ;;  %252 = vmatprep.subr.bf16.mxu1 %v287_v0  ;;  %v168_v8 = vld [vmem:[%s416_s2] sm:$0xff]  ;;  %v276_v10 = vld [vmem:[%s414_s1 + $0x18] sm:$0xff]   ;;  %v197_v12 = vld [vmem:[%s417_s3 + $0x8] sm:$0xff] }
   0x5   :  { %249 = vmatprep.mubr.msk.bf16.mxu0 %vm112_vm0, %v283_v5  ;;  %184 = vperm.xlu1 %271, %v170_v7   ;;  %v277_v13 = vld [vmem:[%s414_s1 + $0x10] sm:$0xff]   ;;  %v196_v14 = vld [vmem:[%s417_s3] sm:$0xff]  ;;  %v199_v15 = vld [vmem:[%s417_s3 + $0x18] sm:$0xff] }
   0x6   :  { %250 = vmatprep.mubr.msk.bf16.mxu1 %vm112_vm0, %v286_v6  ;;  %174 = vperm.xlu0 %270, %v168_v8   ;;  %v278_v16 = vld [vmem:[%s414_s1 + $0x8] sm:$0xff]   ;;  %v198_v17 = vld [vmem:[%s417_s3 + $0x10] sm:$0xff]  ;;  %v279_v18 = vld [vmem:[%s414_s1] sm:$0xff]  }
   0x7   :  { %122 = vmatpush1.bf16.msra.mxu0 %v273_v2  ;;  %261 = vmatpush1.bf16.msra.mxu1 %v273_v2  ;;  %v280_v19 = vld [vmem:[%s414_s1 + $0x40] sm:$0xff]   ;;  %v284_v21 = vld [vmem:[%s415_s0 + $0x10] ss:$8 sps:$4 sm:$0xff]  }
   0x8   :  { %123 = vmatprep.subr.bf16.mxu0 %v287_v0  ;;  %253 = vmatprep.subr.bf16.mxu1 %v287_v0  ;;  %v281_v20 = vld [vmem:[%s415_s0] ss:$8 sps:$4 sm:$0xff]  }
   0x9   :  { %189 = vperm.xlu1 %271, %v171_v9  }
   0xa   :  { %179 = vperm.xlu0 %270, %v169_v11  }
   0xb   :  { %124 = vmatpush1.bf16.msra.mxu0 %v274_v3  ;;  %262 = vmatpush1.bf16.msra.mxu1 %v274_v3 }
   0xc   :  { %125 = vmatprep.subr.bf16.mxu0 %v287_v0  ;;  %254 = vmatprep.subr.bf16.mxu1 %v287_v0 }
   0xd   :  { %207 = vperm.xlu1 %271, %v197_v12  }
   0xe   :  { %202 = vperm.xlu0 %270, %v196_v14  }
   0xf   :  { %126 = vmatpush1.bf16.msra.mxu0 %v275_v4  ;;  %263 = vmatpush1.bf16.msra.mxu1 %v275_v4 }
  0x10   :  { %127 = vmatprep.subr.bf16.mxu0 %v287_v0  ;;  %255 = vmatprep.subr.bf16.mxu1 %v287_v0 }
  0x11   :  { %217 = vperm.xlu1 %271, %v199_v15  }
  0x12   :  { %212 = vperm.xlu0 %270, %v198_v17  }
  0x13   :  { %128 = vmatpush1.bf16.msra.mxu0 %v276_v10  ;;  %264 = vmatpush1.bf16.msra.mxu1 %v276_v10 }
  0x14   :  { %129 = vmatprep.subr.bf16.mxu0 %v287_v0  ;;  %256 = vmatprep.subr.bf16.mxu1 %v287_v0 }
  0x17   :  { %130 = vmatpush1.bf16.msra.mxu0 %v277_v13  ;;  %265 = vmatpush1.bf16.msra.mxu1 %v277_v13 }
  0x18   :  { %131 = vmatprep.subr.bf16.mxu0 %v287_v0  ;;  %257 = vmatprep.subr.bf16.mxu1 %v287_v0 }
  0x1b   :  { %132 = vmatpush1.bf16.msra.mxu0 %v278_v16  ;;  %266 = vmatpush1.bf16.msra.mxu1 %v278_v16 }
  0x1c   :  { %133 = vmatprep.subr.bf16.mxu0 %v287_v0  ;;  %258 = vmatprep.subr.bf16.mxu1 %v287_v0 }
  0x1f   :  { %134 = vmatpush1.bf16.msra.mxu0 %v279_v18  ;;  %267 = vmatpush1.bf16.msra.mxu1 %v279_v18 }
  0x20   :  { %149 = vmatprep.subr.bf16.mxu0 %v287_v0  ;;  %259 = vmatprep.subr.bf16.mxu1 %v287_v0 }
  0x23   :  { %150 = vmatpush2.bf16.msra.mxu0 %v280_v19  ;;  %268 = vmatpush2.bf16.msra.mxu1 %v280_v19 }
  0x26   :  { %152 = vmatmul.mubr.bf16.vlgmr.msra.gmra.mxu0 %v281_v20  ;;  %160 = vmatmul.mubr.bf16.vlgmr.msra.gmra.mxu1 %v284_v21 }
  0x80   :  { %v185_v23 = vpop.permute.xlu1 %184 }
  0x81   :  { %v175_v22 = vpop.permute.xlu0 %174 }
  0x84   :  { %v190_v25 = vpop.permute.xlu1 %189 }
  0x85   :  { %v180_v24 = vpop.permute.xlu0 %179 }
  0x88   :  { %v208_v27 = vpop.permute.xlu1 %207 }
  0x89   :  { %v203_v26 = vpop.permute.xlu0 %202 }
  0x8c   :  { %v218_v39 = vpop.permute.xlu1 %217 }
  0x8d   :  { %v213_v30 = vpop.permute.xlu0 %212 }
  0xe6   :  { %v153_v28 = vpop.f32.mrf.mxu0  ;;  %v161_v29 = vpop.f32.mrf.mxu1 }
  0xe7   :  { %v192_v31 = vmul.f32 %v175_v22, %v153_v28  ;;  %v194_v32 = vmul.f32 %v185_v23, %v161_v29 }
  0xe8   :  { %v155_v33 = vpop.f32.mrf.mxu0  ;;  %v163_v34 = vpop.f32.mrf.mxu1 }
  0xe9   :  { %v220_v35 = vadd.f32 %v203_v26, %v192_v31  ;;  %v222_v36 = vadd.f32 %v213_v30, %v194_v32 }
  0xea   :  { %v156_v37 = vpop.f32.mrf.mxu0  ;;  %v164_v38 = vpop.f32.mrf.mxu1 }
  0xeb   :  { %v224_v40 = vmax.f32 %v220_v35, 0.0  ;;  %v226_v41 = vmax.f32 %v222_v36, 0.0  ;;  %v193_v42 = vmul.f32 %v180_v24, %v156_v37  ;;  %v195_v43 = vmul.f32 %v190_v25, %v164_v38 }
  0xec   :  { %v158_v44 = vpop.f32.mrf.mxu0  ;;  %v166_v45 = vpop.f32.mrf.mxu1 }
  0xed   :  { %228 = vst.msk [vmem:[%s418_s4] sm:$0xff] %vm112_vm0, %v224_v40  ;;  %230 = vst.msk [vmem:[%s418_s4 + $0x10] sm:$0xff] %vm112_vm0, %v226_v41  ;;  %v221_v46 = vadd.f32 %v208_v27, %v193_v42  ;;  %v223_v47 = vadd.f32 %v218_v39, %v195_v43 }
  0xef   :  { %v225_v48 = vmax.f32 %v221_v46, 0.0  ;;  %v227_v49 = vmax.f32 %v223_v47, 0.0 }
  0xf1   :  { %229 = vst.msk [vmem:[%s418_s4 + $0x8] sm:$0xff] %vm112_vm0, %v225_v48  ;;  %231 = vst.msk [vmem:[%s418_s4 + $0x18] sm:$0xff] %vm112_vm0, %v227_v49 }

// kernel: crnn_forward.51
= control target key start
LH: loop header
LB: loop body
LE: loop exit
PB: predicated region body
PF: predicated region fallthrough
CT: control target
= control target key end

     0   :  { %vm40_vm0 = vcmask 130048   ;;  %v180_v1 = vmov 0   ;;  %s257_s1 = inlined_call_operand.vmem [shape: bf16[16,16], index: 1, kind: input, shape index: {}]   ;;  %s258_s0 = inlined_call_operand.vmem [shape: bf16[32,16], index: 0, kind: input, shape index: {}]   ;;  %s259_s2 = inlined_call_operand.vmem [shape: f32[32,1], index: 2, kind: input, shape index: {}]   ;;  %s260_s3 = inlined_call_operand.vmem [shape: f32[32,1], index: 3, kind: input, shape index: {}]   ;;  %s261_s4 = inlined_call_operand.vmem [shape: f32[32,16], index: 4, kind: output, shape index: {}]  }
   0x1   :  { %v177_v0 = vld [vmem:[%s257_s1] sm:$0xff]   ;;  %176 = vset.pattern.permute.xlu1 %v180_v1  ;;  %175 = vset.pattern.permute.xlu0 %v180_v1  ;;  %v179_v3 = vld [vmem:[%s258_s0 + $0x8] sm:$0xff]   ;;  %v98_v4 = vld [vmem:[%s259_s2 + $0x10] sm:$0xff] }
   0x2   :  { %v178_v2 = vld [vmem:[%s258_s0] sm:$0xff]   ;;  %168 = vmatprep.subr.bf16.mxu0 %v177_v0  ;;  %112 = vperm.xlu1 %176, %v98_v4   ;;  %v99_v6 = vld [vmem:[%s259_s2 + $0x18] sm:$0xff]  ;;  %v97_v7 = vld [vmem:[%s259_s2 + $0x8] sm:$0xff] }
   0x3   :  { %169 = vmatpush3.bf16.msra.mxu0 %v177_v0  ;;  %170 = vmatprep.mubr.msk.bf16.mxu0 %vm40_vm0, %v178_v2  ;;  %v96_v5 = vld [vmem:[%s259_s2] sm:$0xff]  ;;  %v125_v8 = vld [vmem:[%s260_s3 + $0x8] sm:$0xff]  ;;  %v127_v10 = vld [vmem:[%s260_s3 + $0x18] sm:$0xff] }
   0x4   :  { %102 = vperm.xlu0 %175, %v96_v5   ;;  %v124_v9 = vld [vmem:[%s260_s3] sm:$0xff]  ;;  %v126_v11 = vld [vmem:[%s260_s3 + $0x10] sm:$0xff] }
   0x6   :  { %171 = vmatmul.mubr.msk.bf16.vlgmr.msra.gmra.mxu0 %vm40_vm0, %v179_v3  ;;  %117 = vperm.xlu1 %176, %v99_v6  }
   0x8   :  { %107 = vperm.xlu0 %175, %v97_v7  }
   0xa   :  { %135 = vperm.xlu1 %176, %v125_v8  }
   0xc   :  { %130 = vperm.xlu0 %175, %v124_v9  }
   0xe   :  { %145 = vperm.xlu1 %176, %v127_v10  }
  0x10   :  { %140 = vperm.xlu0 %175, %v126_v11  }
  0x7d   :  { %v113_v13 = vpop.permute.xlu1 %112 }
  0x7f   :  { %v103_v12 = vpop.permute.xlu0 %102 }
  0x81   :  { %v118_v15 = vpop.permute.xlu1 %117 }
  0x83   :  { %v108_v14 = vpop.permute.xlu0 %107 }
  0x85   :  { %v136_v17 = vpop.permute.xlu1 %135 }
  0x87   :  { %v131_v16 = vpop.permute.xlu0 %130 }
  0x89   :  { %v146_v27 = vpop.permute.xlu1 %145 }
  0x8b   :  { %v141_v20 = vpop.permute.xlu0 %140 }
  0xc6   :  { %v172_v18 = vpop.f32.mrf.mxu0 }
  0xc7   :  { %v122_v19 = vmul.f32 %v172_v18, %v113_v13 }
  0xc8   :  { %v81_v21 = vpop.f32.mrf.mxu0 }
  0xc9   :  { %v150_v22 = vadd.f32 %v141_v20, %v122_v19  ;;  %v120_v23 = vmul.f32 %v103_v12, %v81_v21 }
  0xca   :  { %v173_v24 = vpop.f32.mrf.mxu0 }
  0xcb   :  { %154 = vst.msk [vmem:[%s261_s4 + $0x10] sm:$0xff] %vm40_vm0, %v150_v22  ;;  %v148_v25 = vadd.f32 %v131_v16, %v120_v23  ;;  %v123_v26 = vmul.f32 %v173_v24, %v118_v15 }
  0xcc   :  { %v84_v28 = vpop.f32.mrf.mxu0 }
  0xcd   :  { %152 = vst.msk [vmem:[%s261_s4] sm:$0xff] %vm40_vm0, %v148_v25  ;;  %v151_v29 = vadd.f32 %v146_v27, %v123_v26  ;;  %v121_v30 = vmul.f32 %v108_v14, %v84_v28 }
  0xcf   :  { %155 = vst.msk [vmem:[%s261_s4 + $0x18] sm:$0xff] %vm40_vm0, %v151_v29  ;;  %v149_v31 = vadd.f32 %v136_v17, %v121_v30 }
  0xd1   :  { %153 = vst.msk [vmem:[%s261_s4 + $0x8] sm:$0xff] %vm40_vm0, %v149_v31 }

// kernel: crnn_forward.53
= control target key start
LH: loop header
LB: loop body
LE: loop exit
PB: predicated region body
PF: predicated region fallthrough
CT: control target
= control target key end

     0   :  { %v480_v1 = vmov 0   ;;  %vm203_vm0 = vcmask 261120   ;;  %vm376_vm1 = vcmask 130048   ;;  %s637_s1 = inlined_call_operand.vmem [shape: bf16[288,16], index: 1, kind: input, shape index: {}]   ;;  %s638_s0 = inlined_call_operand.vmem [shape: bf16[32,288], index: 0, kind: input, shape index: {}]   ;;  %s639_s2 = inlined_call_operand.vmem [shape: f32[32,1], index: 2, kind: input, shape index: {}]   ;;  %s640_s3 = inlined_call_operand.vmem [shape: f32[32,1], index: 3, kind: input, shape index: {}]   ;;  %s641_s4 = inlined_call_operand.vmem [shape: f32[32,16], index: 4, kind: input, shape index: {}]   ;;  %s642_s5 = inlined_call_operand.vmem [shape: f32[32,16], index: 5, kind: output, shape index: {}]  }
   0x1   :  { %v454_v0 = vld [vmem:[%s637_s1 + $0x78] sm:$0xff]   ;;  %453 = vset.pattern.permute.xlu1 %v480_v1  ;;  %452 = vset.pattern.permute.xlu0 %v480_v1  ;;  %v456_v3 = vld [vmem:[%s637_s1 + $0x70] sm:$0xff]   ;;  %v458_v5 = vld [vmem:[%s637_s1 + $0x68] sm:$0xff]  }
   0x2   :  { %v455_v2 = vld [vmem:[%s637_s1 + $0x38] sm:$0xff]   ;;  %411 = vmatprep.subr.bf16.mxu0 %v454_v0  ;;  %v457_v4 = vld [vmem:[%s637_s1 + $0x30] sm:$0xff]   ;;  %v459_v6 = vld [vmem:[%s637_s1 + $0x28] sm:$0xff]  }
   0x3   :  { %412 = vmatpush3.bf16.msra.mxu0 %v455_v2  ;;  %v460_v7 = vld [vmem:[%s637_s1 + $0x60] sm:$0xff]   ;;  %v462_v9 = vld [vmem:[%s637_s1 + $0x58] sm:$0xff]   ;;  %v468_v10 = vld [vmem:[%s637_s1 + $0x88] sm:$0xff]  }
   0x4   :  { %413 = vmatprep.subr.bf16.mxu0 %v456_v3  ;;  %v461_v8 = vld [vmem:[%s637_s1 + $0x20] sm:$0xff]   ;;  %v463_v11 = vld [vmem:[%s637_s1 + $0x18] sm:$0xff]   ;;  %v464_v12 = vld [vmem:[%s637_s1 + $0x50] sm:$0xff]   ;;  %443 = vmatprep.subr.bf16.mxu1 %v468_v10 }
   0x5   :  { %v465_v13 = vld [vmem:[%s637_s1 + $0x10] sm:$0xff]   ;;  %444 = vmatpush3.bf16.msra.mxu1 %v468_v10  ;;  %v471_v14 = vld [vmem:[%s637_s1 + $0x80] sm:$0xff]   ;;  %v466_v15 = vld [vmem:[%s637_s1 + $0x48] sm:$0xff]  }
   0x6   :  { %445 = vmatprep.subr.bf16.mxu1 %v471_v14  ;;  %v474_v16 = vld [vmem:[%s638_s0 + $0x4] ss:$12 sps:$4 sm:$0xff]   ;;  %v475_v17 = vld [vmem:[%s638_s0 + $0x8] ss:$12 sps:$4 sm:$0xff]   ;;  %v476_v18 = vld [vmem:[%s638_s0 + $0x20] ss:$12 sps:$4 sm:$0xff]  }
   0x7   :  { %414 = vmatpush3.bf16.msra.mxu0 %v457_v4  ;;  %242 = vmatprep.mubr.bf16.mxu0 %v474_v16  ;;  %v310_v19 = vld [vmem:[%s639_s2 + $0x10] sm:$0xff]  ;;  %v467_v20 = vld [vmem:[%s637_s1 + $0x8] sm:$0xff]   ;;  %v308_v21 = vld [vmem:[%s639_s2] sm:$0xff] }
   0x8   :  { %415 = vmatprep.subr.bf16.mxu0 %v458_v5  ;;  %447 = vmatprep.mubr.msk.bf16.mxu1 %vm203_vm0, %v475_v17  ;;  %v469_v22 = vld [vmem:[%s637_s1 + $0x40] sm:$0xff]   ;;  %v311_v23 = vld [vmem:[%s639_s2 + $0x18] sm:$0xff]  ;;  %v309_v24 = vld [vmem:[%s639_s2 + $0x8] sm:$0xff] }
   0x9   :  { %446 = vmatpush3.bf16.msra.mxu1 %v471_v14  ;;  %324 = vperm.xlu1 %453, %v310_v19   ;;  %v470_v25 = vld [vmem:[%s637_s1] sm:$0xff]   ;;  %v337_v26 = vld [vmem:[%s640_s3 + $0x8] sm:$0xff]  ;;  %v339_v30 = vld [vmem:[%s640_s3 + $0x18] sm:$0xff] }
   0xa   :  { %314 = vperm.xlu0 %452, %v308_v21   ;;  %v472_v27 = vld [vmem:[%s638_s0] ss:$12 sps:$4 sm:$0xff]   ;;  %v477_v29 = vld [vmem:[%s638_s0 + $0x1c] ss:$12 sps:$4 sm:$0xff]   ;;  %v338_v31 = vld [vmem:[%s640_s3 + $0x10] sm:$0xff] }
   0xb   :  { %416 = vmatpush3.bf16.msra.mxu0 %v459_v6  ;;  %v336_v28 = vld [vmem:[%s640_s3] sm:$0xff]  ;;  %v365_v59 = vld [vmem:[%s641_s4 + $0x8] sm:$0xff]  ;;  %v366_v5 = vld [vmem:[%s641_s4 + $0x10] sm:$0xff] }
   0xc   :  { %417 = vmatprep.subr.bf16.mxu0 %v460_v7  ;;  %448 = vmatmul.mubr.msk.bf16.vlgmr.msra.gmra.mxu1 %vm203_vm0, %v476_v18  ;;  %v479_v32 = vld [vmem:[%s638_s0 + $0x18] ss:$12 sps:$4 sm:$0xff]  }
   0xd   :  { %329 = vperm.xlu1 %453, %v311_v23   ;;  %v364_v50 = vld [vmem:[%s641_s4] sm:$0xff] }
   0xe   :  { %319 = vperm.xlu0 %452, %v309_v24  }
   0xf   :  { %418 = vmatpush3.bf16.msra.mxu0 %v461_v8 }
  0x10   :  { %419 = vmatprep.subr.bf16.mxu0 %v462_v9 }
  0x11   :  { %347 = vperm.xlu1 %453, %v337_v26  }
  0x12   :  { %342 = vperm.xlu0 %452, %v336_v28  }
  0x13   :  { %420 = vmatpush3.bf16.msra.mxu0 %v463_v11 }
  0x14   :  { %421 = vmatprep.subr.bf16.mxu0 %v464_v12  ;;  %v367_v12 = vld [vmem:[%s641_s4 + $0x18] sm:$0xff] }
  0x15   :  { %357 = vperm.xlu1 %453, %v339_v30  }
  0x16   :  { %352 = vperm.xlu0 %452, %v338_v31  }
  0x17   :  { %422 = vmatpush3.bf16.msra.mxu0 %v465_v13 }
  0x18   :  { %423 = vmatprep.subr.bf16.mxu0 %v466_v15 }
  0x1b   :  { %424 = vmatpush3.bf16.msra.mxu0 %v467_v20 }
  0x1c   :  { %425 = vmatprep.subr.bf16.mxu0 %v469_v22 }
  0x1f   :  { %426 = vmatpush3.bf16.msra.mxu0 %v470_v25 }
  0x22   :  { %243 = vmatmul.mubr.bf16.vlgmr.msra.gmra.mxu0 %v472_v27 }
  0x23   :  { %250 = vmatprep.mubr.bf16.mxu0 %v477_v29 }
  0x2a   :  { %251 = vmatmul.mubr.bf16.gmra.mxu0 %v479_v32 }
  0x84   :  { %v325_v36 = vpop.permute.xlu1 %324 }
  0x85   :  { %v315_v34 = vpop.permute.xlu0 %314 }
  0x88   :  { %v330_v43 = vpop.permute.xlu1 %329 }
  0x89   :  { %v320_v38 = vpop.permute.xlu0 %319 }
  0x8c   :  { %v348_v58 = vpop.permute.xlu1 %347 }
  0x8d   :  { %v343_v49 = vpop.permute.xlu0 %342 }
  0x90   :  { %v358_v11 = vpop.permute.xlu1 %357 }
  0x91   :  { %v353_v4 = vpop.permute.xlu0 %352 }
  0xcc   :  { %v449_v33 = vpop.f32.mrf.mxu1 }
  0xce   :  { %v293_v35 = vpop.f32.mrf.mxu1 }
  0xd0   :  { %v450_v40 = vpop.f32.mrf.mxu1 }
  0xd2   :  { %v296_v46 = vpop.f32.mrf.mxu1 }
  0xe2   :  { %v427_v37 = vpop.f32.mrf.mxu0 }
  0xe4   :  { %v428_v39 = vpop.f32.mrf.mxu0 }
  0xe5   :  { %v429_v41 = vadd.f32 %v428_v39, %v427_v37 }
  0xe6   :  { %v430_v42 = vpop.f32.mrf.mxu0 }
  0xe7   :  { %v294_v44 = vadd.f32 %v429_v41, %v293_v35 }
  0xe8   :  { %v431_v45 = vpop.f32.mrf.mxu0 }
  0xe9   :  { %v332_v47 = vmul.f32 %v315_v34, %v294_v44  ;;  %v432_v48 = vadd.f32 %v431_v45, %v430_v42 }
  0xea   :  { %v433_v51 = vpop.f32.mrf.mxu0 }
  0xeb   :  { %v360_v52 = vadd.f32 %v343_v49, %v332_v47  ;;  %v297_v53 = vadd.f32 %v432_v48, %v296_v46 }
  0xec   :  { %v434_v54 = vpop.f32.mrf.mxu0 }
  0xed   :  { %v368_v55 = vadd.f32 %v364_v50, %v360_v52  ;;  %v333_v56 = vmul.f32 %v320_v38, %v297_v53  ;;  %v435_v57 = vadd.f32 %v434_v54, %v433_v51 }
  0xee   :  { %v436_v60 = vpop.f32.mrf.mxu0 }
  0xef   :  { %v372_v61 = vmax.f32 %v368_v55, 0.0  ;;  %v361_v62 = vadd.f32 %v348_v58, %v333_v56  ;;  %v302_v63 = vadd.f32 %v449_v33, %v435_v57 }
  0xf0   :  { %v437_v0 = vpop.f32.mrf.mxu0 }
  0xf1   :  { %377 = vst.msk [vmem:[%s642_s5] sm:$0xff] %vm376_vm1, %v372_v61  ;;  %v369_v1 = vadd.f32 %v365_v59, %v361_v62  ;;  %v334_v2 = vmul.f32 %v325_v36, %v302_v63  ;;  %v438_v3 = vadd.f32 %v437_v0, %v436_v60 }
  0xf3   :  { %v373_v6 = vmax.f32 %v369_v1, 0.0  ;;  %v362_v7 = vadd.f32 %v353_v4, %v334_v2  ;;  %v305_v8 = vadd.f32 %v450_v40, %v438_v3 }
  0xf5   :  { %378 = vst.msk [vmem:[%s642_s5 + $0x8] sm:$0xff] %vm376_vm1, %v373_v6  ;;  %v370_v9 = vadd.f32 %v366_v5, %v362_v7  ;;  %v335_v10 = vmul.f32 %v330_v43, %v305_v8 }
  0xf7   :  { %v374_v13 = vmax.f32 %v370_v9, 0.0  ;;  %v363_v14 = vadd.f32 %v358_v11, %v335_v10 }
  0xf9   :  { %379 = vst.msk [vmem:[%s642_s5 + $0x10] sm:$0xff] %vm376_vm1, %v374_v13  ;;  %v371_v15 = vadd.f32 %v367_v12, %v363_v14 }
  0xfb   :  { %v375_v16 = vmax.f32 %v371_v15, 0.0 }
  0xfd   :  { %380 = vst.msk [vmem:[%s642_s5 + $0x18] sm:$0xff] %vm376_vm1, %v375_v16 }

// kernel: crnn_forward.54
= control target key start
LH: loop header
LB: loop body
LE: loop exit
PB: predicated region body
PF: predicated region fallthrough
CT: control target
= control target key end

     0   :  { %v469_v1 = vmov 0   ;;  %vm200_vm0 = vcmask 261120   ;;  %vm365_vm1 = vcmask 130048   ;;  %s609_s1 = inlined_call_operand.vmem [shape: bf16[288,16], index: 1, kind: input, shape index: {}]   ;;  %s610_s0 = inlined_call_operand.vmem [shape: bf16[32,288], index: 0, kind: input, shape index: {}]   ;;  %s611_s2 = inlined_call_operand.vmem [shape: f32[32,1], index: 2, kind: input, shape index: {}]   ;;  %s612_s3 = inlined_call_operand.vmem [shape: f32[32,1], index: 3, kind: input, shape index: {}]   ;;  %s613_s4 = inlined_call_operand.vmem [shape: f32[32,16], index: 4, kind: output, shape index: {}]  }
   0x1   :  { %v443_v0 = vld [vmem:[%s609_s1 + $0x78] sm:$0xff]   ;;  %442 = vset.pattern.permute.xlu1 %v469_v1  ;;  %441 = vset.pattern.permute.xlu0 %v469_v1  ;;  %v445_v3 = vld [vmem:[%s609_s1 + $0x70] sm:$0xff]   ;;  %v447_v5 = vld [vmem:[%s609_s1 + $0x68] sm:$0xff]  }
   0x2   :  { %v444_v2 = vld [vmem:[%s609_s1 + $0x38] sm:$0xff]   ;;  %400 = vmatprep.subr.bf16.mxu0 %v443_v0  ;;  %v446_v4 = vld [vmem:[%s609_s1 + $0x30] sm:$0xff]   ;;  %v448_v6 = vld [vmem:[%s609_s1 + $0x28] sm:$0xff]  }
   0x3   :  { %401 = vmatpush3.bf16.msra.mxu0 %v444_v2  ;;  %v449_v7 = vld [vmem:[%s609_s1 + $0x60] sm:$0xff]   ;;  %v451_v9 = vld [vmem:[%s609_s1 + $0x58] sm:$0xff]   ;;  %v457_v10 = vld [vmem:[%s609_s1 + $0x88] sm:$0xff]  }
   0x4   :  { %402 = vmatprep.subr.bf16.mxu0 %v445_v3  ;;  %v450_v8 = vld [vmem:[%s609_s1 + $0x20] sm:$0xff]   ;;  %v452_v11 = vld [vmem:[%s609_s1 + $0x18] sm:$0xff]   ;;  %v453_v12 = vld [vmem:[%s609_s1 + $0x50] sm:$0xff]   ;;  %432 = vmatprep.subr.bf16.mxu1 %v457_v10 }
   0x5   :  { %v454_v13 = vld [vmem:[%s609_s1 + $0x10] sm:$0xff]   ;;  %433 = vmatpush3.bf16.msra.mxu1 %v457_v10  ;;  %v460_v14 = vld [vmem:[%s609_s1 + $0x80] sm:$0xff]   ;;  %v455_v15 = vld [vmem:[%s609_s1 + $0x48] sm:$0xff]  }
   0x6   :  { %434 = vmatprep.subr.bf16.mxu1 %v460_v14  ;;  %v463_v16 = vld [vmem:[%s610_s0 + $0x4] ss:$12 sps:$4 sm:$0xff]   ;;  %v464_v17 = vld [vmem:[%s610_s0 + $0x8] ss:$12 sps:$4 sm:$0xff]   ;;  %v465_v18 = vld [vmem:[%s610_s0 + $0x20] ss:$12 sps:$4 sm:$0xff]  }
   0x7   :  { %403 = vmatpush3.bf16.msra.mxu0 %v446_v4  ;;  %239 = vmatprep.mubr.bf16.mxu0 %v463_v16  ;;  %v307_v19 = vld [vmem:[%s611_s2 + $0x10] sm:$0xff]  ;;  %v456_v20 = vld [vmem:[%s609_s1 + $0x8] sm:$0xff]   ;;  %v305_v21 = vld [vmem:[%s611_s2] sm:$0xff] }
   0x8   :  { %404 = vmatprep.subr.bf16.mxu0 %v447_v5  ;;  %436 = vmatprep.mubr.msk.bf16.mxu1 %vm200_vm0, %v464_v17  ;;  %v458_v22 = vld [vmem:[%s609_s1 + $0x40] sm:$0xff]   ;;  %v308_v23 = vld [vmem:[%s611_s2 + $0x18] sm:$0xff]  ;;  %v306_v24 = vld [vmem:[%s611_s2 + $0x8] sm:$0xff] }
   0x9   :  { %435 = vmatpush3.bf16.msra.mxu1 %v460_v14  ;;  %321 = vperm.xlu1 %442, %v307_v19   ;;  %v459_v25 = vld [vmem:[%s609_s1] sm:$0xff]   ;;  %v334_v26 = vld [vmem:[%s612_s3 + $0x8] sm:$0xff]  ;;  %v336_v30 = vld [vmem:[%s612_s3 + $0x18] sm:$0xff] }
   0xa   :  { %311 = vperm.xlu0 %441, %v305_v21   ;;  %v461_v27 = vld [vmem:[%s610_s0] ss:$12 sps:$4 sm:$0xff]   ;;  %v466_v29 = vld [vmem:[%s610_s0 + $0x1c] ss:$12 sps:$4 sm:$0xff]   ;;  %v335_v31 = vld [vmem:[%s612_s3 + $0x10] sm:$0xff] }
   0xb   :  { %405 = vmatpush3.bf16.msra.mxu0 %v448_v6  ;;  %v333_v28 = vld [vmem:[%s612_s3] sm:$0xff] }
   0xc   :  { %406 = vmatprep.subr.bf16.mxu0 %v449_v7  ;;  %437 = vmatmul.mubr.msk.bf16.vlgmr.msra.gmra.mxu1 %vm200_vm0, %v465_v18  ;;  %v468_v32 = vld [vmem:[%s610_s0 + $0x18] ss:$12 sps:$4 sm:$0xff]  }
   0xd   :  { %326 = vperm.xlu1 %442, %v308_v23  }
   0xe   :  { %316 = vperm.xlu0 %441, %v306_v24  }
   0xf   :  { %407 = vmatpush3.bf16.msra.mxu0 %v450_v8 }
  0x10   :  { %408 = vmatprep.subr.bf16.mxu0 %v451_v9 }
  0x11   :  { %344 = vperm.xlu1 %442, %v334_v26  }
  0x12   :  { %339 = vperm.xlu0 %441, %v333_v28  }
  0x13   :  { %409 = vmatpush3.bf16.msra.mxu0 %v452_v11 }
  0x14   :  { %410 = vmatprep.subr.bf16.mxu0 %v453_v12 }
  0x15   :  { %354 = vperm.xlu1 %442, %v336_v30  }
  0x16   :  { %349 = vperm.xlu0 %441, %v335_v31  }
  0x17   :  { %411 = vmatpush3.bf16.msra.mxu0 %v454_v13 }
  0x18   :  { %412 = vmatprep.subr.bf16.mxu0 %v455_v15 }
  0x1b   :  { %413 = vmatpush3.bf16.msra.mxu0 %v456_v20 }
  0x1c   :  { %414 = vmatprep.subr.bf16.mxu0 %v458_v22 }
  0x1f   :  { %415 = vmatpush3.bf16.msra.mxu0 %v459_v25 }
  0x22   :  { %240 = vmatmul.mubr.bf16.vlgmr.msra.gmra.mxu0 %v461_v27 }
  0x23   :  { %247 = vmatprep.mubr.bf16.mxu0 %v466_v29 }
  0x2a   :  { %248 = vmatmul.mubr.bf16.gmra.mxu0 %v468_v32 }
  0x84   :  { %v322_v36 = vpop.permute.xlu1 %321 }
  0x85   :  { %v312_v34 = vpop.permute.xlu0 %311 }
  0x88   :  { %v327_v43 = vpop.permute.xlu1 %326 }
  0x89   :  { %v317_v38 = vpop.permute.xlu0 %316 }
  0x8c   :  { %v345_v57 = vpop.permute.xlu1 %344 }
  0x8d   :  { %v340_v49 = vpop.permute.xlu0 %339 }
  0x90   :  { %v355_v6 = vpop.permute.xlu1 %354 }
  0x91   :  { %v350_v1 = vpop.permute.xlu0 %349 }
  0xcc   :  { %v438_v33 = vpop.f32.mrf.mxu1 }
  0xce   :  { %v290_v35 = vpop.f32.mrf.mxu1 }
  0xd0   :  { %v439_v40 = vpop.f32.mrf.mxu1 }
  0xd2   :  { %v293_v46 = vpop.f32.mrf.mxu1 }
  0xe2   :  { %v416_v37 = vpop.f32.mrf.mxu0 }
  0xe4   :  { %v417_v39 = vpop.f32.mrf.mxu0 }
  0xe5   :  { %v418_v41 = vadd.f32 %v417_v39, %v416_v37 }
  0xe6   :  { %v419_v42 = vpop.f32.mrf.mxu0 }
  0xe7   :  { %v291_v44 = vadd.f32 %v418_v41, %v290_v35 }
  0xe8   :  { %v420_v45 = vpop.f32.mrf.mxu0 }
  0xe9   :  { %v329_v47 = vmul.f32 %v312_v34, %v291_v44  ;;  %v421_v48 = vadd.f32 %v420_v45, %v419_v42 }
  0xea   :  { %v422_v50 = vpop.f32.mrf.mxu0 }
  0xeb   :  { %v357_v51 = vadd.f32 %v340_v49, %v329_v47  ;;  %v294_v52 = vadd.f32 %v421_v48, %v293_v46 }
  0xec   :  { %v423_v53 = vpop.f32.mrf.mxu0 }
  0xed   :  { %v361_v54 = vmax.f32 %v357_v51, 0.0  ;;  %v330_v55 = vmul.f32 %v317_v38, %v294_v52  ;;  %v424_v56 = vadd.f32 %v423_v53, %v422_v50 }
  0xee   :  { %v425_v58 = vpop.f32.mrf.mxu0 }
  0xef   :  { %366 = vst.msk [vmem:[%s613_s4] sm:$0xff] %vm365_vm1, %v361_v54  ;;  %v358_v59 = vadd.f32 %v345_v57, %v330_v55  ;;  %v299_v60 = vadd.f32 %v438_v33, %v424_v56 }
  0xf0   :  { %v426_v61 = vpop.f32.mrf.mxu0 }
  0xf1   :  { %v362_v62 = vmax.f32 %v358_v59, 0.0  ;;  %v331_v63 = vmul.f32 %v322_v36, %v299_v60  ;;  %v427_v0 = vadd.f32 %v426_v61, %v425_v58 }
  0xf3   :  { %367 = vst.msk [vmem:[%s613_s4 + $0x8] sm:$0xff] %vm365_vm1, %v362_v62  ;;  %v359_v2 = vadd.f32 %v350_v1, %v331_v63  ;;  %v302_v3 = vadd.f32 %v439_v40, %v427_v0 }
  0xf5   :  { %v363_v4 = vmax.f32 %v359_v2, 0.0  ;;  %v332_v5 = vmul.f32 %v327_v43, %v302_v3 }
  0xf7   :  { %368 = vst.msk [vmem:[%s613_s4 + $0x10] sm:$0xff] %vm365_vm1, %v363_v4  ;;  %v360_v7 = vadd.f32 %v355_v6, %v332_v5 }
  0xf9   :  { %v364_v8 = vmax.f32 %v360_v7, 0.0 }
  0xfb   :  { %369 = vst.msk [vmem:[%s613_s4 + $0x18] sm:$0xff] %vm365_vm1, %v364_v8 }

// kernel: crnn_forward.64
= control target key start
LH: loop header
LB: loop body
LE: loop exit
PB: predicated region body
PF: predicated region fallthrough
CT: control target
= control target key end

     0   :  { %vm20_vm0 = vcmask 1043456   ;;  %v423_v0 = vmov 0.0   ;;  %vm16_vm1 = vcmask 31744   ;;  %vm424_vm2 = vmmov 0   ;;  %s488_s0 = inlined_call_operand.vmem [shape: f32[2,4,64], index: 0, kind: input, shape index: {}]   ;;  %s489_s1 = inlined_call_operand.vmem [shape: f32[8,4], index: 1, kind: input, shape index: {}]   ;;  %s490_s2 = inlined_call_operand.vmem [shape: f32[64,64], index: 2, kind: input, shape index: {}]   ;;  %s491_s3 = inlined_call_operand.vmem [shape: f32[2,8,64], index: 3, kind: output, shape index: {}]  }
   0x1   :  { %373 = vmatprep.subr.mxu1 %v423_v0  ;;  %397 = vmatprep.subr.mxu0 %v423_v0  ;;  %v15_v1 = vld [vmem:[%s488_s0] sm:$0xf]  ;;  %v346_v2 = vld [vmem:[%s488_s0 + $0x4] sm:$0xf]  ;;  %v101_v4 = vld [vmem:[%s490_s2 + $0x38] sm:$0xff]  ;;  %vm102_vm3 = vcmask 523264  }
   0x2   :  { %v14_v3 = vld [vmem:[%s489_s1] sm:$0xff]  ;;  %374 = vmatpush3.msk.msra.mxu1 %vm20_vm0, %v15_v1  ;;  %375 = vmatprep.mubr.msk.f32.mxu1 %vm424_vm2, %v423_v0  ;;  %v100_v5 = vld [vmem:[%s490_s2 + $0x30] sm:$0xff]  ;;  %v99_v6 = vld [vmem:[%s490_s2 + $0x28] sm:$0xff] }
   0x3   :  { %398 = vmatpush3.msk.msra.mxu0 %vm20_vm0, %v346_v2  ;;  %399 = vmatprep.mubr.msk.f32.mxu0 %vm424_vm2, %v423_v0  ;;  %v98_v7 = vld [vmem:[%s490_s2 + $0x20] sm:$0xff]  ;;  %v97_v8 = vld [vmem:[%s490_s2 + $0x18] sm:$0xff]  ;;  %v96_v9 = vld [vmem:[%s490_s2 + $0x10] sm:$0xff] }
   0x4   :  { %376 = vmatmul.mubr.msk.f32.vlgmr.msra.gmra.mxu1 %vm16_vm1, %v14_v3  ;;  %400 = vmatmul.mubr.msk.f32.vlgmr.msra.gmra.mxu0 %vm16_vm1, %v14_v3  ;;  %v95_v10 = vld [vmem:[%s490_s2 + $0x8] sm:$0xff]  ;;  %v94_v11 = vld [vmem:[%s490_s2] sm:$0xff] }
   0x5   :  { %378 = vmatprep.subr.mxu1 %v423_v0  ;;  %402 = vmatprep.subr.mxu0 %v423_v0 }
   0x6   :  { %379 = vmatpush3.msra.mxu1 %v101_v4  ;;  %403 = vmatpush3.msra.mxu0 %v101_v4 }
   0x7   :  { %380 = vmatprep.subr.mxu1 %v423_v0  ;;  %404 = vmatprep.subr.mxu0 %v423_v0 }
   0x8   :  { %381 = vmatpush3.msra.mxu1 %v100_v5  ;;  %405 = vmatpush3.msra.mxu0 %v100_v5 }
   0x9   :  { %382 = vmatprep.subr.mxu1 %v423_v0  ;;  %406 = vmatprep.subr.mxu0 %v423_v0 }
   0xa   :  { %383 = vmatpush3.msra.mxu1 %v99_v6  ;;  %407 = vmatpush3.msra.mxu0 %v99_v6 }
   0xb   :  { %384 = vmatprep.subr.mxu1 %v423_v0  ;;  %408 = vmatprep.subr.mxu0 %v423_v0 }
   0xc   :  { %385 = vmatpush3.msra.mxu1 %v98_v7  ;;  %409 = vmatpush3.msra.mxu0 %v98_v7 }
   0xd   :  { %386 = vmatprep.subr.mxu1 %v423_v0  ;;  %410 = vmatprep.subr.mxu0 %v423_v0 }
   0xe   :  { %387 = vmatpush3.msra.mxu1 %v97_v8  ;;  %411 = vmatpush3.msra.mxu0 %v97_v8 }
   0xf   :  { %388 = vmatprep.subr.mxu1 %v423_v0  ;;  %412 = vmatprep.subr.mxu0 %v423_v0 }
  0x10   :  { %389 = vmatpush3.msra.mxu1 %v96_v9  ;;  %413 = vmatpush3.msra.mxu0 %v96_v9 }
  0x11   :  { %390 = vmatprep.subr.mxu1 %v423_v0  ;;  %414 = vmatprep.subr.mxu0 %v423_v0 }
  0x12   :  { %391 = vmatpush3.msra.mxu1 %v95_v10  ;;  %415 = vmatpush3.msra.mxu0 %v95_v10 }
  0x13   :  { %392 = vmatprep.subr.mxu1 %v423_v0  ;;  %416 = vmatprep.subr.mxu0 %v423_v0 }
  0x14   :  { %394 = vmatprep.mubr.msk.f32.mxu1 %vm424_vm2, %v423_v0  ;;  %418 = vmatprep.mubr.msk.f32.mxu0 %vm424_vm2, %v423_v0 }
  0x15   :  { %393 = vmatpush3.msra.mxu1 %v94_v11  ;;  %417 = vmatpush3.msra.mxu0 %v94_v11 }
  0xc4   :  { %v90_v12 = vpop.f32.mrf.mxu1  ;;  %v252_v13 = vpop.f32.mrf.mxu0 }
  0xc5   :  { %395 = vmatmul.mubr.msk.f32.vlgmr.msra.gmra.mxu1 %vm102_vm3, %v90_v12  ;;  %419 = vmatmul.mubr.msk.f32.vlgmr.msra.gmra.mxu0 %vm102_vm3, %v252_v13 }
  0xc6   :  { %v377_v14 = vpop.f32.mrf.mxu1  ;;  %v401_v15 = vpop.f32.mrf.mxu0 }
 0x185   :  { %v172_v16 = vpop.f32.mrf.mxu1  ;;  %v333_v17 = vpop.f32.mrf.mxu0 }
 0x186   :  { %176 = vst.msk [vmem:[%s491_s3] sm:$0xff] %vm102_vm3, %v172_v16  ;;  %350 = vst.msk [vmem:[%s491_s3 + $0x8] sm:$0xff] %vm102_vm3, %v333_v17 }
 0x187   :  { %v396_v18 = vpop.f32.mrf.mxu1  ;;  %v420_v19 = vpop.f32.mrf.mxu0 }

// kernel: crnn_forward.67
= control target key start
LH: loop header
LB: loop body
LE: loop exit
PB: predicated region body
PF: predicated region fallthrough
CT: control target
= control target key end

     0   :  { %v322_v1 = vmov 0.0   ;;  %vm323_vm0 = vmmov 0   ;;  %s396_s0 = inlined_call_operand.vmem [shape: f32[16,64], index: 0, kind: input, shape index: {}]   ;;  %s397_s1 = inlined_call_operand.vmem [shape: bf16[64,32], index: 1, kind: input, shape index: {}]   ;;  %s398_s2 = inlined_call_operand.vmem [shape: f32[1,32], index: 2, kind: input, shape index: {}]   ;;  %s399_s3 = inlined_call_operand.vmem [shape: bf16[32,11], index: 3, kind: input, shape index: {}]   ;;  %s400_s4 = inlined_call_operand.vmem [shape: f32[1,11], index: 4, kind: input, shape index: {}]   ;;  %s401_s5 = inlined_call_operand.hbm [shape: f32[16,11], index: 5, kind: output, shape index: {}]  }
   0x1   :  { %v282_v0 = vld [vmem:[%s397_s1 + $0x18] sm:$0xff]   ;;  %257 = vmatprep.subr.bf16.mxu0 %v322_v1  ;;  %269 = vmatprep.subr.bf16.mxu1 %v322_v1  ;;  %v283_v2 = vld [vmem:[%s397_s1 + $0x10] sm:$0xff]   ;;  %v284_v3 = vld [vmem:[%s397_s1 + $0x8] sm:$0xff]  }
   0x2   :  { %258 = vmatpush3.bf16.msra.mxu0 %v282_v0  ;;  %265 = vmatprep.mubr.msk.bf16.mxu0 %vm323_vm0, %v322_v1 }
   0x3   :  { %259 = vmatprep.subr.bf16.mxu0 %v322_v1  ;;  %273 = vmatprep.mubr.msk.bf16.mxu1 %vm323_vm0, %v322_v1 }
   0x6   :  { %260 = vmatpush3.bf16.msra.mxu0 %v283_v2 }
   0x7   :  { %10 = vsyncpa [#allocation3], 0  ;;  %261 = vmatprep.subr.bf16.mxu0 %v322_v1  ;;  %v285_v4 = vld [vmem:[%s397_s1] sm:$0xff]   ;;  %v23_v6 = vld [vmem:[%s396_s0 + $0x8] sm:$0xff]  ;;  %vm64_vm1 = vcmask 523264   ;;  %vm151_vm2 = vcmask 261120  }
   0x8   :  { %v22_v5 = vld [vmem:[%s396_s0] sm:$0xff]  ;;  %v286_v8 = vld [vmem:[%s399_s3 + $0x8] sm:$0xff]   ;;  %vm196_vm3 = vcmask 89088  }
   0x9   :  { %v24_v7 = vpack.c.bf16 %v23_v6, %v22_v5  ;;  %270 = vmatpush3.bf16.msra.mxu1 %v286_v8  ;;  %v287_v9 = vld [vmem:[%s399_s3] sm:$0xff]   ;;  %s324_s3 = smov [#allocation2]  }
   0xa   :  { %262 = vmatpush3.bf16.msra.mxu0 %v284_v3  ;;  %271 = vmatprep.subr.bf16.mxu1 %v322_v1  ;;  %v239_v10 = vld [vmem:[%s398_s2] ss:$0 sm:$0xff] }
   0xb   :  { %263 = vmatprep.subr.bf16.mxu0 %v322_v1  ;;  %v245_v36 = vld [vmem:[%s400_s4] ss:$0 sm:$0xff]  ;;  %s228_s4 = sshll.u32 %s324_s3, 4  ;;  %s229_s4 = int_to_ptr.vmem [resolvable:$true] %s228_s4 }
   0xc   :  { %s300_s10 = scalar_lea.vmem %s229_s4, 256  ;;  %p305_p1 = scmp.lt.s32.totalorder %s229_s4, %s229_s4 }
   0xd   :  { %272 = vmatpush3.bf16.msra.mxu1 %v287_v9  ;;  %p301_p0 = scmp.ne.s32.totalorder %s229_s4, %s300_s10  ;;  %p306_p2 = scmp.lt.s32.totalorder %s300_s10, %s300_s10 }
   0xe   :  { %264 = vmatpush3.bf16.msra.mxu0 %v285_v4 }
   0xf   :  { %p307_p3 = por %p306_p2, %p305_p1 }
  0x11   :  { %266 = vmatmul.mubr.msk.bf16.vlgmr.msra.gmra.mxu0 %vm64_vm1, %v24_v7  ;;  %p308_p4 = pnand %p307_p3, %p301_p0 }
  0xd1   :  { %v102_v11 = vpop.f32.mrf.mxu0 }
  0xd2   :  { %v103_v12 = vadd.f32 %v239_v10, %v102_v11 }
  0xd3   :  { %v267_v13 = vpop.f32.mrf.mxu0 }
  0xd4   :  { %v111_v14 = vmul.f32 0.044715, %v103_v12  ;;  %v109_v30 = vmul.f32 0.5, %v103_v12 }
  0xd5   :  { %v105_v15 = vpop.f32.mrf.mxu0 }
  0xd6   :  { %v113_v16 = vmul.f32 %v111_v14, %v103_v12  ;;  %v106_v17 = vadd.f32 %v239_v10, %v105_v15 }
  0xd7   :  { %v268_v18 = vpop.f32.mrf.mxu0 }
  0xd8   :  { %v115_v19 = vmul.f32 %v113_v16, %v103_v12  ;;  %v112_v20 = vmul.f32 0.044715, %v106_v17  ;;  %v110_v31 = vmul.f32 0.5, %v106_v17 }
  0xda   :  { %v117_v21 = vadd.f32 %v115_v19, %v103_v12  ;;  %v114_v22 = vmul.f32 %v112_v20, %v106_v17 }
  0xdc   :  { %v119_v23 = vmul.f32 0.7978846, %v117_v21  ;;  %v116_v24 = vmul.f32 %v114_v22, %v106_v17 }
  0xde   :  { %288 = vtanh.f32 %v119_v23  ;;  %v118_v25 = vadd.f32 %v116_v24, %v106_v17 }
  0xe0   :  { %v120_v26 = vmul.f32 0.7978846, %v118_v25 }
  0xe2   :  { %290 = vtanh.f32 %v120_v26 }
  0xeb   :  { %v289_v27 = vpop.eup %288 }
  0xec   :  { %v123_v28 = vadd.f32 1.0, %v289_v27 }
  0xee   :  { %v125_v33 = vmul.f32 %v123_v28, %v109_v30 }
  0xef   :  { %v291_v29 = vpop.eup %290 }
  0xf0   :  { %v124_v32 = vadd.f32 1.0, %v291_v29 }
  0xf2   :  { %v126_v34 = vmul.f32 %v124_v32, %v110_v31 }
  0xf4   :  { %v127_v35 = vpack.c.bf16 %v126_v34, %v125_v33 }
  0xf6   :  { %274 = vmatmul.mubr.msk.bf16.vlgmr.msra.gmra.mxu1 %vm151_vm2, %v127_v35 }
 0x1b6   :  { %v189_v37 = vpop.f32.mrf.mxu1 }
 0x1b7   :  { %v190_v38 = vadd.f32 %v245_v36, %v189_v37 }
 0x1b8   :  { %v275_v39 = vpop.f32.mrf.mxu1 }
 0x1b9   :  { %v197_v40 = vsel %vm196_vm3, %v190_v38, -inf }
 0x1ba   :  { %198 = vmax.xlane.f32.xlu0 %v197_v40  ;;  %v192_v41 = vpop.f32.mrf.mxu1 }
 0x1bb   :  { %v193_v42 = vadd.f32 %v245_v36, %v192_v41 }
 0x1bc   :  { %v276_v43 = vpop.f32.mrf.mxu1 }
 0x1bd   :  { %v200_v44 = vsel %vm196_vm3, %v193_v42, -inf }
 0x1be   :  { %201 = vmax.xlane.f32.xlu0 %v200_v44 }
 0x243   :  { %v199_v45 = vpop.xlane.xlu0 %198 }
 0x244   :  { %v203_v46 = vsub.f32 %v190_v38, %v199_v45 }
 0x246   :  { %v205_v47 = vmul.f32 1.442695, %v203_v46 }
 0x247   :  { %v202_v48 = vpop.xlane.xlu0 %201 }
 0x248   :  { %292 = vpow2.f32 %v205_v47  ;;  %v204_v49 = vsub.f32 %v193_v42, %v202_v48 }
 0x24a   :  { %v207_v50 = vmul.f32 1.442695, %v204_v49 }
 0x24c   :  { %294 = vpow2.f32 %v207_v50 }
 0x255   :  { %v293_v51 = vpop.eup %292 }
 0x256   :  { %v209_v52 = vsel %vm196_vm3, %v293_v51, 0.0 }
 0x257   :  { %210 = vadd.xlane.f32.xlu1 %v209_v52 }
 0x259   :  { %v295_v53 = vpop.eup %294 }
 0x25a   :  { %v212_v54 = vsel %vm196_vm3, %v295_v53, 0.0 }
 0x25b   :  { %213 = vadd.xlane.f32.xlu1 %v212_v54 }
 0x2e0   :  { %v211_v55 = vpop.xlane.xlu1 %210 }
 0x2e1   :  { %296 = vlog2.f32 %v211_v55 }
 0x2e4   :  { %v214_v56 = vpop.xlane.xlu1 %213 }
 0x2e5   :  { %298 = vlog2.f32 %v214_v56 }
 0x2ee   :  { %v297_v57 = vpop.eup %296 }
 0x2ef   :  { %v216_v58 = vmul.f32 0.6931472, %v297_v57 }
 0x2f1   :  { %v219_v59 = vsub.f32 %v203_v46, %v216_v58 }
 0x2f2   :  { %v299_v60 = vpop.eup %298 }
 0x2f3   :  { %221 = vst.msk [vmem:[#allocation2] sm:$0xff] %vm196_vm3, %v219_v59  ;;  %v218_v61 = vmul.f32 0.6931472, %v299_v60 }
 0x2f5   :  { %v220_v62 = vsub.f32 %v204_v49, %v218_v61 }
 0x2f7   :  { %222 = vst.msk [vmem:[#allocation2 + $0x8] sm:$0xff] %vm196_vm3, %v220_v62 }
 0x2f8   :  { %311 = shalt.err (!%p308_p4)
}
 0x2f9   :  { %s325_s11 = smov 128   ;;  %s326_s12 = smov 8  }
 0x2fa   :  { %234 = dma.vmem_to_hbm [thread:$0]  %s229_s4, 256, %s401_s5, [#allocation3], %s325_s11, %s325_s11, %s326_s12  }
 0x2fb   :  { %320 = dma.done.wait [#allocation3], 256  }
 0x2fc   :  { %321 = vsyncadd [#allocation3], 4294967040 }
 0x2fd   :  { %238 = vsyncpa [#allocation3], 1 }

// kernel: crnn_forward.65
= control target key start
LH: loop header
LB: loop body
LE: loop exit
PB: predicated region body
PF: predicated region fallthrough
CT: control target
= control target key end

     0   :  { %v3734_v0 = vmov 0.0   ;;  %vm3735_vm0 = vmmov 0   ;;  %v3736_v7 = vmov 0   ;;  %vm120_vm1 = vcmask 523264   ;;  %s3737_s10 = smov 64   ;;  %s3738_s11 = smov 32   ;;  %s4609_s2 = inlined_call_operand.vmem [shape: bf16[32,128], index: 2, kind: input, shape index: {}]   ;;  %s4610_s5 = inlined_call_operand.vmem [shape: bf16[32,128], index: 5, kind: input, shape index: {}]   ;;  %s4611_s1 = inlined_call_operand.vmem [shape: bf16[64,128], index: 1, kind: input, shape index: {}]   ;;  %s4612_s4 = inlined_call_operand.vmem [shape: bf16[64,128], index: 4, kind: input, shape index: {}]   ;;  %s4613_s0 = inlined_call_operand.vmem [shape: bf16[8,2,2,64], index: 0, kind: input, shape index: {}]   ;;  %s4614_s3 = inlined_call_operand.vmem [shape: f32[1,128], index: 3, kind: input, shape index: {}]   ;;  %s4615_s6 = inlined_call_operand.vmem [shape: f32[1,128], index: 6, kind: input, shape index: {}]   ;;  %s4616_s7 = inlined_call_operand.vmem [shape: f32[8,2,2,32], index: 7, kind: output, shape index: {}]  }
   0x1   :  { %3185 = vmatprep.subr.bf16.mxu1 %v3734_v0  ;;  %3205 = vmatprep.subr.bf16.mxu0 %v3734_v0  ;;  %v3510_v1 = vld [vmem:[%s4609_s2 + $0x8] sm:$0xff]   ;;  %v3512_v3 = vld [vmem:[%s4609_s2] sm:$0xff]   ;;  %v3514_v5 = vld [vmem:[%s4611_s1 + $0x18] sm:$0xff]   ;;  %vm52_vm2 = vcmask 261120   ;;  %vm365_vm3 = vcmask 254976  }
   0x2   :  { %v3511_v2 = vld [vmem:[%s4610_s5 + $0x8] sm:$0xff]   ;;  %3189 = vmatprep.mubr.msk.bf16.mxu1 %vm3735_vm0, %v3734_v0  ;;  %3209 = vmatprep.mubr.msk.bf16.mxu0 %vm3735_vm0, %v3734_v0  ;;  %v3513_v4 = vld [vmem:[%s4610_s5] sm:$0xff]   ;;  %v3515_v6 = vld [vmem:[%s4612_s4 + $0x18] sm:$0xff]  }
   0x3   :  { %3186 = vmatpush3.bf16.msra.mxu1 %v3510_v1  ;;  %3206 = vmatpush3.bf16.msra.mxu0 %v3511_v2  ;;  %v3516_v8 = vld [vmem:[%s4611_s1 + $0x10] sm:$0xff]   ;;  %v3518_v10 = vld [vmem:[%s4611_s1 + $0x8] sm:$0xff]   ;;  %v3520_v12 = vld [vmem:[%s4611_s1] sm:$0xff]  }
   0x4   :  { %3187 = vmatprep.subr.bf16.mxu1 %v3734_v0  ;;  %3207 = vmatprep.subr.bf16.mxu0 %v3734_v0  ;;  %v3517_v9 = vld [vmem:[%s4612_s4 + $0x10] sm:$0xff]   ;;  %v3519_v11 = vld [vmem:[%s4612_s4 + $0x8] sm:$0xff]   ;;  %v3521_v13 = vld [vmem:[%s4612_s4] sm:$0xff]  }
   0x5   :  { %v27_v14 = vld [vmem:[%s4613_s0] sm:$0x1]  ;;  %v2878_v15 = vld [vmem:[%s4613_s0 + $0x1] sm:$0x1]  ;;  %v3522_v58 = vld [vmem:[%s4609_s2 + $0x8] sm:$0xff]  }
   0x6   :  { %v3852_v25 = vld [vmem:[%s4614_s3] ss:$0 sm:$0xff]  ;;  %v3524_v59 = vld [vmem:[%s4610_s5 + $0x8] sm:$0xff]  }
   0x7   :  { %3188 = vmatpush3.bf16.msra.mxu1 %v3512_v3  ;;  %3208 = vmatpush3.bf16.msra.mxu0 %v3513_v4  ;;  %v3857_v29 = vld [vmem:[%s4615_s6] ss:$0 sm:$0xff] }
   0x8   :  { %3193 = vmatprep.subr.bf16.mxu1 %v3734_v0  ;;  %3213 = vmatprep.subr.bf16.mxu0 %v3734_v0  ;;  %v3523_v60 = vld [vmem:[%s4609_s2] sm:$0xff]  }
   0x9   :  { %v3526_v63 = vld [vmem:[%s4610_s5] sm:$0xff]  }
   0xa   :  { %3190 = vmatmul.mubr.bf16.vlgmr.msra.gmra.mxu1 %v3736_v7  ;;  %3210 = vmatmul.mubr.bf16.vlgmr.msra.gmra.mxu0 %v3736_v7  ;;  %v3525_v7 = vld [vmem:[%s4611_s1 + $0x18] sm:$0xff]  }
   0xb   :  { %3194 = vmatpush3.bf16.msra.mxu1 %v3514_v5  ;;  %3214 = vmatpush3.bf16.msra.mxu0 %v3515_v6 }
   0xc   :  { %3195 = vmatprep.subr.bf16.mxu1 %v3734_v0  ;;  %3215 = vmatprep.subr.bf16.mxu0 %v3734_v0 }
   0xd   :  { %3201 = vmatprep.mubr.msk.bf16.mxu1 %vm3735_vm0, %v3734_v0  ;;  %3221 = vmatprep.mubr.msk.bf16.mxu0 %vm3735_vm0, %v3734_v0 }
   0xf   :  { %3196 = vmatpush3.bf16.msra.mxu1 %v3516_v8  ;;  %3216 = vmatpush3.bf16.msra.mxu0 %v3517_v9  ;;  %v3527_v9 = vld [vmem:[%s4611_s1 + $0x10] sm:$0xff]  }
  0x10   :  { %3197 = vmatprep.subr.bf16.mxu1 %v3734_v0  ;;  %3217 = vmatprep.subr.bf16.mxu0 %v3734_v0 }
  0x13   :  { %3198 = vmatpush3.bf16.msra.mxu1 %v3518_v10  ;;  %3218 = vmatpush3.bf16.msra.mxu0 %v3519_v11  ;;  %v3528_v10 = vld [vmem:[%s4612_s4 + $0x18] sm:$0xff]  }
  0x14   :  { %3199 = vmatprep.subr.bf16.mxu1 %v3734_v0  ;;  %3219 = vmatprep.subr.bf16.mxu0 %v3734_v0 }
  0x17   :  { %3200 = vmatpush3.bf16.msra.mxu1 %v3520_v12  ;;  %3220 = vmatpush3.bf16.msra.mxu0 %v3521_v13  ;;  %v3529_v12 = vld [vmem:[%s4611_s1 + $0x8] sm:$0xff]   ;;  %v3530_v13 = vld [vmem:[%s4612_s4 + $0x10] sm:$0xff]  }
  0x18   :  { %3225 = vmatprep.subr.bf16.mxu1 %v3734_v0  ;;  %3245 = vmatprep.subr.bf16.mxu0 %v3734_v0 }
  0x1a   :  { %3202 = vmatmul.mubr.msk.bf16.vlgmr.msra.gmra.mxu1 %vm120_vm1, %v27_v14  ;;  %3222 = vmatmul.mubr.msk.bf16.vlgmr.msra.gmra.mxu0 %vm120_vm1, %v2878_v15  ;;  %v3531_v14 = vld [vmem:[%s4611_s1] sm:$0xff]   ;;  %v3532_v15 = vld [vmem:[%s4612_s4 + $0x8] sm:$0xff]  }
  0x1b   :  { %3229 = vmatprep.mubr.msk.bf16.mxu1 %vm3735_vm0, %v3734_v0  ;;  %3249 = vmatprep.mubr.msk.bf16.mxu0 %vm3735_vm0, %v3734_v0 }
  0x1c   :  { %3226 = vmatpush3.bf16.msra.mxu1 %v3522_v58  ;;  %3246 = vmatpush3.bf16.msra.mxu0 %v3524_v59 }
  0x1d   :  { %3227 = vmatprep.subr.bf16.mxu1 %v3734_v0  ;;  %3247 = vmatprep.subr.bf16.mxu0 %v3734_v0 }
  0x20   :  { %3228 = vmatpush3.bf16.msra.mxu1 %v3523_v60  ;;  %3248 = vmatpush3.bf16.msra.mxu0 %v3526_v63  ;;  %v3534_v63 = vld [vmem:[%s4609_s2 + $0x8] sm:$0xff]  }
  0x21   :  { %3233 = vmatprep.subr.bf16.mxu1 %v3734_v0  ;;  %3253 = vmatprep.subr.bf16.mxu0 %v3734_v0 }
  0xca   :  { %v90_v16 = vpop.f32.mrf.mxu1  ;;  %v256_v17 = vpop.f32.mrf.mxu0 }
  0xcc   :  { %v3191_v18 = vpop.f32.mrf.mxu1  ;;  %v3211_v19 = vpop.f32.mrf.mxu0 }
  0xcd   :  { %v2900_v18 = vld [vmem:[%s4613_s0 + $0x3] sm:$0x1] }
  0xce   :  { %v93_v20 = vpop.f32.mrf.mxu1  ;;  %v259_v21 = vpop.f32.mrf.mxu0 }
  0xd0   :  { %v3192_v22 = vpop.f32.mrf.mxu1  ;;  %v3212_v23 = vpop.f32.mrf.mxu0 }
  0xda   :  { %v158_v24 = vpop.f32.mrf.mxu1  ;;  %v323_v27 = vpop.f32.mrf.mxu0 }
  0xdb   :  { %v159_v26 = vadd.f32 %v158_v24, %v90_v16  ;;  %v324_v28 = vadd.f32 %v323_v27, %v256_v17  ;;  %v2889_v16 = vld [vmem:[%s4613_s0 + $0x2] sm:$0x1] }
  0xdc   :  { %v3203_v30 = vpop.f32.mrf.mxu1  ;;  %v3223_v32 = vpop.f32.mrf.mxu0  ;;  %v3533_v17 = vld [vmem:[%s4612_s4] sm:$0xff]  }
  0xdd   :  { %v171_v31 = vadd.f32 %v3852_v25, %v159_v26  ;;  %v336_v34 = vadd.f32 %v3857_v29, %v324_v28 }
  0xde   :  { %v161_v33 = vpop.f32.mrf.mxu1  ;;  %v326_v35 = vpop.f32.mrf.mxu0 }
  0xdf   :  { %3606 = vtanh.f32 %v171_v31  ;;  %v2877_v40 = vmul.f32 -1.442695, %v171_v31  ;;  %v2887_v41 = vmul.f32 -1.442695, %v336_v34 }
  0xe0   :  { %v3204_v36 = vpop.f32.mrf.mxu1  ;;  %v3224_v37 = vpop.f32.mrf.mxu0  ;;  %3608 = vtanh.f32 %v336_v34 }
  0xe1   :  { %3610 = vpow2.f32 %v2877_v40 }
  0xe2   :  { %3612 = vpow2.f32 %v2887_v41 }
  0xec   :  { %v3607_v38 = vpop.eup %3606 }
  0xed   :  { %181 = vrot.lane.b32.xlu0 %v3607_v38, %s3737_s10  ;;  %v3609_v39 = vpop.eup %3608 }
  0xee   :  { %v3611_v42 = vpop.eup %3610 }
  0xef   :  { %v175_v43 = vadd.f32 1.0, %v3611_v42  ;;  %v3613_v44 = vpop.eup %3612 }
  0xf0   :  { %v340_v45 = vadd.f32 1.0, %v3613_v44 }
  0xf1   :  { %346 = vrot.lane.b32.xlu0 %v3609_v39, %s3737_s10  ;;  %3614 = vrcp.f32 %v175_v43 }
  0xf2   :  { %3616 = vrcp.f32 %v340_v45 }
  0xfe   :  { %v3615_v46 = vpop.eup %3614 }
  0xff   :  { %v3617_v49 = vpop.eup %3616  ;;  %v179_v52 = vmul.f32 0.0, %v3615_v46 }
 0x100   :  { %v344_v55 = vmul.f32 0.0, %v3617_v49 }
 0x15f   :  { %v182_v47 = vpop.permute.xlu0 %181 }
 0x160   :  { %v184_v48 = vmul.f32 %v3615_v46, %v182_v47 }
 0x162   :  { %186 = vrot.lane.b32.xlu1 %v184_v48, %s3738_s11 }
 0x163   :  { %v347_v50 = vpop.permute.xlu0 %346 }
 0x164   :  { %v349_v51 = vmul.f32 %v3617_v49, %v347_v50 }
 0x166   :  { %351 = vrot.lane.b32.xlu1 %v349_v51, %s3738_s11 }
 0x1d4   :  { %v187_v53 = vpop.permute.xlu1 %186 }
 0x1d5   :  { %v3865_v54 = vadd.f32 %v187_v53, %v179_v52 }
 0x1d7   :  { %3618 = vtanh.f32 %v3865_v54 }
 0x1d8   :  { %v352_v56 = vpop.permute.xlu1 %351 }
 0x1d9   :  { %v3868_v57 = vadd.f32 %v352_v56, %v344_v55 }
 0x1db   :  { %3620 = vtanh.f32 %v3868_v57 }
 0x1e4   :  { %v3619_v61 = vpop.eup %3618 }
 0x1e5   :  { %192 = vrot.lane.b32.xlu0 %v3619_v61, %s3737_s10 }
 0x1e8   :  { %v3621_v62 = vpop.eup %3620 }
 0x1e9   :  { %357 = vrot.lane.b32.xlu1 %v3621_v62, %s3737_s10 }
 0x257   :  { %v193_v1 = vpop.permute.xlu0 %192 }
 0x258   :  { %v3889_v2 = vmul.f32 %v3615_v46, %v193_v1  ;;  %v3535_v1 = vld [vmem:[%s4609_s2] sm:$0xff]  }
 0x25a   :  { %v383_v3 = vpack.c.bf16 %v3889_v2, %v3889_v2 }
 0x25b   :  { %v358_v4 = vpop.permute.xlu1 %357 }
 0x25c   :  { %v3893_v5 = vmul.f32 %v3617_v49, %v358_v4  ;;  %389 = vrot.lane.b32.xlu0 %v383_v3, %s3738_s11  ;;  %v3538_v4 = vld [vmem:[%s4610_s5] sm:$0xff]  }
 0x25e   :  { %v555_v6 = vpack.c.bf16 %v3893_v5, %v3893_v5 }
 0x260   :  { %561 = vrot.lane.b32.xlu1 %v555_v6, %s3738_s11 }
 0x2ce   :  { %v390_v8 = vpop.permute.xlu0 %389 }
 0x2cf   :  { %3230 = vmatmul.mubr.msk.bf16.vlgmr.msra.gmra.mxu1 %vm52_vm2, %v390_v8 }
 0x2d0   :  { %3234 = vmatpush3.bf16.msra.mxu1 %v3525_v7  ;;  %3241 = vmatprep.mubr.msk.bf16.mxu1 %vm3735_vm0, %v3734_v0 }
 0x2d1   :  { %3235 = vmatprep.subr.bf16.mxu1 %v3734_v0 }
 0x2d2   :  { %v562_v11 = vpop.permute.xlu1 %561 }
 0x2d3   :  { %3250 = vmatmul.mubr.msk.bf16.vlgmr.msra.gmra.mxu0 %vm52_vm2, %v562_v11 }
 0x2d4   :  { %3236 = vmatpush3.bf16.msra.mxu1 %v3527_v9  ;;  %3254 = vmatpush3.bf16.msra.mxu0 %v3528_v10 }
 0x2d5   :  { %3237 = vmatprep.subr.bf16.mxu1 %v3734_v0  ;;  %3255 = vmatprep.subr.bf16.mxu0 %v3734_v0 }
 0x2d6   :  { %3261 = vmatprep.mubr.msk.bf16.mxu0 %vm3735_vm0, %v3734_v0 }
 0x2d8   :  { %3238 = vmatpush3.bf16.msra.mxu1 %v3529_v12  ;;  %3256 = vmatpush3.bf16.msra.mxu0 %v3530_v13  ;;  %v3537_v12 = vld [vmem:[%s4611_s1 + $0x18] sm:$0xff]  }
 0x2d9   :  { %3239 = vmatprep.subr.bf16.mxu1 %v3734_v0  ;;  %3257 = vmatprep.subr.bf16.mxu0 %v3734_v0 }
 0x2dc   :  { %3240 = vmatpush3.bf16.msra.mxu1 %v3531_v14  ;;  %3258 = vmatpush3.bf16.msra.mxu0 %v3532_v15  ;;  %v3539_v14 = vld [vmem:[%s4611_s1 + $0x10] sm:$0xff]   ;;  %v3540_v15 = vld [vmem:[%s4612_s4 + $0x18] sm:$0xff]  }
 0x2dd   :  { %3259 = vmatprep.subr.bf16.mxu0 %v3734_v0  ;;  %3265 = vmatprep.subr.bf16.mxu1 %v3734_v0 }
 0x2df   :  { %3242 = vmatmul.mubr.msk.bf16.vlgmr.msra.gmra.mxu1 %vm120_vm1, %v2889_v16 }
 0x2e0   :  { %3260 = vmatpush3.bf16.msra.mxu0 %v3533_v17  ;;  %3269 = vmatprep.mubr.msk.bf16.mxu1 %vm3735_vm0, %v3734_v0  ;;  %v3541_v17 = vld [vmem:[%s4611_s1 + $0x8] sm:$0xff]  }
 0x2e1   :  { %3285 = vmatprep.subr.bf16.mxu0 %v3734_v0  ;;  %3266 = vmatpush3.bf16.msra.mxu1 %v3534_v63 }
 0x2e2   :  { %3267 = vmatprep.subr.bf16.mxu1 %v3734_v0 }
 0x2e3   :  { %3262 = vmatmul.mubr.msk.bf16.vlgmr.msra.gmra.mxu0 %vm120_vm1, %v2900_v18  ;;  %v3542_v18 = vld [vmem:[%s4612_s4 + $0x10] sm:$0xff]  }
 0x2e4   :  { %3289 = vmatprep.mubr.msk.bf16.mxu0 %vm3735_vm0, %v3734_v0 }
 0x2e5   :  { %3268 = vmatpush3.bf16.msra.mxu1 %v3535_v1 }
 0x2e6   :  { %3273 = vmatprep.subr.bf16.mxu1 %v3734_v0 }
 0x38f   :  { %v440_v19 = vpop.f32.mrf.mxu1 }
 0x391   :  { %v3231_v20 = vpop.f32.mrf.mxu1 }
 0x392   :  { %v3544_v20 = vld [vmem:[%s4612_s4 + $0x8] sm:$0xff]  }
 0x393   :  { %v443_v21 = vpop.f32.mrf.mxu1  ;;  %v612_v22 = vpop.f32.mrf.mxu0 }
 0x394   :  { %v2913_v21 = vld [vmem:[%s4613_s0 + $0x4] sm:$0x1] }
 0x395   :  { %v3232_v23 = vpop.f32.mrf.mxu1  ;;  %v3251_v24 = vpop.f32.mrf.mxu0 }
 0x396   :  { %v2924_v23 = vld [vmem:[%s4613_s0 + $0x5] sm:$0x1] }
 0x397   :  { %v615_v26 = vpop.f32.mrf.mxu0 }
 0x399   :  { %v3252_v27 = vpop.f32.mrf.mxu0 }
 0x39f   :  { %v507_v28 = vpop.f32.mrf.mxu1 }
 0x3a0   :  { %v508_v30 = vadd.f32 %v507_v28, %v440_v19  ;;  %v3543_v19 = vld [vmem:[%s4611_s1] sm:$0xff]  }
 0x3a1   :  { %v3243_v31 = vpop.f32.mrf.mxu1 }
 0x3a2   :  { %v520_v32 = vadd.f32 %v3852_v25, %v508_v30 }
 0x3a3   :  { %v510_v33 = vpop.f32.mrf.mxu1  ;;  %v679_v34 = vpop.f32.mrf.mxu0 }
 0x3a4   :  { %3622 = vtanh.f32 %v520_v32  ;;  %v680_v35 = vadd.f32 %v679_v34, %v612_v22  ;;  %v2899_v43 = vmul.f32 -1.442695, %v520_v32  ;;  %v3545_v22 = vld [vmem:[%s4612_s4] sm:$0xff]  }
 0x3a5   :  { %v3244_v36 = vpop.f32.mrf.mxu1  ;;  %v3263_v37 = vpop.f32.mrf.mxu0 }
 0x3a6   :  { %v692_v38 = vadd.f32 %v3857_v29, %v680_v35 }
 0x3a7   :  { %v682_v39 = vpop.f32.mrf.mxu0 }
 0x3a8   :  { %3624 = vtanh.f32 %v692_v38  ;;  %v2910_v44 = vmul.f32 -1.442695, %v692_v38 }
 0x3a9   :  { %v3264_v40 = vpop.f32.mrf.mxu0  ;;  %3626 = vpow2.f32 %v2899_v43 }
 0x3aa   :  { %3628 = vpow2.f32 %v2910_v44 }
 0x3b1   :  { %v3623_v41 = vpop.eup %3622 }
 0x3b2   :  { %530 = vrot.lane.b32.xlu0 %v3623_v41, %s3737_s10 }
 0x3b5   :  { %v3625_v42 = vpop.eup %3624 }
 0x3b6   :  { %702 = vrot.lane.b32.xlu1 %v3625_v42, %s3737_s10  ;;  %v3627_v45 = vpop.eup %3626 }
 0x3b7   :  { %v524_v46 = vadd.f32 1.0, %v3627_v45  ;;  %v3629_v47 = vpop.eup %3628 }
 0x3b8   :  { %v696_v48 = vadd.f32 1.0, %v3629_v47 }
 0x3b9   :  { %3630 = vrcp.f32 %v524_v46 }
 0x3ba   :  { %3632 = vrcp.f32 %v696_v48 }
 0x3c6   :  { %v3631_v49 = vpop.eup %3630 }
 0x3c7   :  { %v3633_v52 = vpop.eup %3632  ;;  %v528_v56 = vmul.f32 %v3631_v49, %v3865_v54  ;;  %v3536_v54 = vld [vmem:[%s4610_s5 + $0x8] sm:$0xff]  }
 0x3c8   :  { %v700_v60 = vmul.f32 %v3633_v52, %v3868_v57  ;;  %3286 = vmatpush3.bf16.msra.mxu0 %v3536_v54 }
 0x3c9   :  { %3287 = vmatprep.subr.bf16.mxu0 %v3734_v0 }
 0x3cc   :  { %3288 = vmatpush3.bf16.msra.mxu0 %v3538_v4 }
 0x3cd   :  { %3293 = vmatprep.subr.bf16.mxu0 %v3734_v0 }
 0x424   :  { %v531_v50 = vpop.permute.xlu0 %530 }
 0x425   :  { %v533_v51 = vmul.f32 %v3631_v49, %v531_v50 }
 0x427   :  { %535 = vrot.lane.b32.xlu0 %v533_v51, %s3738_s11 }
 0x428   :  { %v703_v53 = vpop.permute.xlu1 %702 }
 0x429   :  { %v705_v55 = vmul.f32 %v3633_v52, %v703_v53 }
 0x42b   :  { %707 = vrot.lane.b32.xlu1 %v705_v55, %s3738_s11 }
 0x499   :  { %v536_v58 = vpop.permute.xlu0 %535 }
 0x49a   :  { %v3956_v59 = vadd.f32 %v536_v58, %v528_v56 }
 0x49c   :  { %3634 = vtanh.f32 %v3956_v59 }
 0x49d   :  { %v708_v61 = vpop.permute.xlu1 %707 }
 0x49e   :  { %v3960_v62 = vadd.f32 %v708_v61, %v700_v60 }
 0x4a0   :  { %3636 = vtanh.f32 %v3960_v62 }
 0x4a9   :  { %v3635_v57 = vpop.eup %3634 }
 0x4aa   :  { %541 = vrot.lane.b32.xlu0 %v3635_v57, %s3737_s10 }
 0x4ad   :  { %v3637_v3 = vpop.eup %3636 }
 0x4ae   :  { %713 = vrot.lane.b32.xlu1 %v3637_v3, %s3737_s10 }
 0x51c   :  { %v542_v6 = vpop.permute.xlu0 %541 }
 0x51d   :  { %v3981_v7 = vmul.f32 %v3631_v49, %v542_v6 }
 0x51f   :  { %v739_v8 = vpack.c.bf16 %v3981_v7, %v3981_v7 }
 0x520   :  { %v714_v9 = vpop.permute.xlu1 %713 }
 0x521   :  { %v3985_v10 = vmul.f32 %v3633_v52, %v714_v9  ;;  %745 = vrot.lane.b32.xlu0 %v739_v8, %s3738_s11  ;;  %v3546_v8 = vld [vmem:[%s4609_s2 + $0x8] sm:$0xff]   ;;  %v3547_v9 = vld [vmem:[%s4609_s2] sm:$0xff]  }
 0x523   :  { %v911_v11 = vpack.c.bf16 %v3985_v10, %v3985_v10 }
 0x525   :  { %917 = vrot.lane.b32.xlu1 %v911_v11, %s3738_s11 }
 0x593   :  { %v746_v13 = vpop.permute.xlu0 %745 }
 0x594   :  { %3270 = vmatmul.mubr.msk.bf16.vlgmr.msra.gmra.mxu1 %vm52_vm2, %v746_v13 }
 0x595   :  { %3274 = vmatpush3.bf16.msra.mxu1 %v3537_v12  ;;  %3281 = vmatprep.mubr.msk.bf16.mxu1 %vm3735_vm0, %v3734_v0  ;;  %v3550_v12 = vld [vmem:[%s4610_s5] sm:$0xff]  }
 0x596   :  { %3275 = vmatprep.subr.bf16.mxu1 %v3734_v0 }
 0x597   :  { %v918_v16 = vpop.permute.xlu1 %917 }
 0x598   :  { %3290 = vmatmul.mubr.msk.bf16.vlgmr.msra.gmra.mxu0 %vm52_vm2, %v918_v16 }
 0x599   :  { %3276 = vmatpush3.bf16.msra.mxu1 %v3539_v14  ;;  %3294 = vmatpush3.bf16.msra.mxu0 %v3540_v15 }
 0x59a   :  { %3277 = vmatprep.subr.bf16.mxu1 %v3734_v0  ;;  %3295 = vmatprep.subr.bf16.mxu0 %v3734_v0 }
 0x59b   :  { %3301 = vmatprep.mubr.msk.bf16.mxu0 %vm3735_vm0, %v3734_v0 }
 0x59d   :  { %3278 = vmatpush3.bf16.msra.mxu1 %v3541_v17  ;;  %3296 = vmatpush3.bf16.msra.mxu0 %v3542_v18 }
 0x59e   :  { %3279 = vmatprep.subr.bf16.mxu1 %v3734_v0  ;;  %3297 = vmatprep.subr.bf16.mxu0 %v3734_v0 }
 0x5a1   :  { %3280 = vmatpush3.bf16.msra.mxu1 %v3543_v19  ;;  %3298 = vmatpush3.bf16.msra.mxu0 %v3544_v20  ;;  %v3549_v19 = vld [vmem:[%s4611_s1 + $0x18] sm:$0xff]  }
 0x5a2   :  { %3299 = vmatprep.subr.bf16.mxu0 %v3734_v0  ;;  %3305 = vmatprep.subr.bf16.mxu1 %v3734_v0 }
 0x5a4   :  { %3282 = vmatmul.mubr.msk.bf16.vlgmr.msra.gmra.mxu1 %vm120_vm1, %v2913_v21  ;;  %v3551_v21 = vld [vmem:[%s4611_s1 + $0x10] sm:$0xff]  }
 0x5a5   :  { %3300 = vmatpush3.bf16.msra.mxu0 %v3545_v22  ;;  %3309 = vmatprep.mubr.msk.bf16.mxu1 %vm3735_vm0, %v3734_v0  ;;  %v3552_v22 = vld [vmem:[%s4612_s4 + $0x18] sm:$0xff]  }
 0x5a6   :  { %3325 = vmatprep.subr.bf16.mxu0 %v3734_v0  ;;  %3306 = vmatpush3.bf16.msra.mxu1 %v3546_v8 }
 0x5a7   :  { %3307 = vmatprep.subr.bf16.mxu1 %v3734_v0 }
 0x5a8   :  { %3302 = vmatmul.mubr.msk.bf16.vlgmr.msra.gmra.mxu0 %vm120_vm1, %v2924_v23 }
 0x5a9   :  { %3329 = vmatprep.mubr.msk.bf16.mxu0 %vm3735_vm0, %v3734_v0 }
 0x5aa   :  { %3308 = vmatpush3.bf16.msra.mxu1 %v3547_v9 }
 0x5ab   :  { %3313 = vmatprep.subr.bf16.mxu1 %v3734_v0 }
 0x654   :  { %v796_v24 = vpop.f32.mrf.mxu1 }
 0x656   :  { %v3271_v26 = vpop.f32.mrf.mxu1 }
 0x657   :  { %v3554_v26 = vld [vmem:[%s4612_s4 + $0x10] sm:$0xff]  }
 0x658   :  { %v799_v27 = vpop.f32.mrf.mxu1  ;;  %v968_v28 = vpop.f32.mrf.mxu0 }
 0x659   :  { %v3555_v27 = vld [vmem:[%s4611_s1] sm:$0xff]  }
 0x65a   :  { %v3272_v30 = vpop.f32.mrf.mxu1  ;;  %v3291_v31 = vpop.f32.mrf.mxu0 }
 0x65b   :  { %v2937_v30 = vld [vmem:[%s4613_s0 + $0x6] sm:$0x1] }
 0x65c   :  { %v971_v32 = vpop.f32.mrf.mxu0  ;;  %v3557_v31 = vld [vmem:[%s4612_s4] sm:$0xff]  }
 0x65d   :  { %v2948_v32 = vld [vmem:[%s4613_s0 + $0x7] sm:$0x1] }
 0x65e   :  { %v3292_v33 = vpop.f32.mrf.mxu0 }
 0x664   :  { %v863_v34 = vpop.f32.mrf.mxu1 }
 0x665   :  { %v864_v35 = vadd.f32 %v863_v34, %v796_v24  ;;  %v3553_v24 = vld [vmem:[%s4611_s1 + $0x8] sm:$0xff]  }
 0x666   :  { %v3283_v36 = vpop.f32.mrf.mxu1 }
 0x667   :  { %v876_v37 = vadd.f32 %v3852_v25, %v864_v35 }
 0x668   :  { %v866_v38 = vpop.f32.mrf.mxu1  ;;  %v1035_v39 = vpop.f32.mrf.mxu0 }
 0x669   :  { %3638 = vtanh.f32 %v876_v37  ;;  %v1036_v40 = vadd.f32 %v1035_v39, %v968_v28  ;;  %v2923_v48 = vmul.f32 -1.442695, %v876_v37  ;;  %v3556_v28 = vld [vmem:[%s4612_s4 + $0x8] sm:$0xff]  }
 0x66a   :  { %v3284_v41 = vpop.f32.mrf.mxu1  ;;  %v3303_v42 = vpop.f32.mrf.mxu0 }
 0x66b   :  { %v1048_v43 = vadd.f32 %v3857_v29, %v1036_v40 }
 0x66c   :  { %v1038_v44 = vpop.f32.mrf.mxu0 }
 0x66d   :  { %3640 = vtanh.f32 %v1048_v43  ;;  %v2934_v49 = vmul.f32 -1.442695, %v1048_v43 }
 0x66e   :  { %v3304_v45 = vpop.f32.mrf.mxu0  ;;  %3642 = vpow2.f32 %v2923_v48 }
 0x66f   :  { %3644 = vpow2.f32 %v2934_v49 }
 0x676   :  { %v3639_v46 = vpop.eup %3638 }
 0x677   :  { %886 = vrot.lane.b32.xlu0 %v3639_v46, %s3737_s10 }
 0x67a   :  { %v3641_v47 = vpop.eup %3640 }
 0x67b   :  { %1058 = vrot.lane.b32.xlu1 %v3641_v47, %s3737_s10  ;;  %v3643_v50 = vpop.eup %3642 }
 0x67c   :  { %v880_v51 = vadd.f32 1.0, %v3643_v50  ;;  %v3645_v52 = vpop.eup %3644 }
 0x67d   :  { %v1052_v53 = vadd.f32 1.0, %v3645_v52 }
 0x67e   :  { %3646 = vrcp.f32 %v880_v51 }
 0x67f   :  { %3648 = vrcp.f32 %v1052_v53 }
 0x68b   :  { %v3647_v55 = vpop.eup %3646 }
 0x68c   :  { %v3649_v60 = vpop.eup %3648  ;;  %v884_v54 = vmul.f32 %v3647_v55, %v3956_v59  ;;  %v3548_v59 = vld [vmem:[%s4610_s5 + $0x8] sm:$0xff]  }
 0x68d   :  { %v1056_v3 = vmul.f32 %v3649_v60, %v3960_v62  ;;  %3326 = vmatpush3.bf16.msra.mxu0 %v3548_v59 }
 0x68e   :  { %3327 = vmatprep.subr.bf16.mxu0 %v3734_v0 }
 0x691   :  { %3328 = vmatpush3.bf16.msra.mxu0 %v3550_v12 }
 0x692   :  { %3333 = vmatprep.subr.bf16.mxu0 %v3734_v0 }
 0x6e9   :  { %v887_v56 = vpop.permute.xlu0 %886 }
 0x6ea   :  { %v889_v58 = vmul.f32 %v3647_v55, %v887_v56 }
 0x6ec   :  { %891 = vrot.lane.b32.xlu0 %v889_v58, %s3738_s11 }
 0x6ed   :  { %v1059_v61 = vpop.permute.xlu1 %1058 }
 0x6ee   :  { %v1061_v63 = vmul.f32 %v3649_v60, %v1059_v61 }
 0x6f0   :  { %1063 = vrot.lane.b32.xlu1 %v1061_v63, %s3738_s11 }
 0x75e   :  { %v892_v1 = vpop.permute.xlu0 %891 }
 0x75f   :  { %v4048_v57 = vadd.f32 %v892_v1, %v884_v54 }
 0x761   :  { %3650 = vtanh.f32 %v4048_v57 }
 0x762   :  { %v1064_v4 = vpop.permute.xlu1 %1063 }
 0x763   :  { %v4052_v6 = vadd.f32 %v1064_v4, %v1056_v3 }
 0x765   :  { %3652 = vtanh.f32 %v4052_v6 }
 0x76e   :  { %v3651_v62 = vpop.eup %3650 }
 0x76f   :  { %897 = vrot.lane.b32.xlu0 %v3651_v62, %s3737_s10 }
 0x772   :  { %v3653_v11 = vpop.eup %3652 }
 0x773   :  { %1069 = vrot.lane.b32.xlu1 %v3653_v11, %s3737_s10 }
 0x7e1   :  { %v898_v13 = vpop.permute.xlu0 %897 }
 0x7e2   :  { %v4073_v14 = vmul.f32 %v3647_v55, %v898_v13 }
 0x7e4   :  { %v1095_v15 = vpack.c.bf16 %v4073_v14, %v4073_v14 }
 0x7e5   :  { %v1070_v16 = vpop.permute.xlu1 %1069 }
 0x7e6   :  { %v4077_v17 = vmul.f32 %v3649_v60, %v1070_v16  ;;  %1101 = vrot.lane.b32.xlu0 %v1095_v15, %s3738_s11  ;;  %v3558_v15 = vld [vmem:[%s4609_s2 + $0x8] sm:$0xff]   ;;  %v3559_v16 = vld [vmem:[%s4609_s2] sm:$0xff]  }
 0x7e8   :  { %v1267_v18 = vpack.c.bf16 %v4077_v17, %v4077_v17 }
 0x7ea   :  { %1273 = vrot.lane.b32.xlu1 %v1267_v18, %s3738_s11 }
 0x858   :  { %v1102_v20 = vpop.permute.xlu0 %1101 }
 0x859   :  { %3310 = vmatmul.mubr.msk.bf16.vlgmr.msra.gmra.mxu1 %vm52_vm2, %v1102_v20 }
 0x85a   :  { %3314 = vmatpush3.bf16.msra.mxu1 %v3549_v19  ;;  %3321 = vmatprep.mubr.msk.bf16.mxu1 %vm3735_vm0, %v3734_v0  ;;  %v3562_v19 = vld [vmem:[%s4610_s5] sm:$0xff]  }
 0x85b   :  { %3315 = vmatprep.subr.bf16.mxu1 %v3734_v0 }
 0x85c   :  { %v1274_v23 = vpop.permute.xlu1 %1273 }
 0x85d   :  { %3330 = vmatmul.mubr.msk.bf16.vlgmr.msra.gmra.mxu0 %vm52_vm2, %v1274_v23 }
 0x85e   :  { %3316 = vmatpush3.bf16.msra.mxu1 %v3551_v21  ;;  %3334 = vmatpush3.bf16.msra.mxu0 %v3552_v22 }
 0x85f   :  { %3317 = vmatprep.subr.bf16.mxu1 %v3734_v0  ;;  %3335 = vmatprep.subr.bf16.mxu0 %v3734_v0 }
 0x860   :  { %3341 = vmatprep.mubr.msk.bf16.mxu0 %vm3735_vm0, %v3734_v0 }
 0x862   :  { %3318 = vmatpush3.bf16.msra.mxu1 %v3553_v24  ;;  %3336 = vmatpush3.bf16.msra.mxu0 %v3554_v26 }
 0x863   :  { %3319 = vmatprep.subr.bf16.mxu1 %v3734_v0  ;;  %3337 = vmatprep.subr.bf16.mxu0 %v3734_v0 }
 0x866   :  { %3320 = vmatpush3.bf16.msra.mxu1 %v3555_v27  ;;  %3338 = vmatpush3.bf16.msra.mxu0 %v3556_v28  ;;  %v3561_v27 = vld [vmem:[%s4611_s1 + $0x18] sm:$0xff]  }
 0x867   :  { %3339 = vmatprep.subr.bf16.mxu0 %v3734_v0  ;;  %3345 = vmatprep.subr.bf16.mxu1 %v3734_v0 }
 0x869   :  { %3322 = vmatmul.mubr.msk.bf16.vlgmr.msra.gmra.mxu1 %vm120_vm1, %v2937_v30  ;;  %v3563_v30 = vld [vmem:[%s4611_s1 + $0x10] sm:$0xff]  }
 0x86a   :  { %3340 = vmatpush3.bf16.msra.mxu0 %v3557_v31  ;;  %3349 = vmatprep.mubr.msk.bf16.mxu1 %vm3735_vm0, %v3734_v0  ;;  %v3564_v31 = vld [vmem:[%s4612_s4 + $0x18] sm:$0xff]  }
 0x86b   :  { %3365 = vmatprep.subr.bf16.mxu0 %v3734_v0  ;;  %3346 = vmatpush3.bf16.msra.mxu1 %v3558_v15 }
 0x86c   :  { %3347 = vmatprep.subr.bf16.mxu1 %v3734_v0 }
 0x86d   :  { %3342 = vmatmul.mubr.msk.bf16.vlgmr.msra.gmra.mxu0 %vm120_vm1, %v2948_v32 }
 0x86e   :  { %3369 = vmatprep.mubr.msk.bf16.mxu0 %vm3735_vm0, %v3734_v0 }
 0x86f   :  { %3348 = vmatpush3.bf16.msra.mxu1 %v3559_v16 }
 0x870   :  { %3353 = vmatprep.subr.bf16.mxu1 %v3734_v0 }
 0x919   :  { %v1152_v33 = vpop.f32.mrf.mxu1 }
 0x91b   :  { %v3311_v34 = vpop.f32.mrf.mxu1 }
 0x91c   :  { %v3566_v34 = vld [vmem:[%s4612_s4 + $0x10] sm:$0xff]  }
 0x91d   :  { %v1155_v35 = vpop.f32.mrf.mxu1  ;;  %v1324_v36 = vpop.f32.mrf.mxu0 }
 0x91e   :  { %v3567_v35 = vld [vmem:[%s4611_s1] sm:$0xff]  }
 0x91f   :  { %v3312_v37 = vpop.f32.mrf.mxu1  ;;  %v3331_v38 = vpop.f32.mrf.mxu0 }
 0x920   :  { %v2961_v37 = vld [vmem:[%s4613_s0 + $0x8] sm:$0x1]  ;;  %v3569_v38 = vld [vmem:[%s4612_s4] sm:$0xff]  }
 0x921   :  { %v1327_v39 = vpop.f32.mrf.mxu0 }
 0x922   :  { %v2972_v39 = vld [vmem:[%s4613_s0 + $0x9] sm:$0x1] }
 0x923   :  { %v3332_v40 = vpop.f32.mrf.mxu0 }
 0x929   :  { %v1219_v41 = vpop.f32.mrf.mxu1 }
 0x92a   :  { %v1220_v42 = vadd.f32 %v1219_v41, %v1152_v33  ;;  %v3565_v33 = vld [vmem:[%s4611_s1 + $0x8] sm:$0xff]  }
 0x92b   :  { %v3323_v43 = vpop.f32.mrf.mxu1 }
 0x92c   :  { %v1232_v44 = vadd.f32 %v3852_v25, %v1220_v42 }
 0x92d   :  { %v1222_v45 = vpop.f32.mrf.mxu1  ;;  %v1391_v46 = vpop.f32.mrf.mxu0 }
 0x92e   :  { %3654 = vtanh.f32 %v1232_v44  ;;  %v1392_v47 = vadd.f32 %v1391_v46, %v1324_v36  ;;  %v2947_v56 = vmul.f32 -1.442695, %v1232_v44  ;;  %v3568_v36 = vld [vmem:[%s4612_s4 + $0x8] sm:$0xff]  }
 0x92f   :  { %v3324_v48 = vpop.f32.mrf.mxu1  ;;  %v3343_v49 = vpop.f32.mrf.mxu0 }
 0x930   :  { %v1404_v50 = vadd.f32 %v3857_v29, %v1392_v47  ;;  %v4228_v49 = vld [vmem:[%s4614_s3] ss:$0 sm:$0xff] }
 0x931   :  { %v1394_v51 = vpop.f32.mrf.mxu0 }
 0x932   :  { %3656 = vtanh.f32 %v1404_v50  ;;  %v2958_v25 = vmul.f32 -1.442695, %v1404_v50 }
 0x933   :  { %v3344_v52 = vpop.f32.mrf.mxu0  ;;  %3658 = vpow2.f32 %v2947_v56  ;;  %v4234_v56 = vld [vmem:[%s4615_s6] ss:$0 sm:$0xff] }
 0x934   :  { %3660 = vpow2.f32 %v2958_v25 }
 0x93b   :  { %v3655_v53 = vpop.eup %3654 }
 0x93c   :  { %1242 = vrot.lane.b32.xlu0 %v3655_v53, %s3737_s10 }
 0x93f   :  { %v3657_v55 = vpop.eup %3656 }
 0x940   :  { %1414 = vrot.lane.b32.xlu1 %v3657_v55, %s3737_s10  ;;  %v3659_v58 = vpop.eup %3658 }
 0x941   :  { %v1236_v60 = vadd.f32 1.0, %v3659_v58  ;;  %v3661_v61 = vpop.eup %3660 }
 0x942   :  { %v1408_v63 = vadd.f32 1.0, %v3661_v61 }
 0x943   :  { %3662 = vrcp.f32 %v1236_v60 }
 0x944   :  { %3664 = vrcp.f32 %v1408_v63 }
 0x950   :  { %v3663_v29 = vpop.eup %3662 }
 0x951   :  { %v3665_v3 = vpop.eup %3664  ;;  %v1240_v59 = vmul.f32 %v3663_v29, %v4048_v57  ;;  %v3560_v57 = vld [vmem:[%s4610_s5 + $0x8] sm:$0xff]  }
 0x952   :  { %v1412_v11 = vmul.f32 %v3665_v3, %v4052_v6  ;;  %3366 = vmatpush3.bf16.msra.mxu0 %v3560_v57 }
 0x953   :  { %3367 = vmatprep.subr.bf16.mxu0 %v3734_v0 }
 0x956   :  { %3368 = vmatpush3.bf16.msra.mxu0 %v3562_v19 }
 0x957   :  { %3373 = vmatprep.subr.bf16.mxu0 %v3734_v0 }
 0x9ae   :  { %v1243_v54 = vpop.permute.xlu0 %1242 }
 0x9af   :  { %v1245_v1 = vmul.f32 %v3663_v29, %v1243_v54 }
 0x9b1   :  { %1247 = vrot.lane.b32.xlu0 %v1245_v1, %s3738_s11 }
 0x9b2   :  { %v1415_v4 = vpop.permute.xlu1 %1414 }
 0x9b3   :  { %v1417_v8 = vmul.f32 %v3665_v3, %v1415_v4 }
 0x9b5   :  { %1419 = vrot.lane.b32.xlu1 %v1417_v8, %s3738_s11 }
 0xa23   :  { %v1248_v9 = vpop.permute.xlu0 %1247 }
 0xa24   :  { %v4140_v62 = vadd.f32 %v1248_v9, %v1240_v59 }
 0xa26   :  { %3666 = vtanh.f32 %v4140_v62 }
 0xa27   :  { %v1420_v12 = vpop.permute.xlu1 %1419 }
 0xa28   :  { %v4144_v13 = vadd.f32 %v1420_v12, %v1412_v11 }
 0xa2a   :  { %3668 = vtanh.f32 %v4144_v13 }
 0xa33   :  { %v3667_v6 = vpop.eup %3666 }
 0xa34   :  { %1253 = vrot.lane.b32.xlu0 %v3667_v6, %s3737_s10 }
 0xa37   :  { %v3669_v18 = vpop.eup %3668 }
 0xa38   :  { %1425 = vrot.lane.b32.xlu1 %v3669_v18, %s3737_s10 }
 0xaa6   :  { %v1254_v20 = vpop.permute.xlu0 %1253 }
 0xaa7   :  { %v4165_v21 = vmul.f32 %v3663_v29, %v1254_v20 }
 0xaa9   :  { %v1451_v22 = vpack.c.bf16 %v4165_v21, %v4165_v21 }
 0xaaa   :  { %v1426_v23 = vpop.permute.xlu1 %1425 }
 0xaab   :  { %v4169_v24 = vmul.f32 %v3665_v3, %v1426_v23  ;;  %1457 = vrot.lane.b32.xlu0 %v1451_v22, %s3738_s11 }
 0xaad   :  { %v1623_v26 = vpack.c.bf16 %v4169_v24, %v4169_v24 }
 0xaaf   :  { %1629 = vrot.lane.b32.xlu1 %v1623_v26, %s3738_s11 }
 0xb1d   :  { %v1458_v28 = vpop.permute.xlu0 %1457 }
 0xb1e   :  { %3350 = vmatmul.mubr.msk.bf16.vlgmr.msra.gmra.mxu1 %vm52_vm2, %v1458_v28  ;;  %v3570_v28 = vld [vmem:[%s4609_s2 + $0x8] sm:$0xff]  }
 0xb1f   :  { %3354 = vmatpush3.bf16.msra.mxu1 %v3561_v27  ;;  %3361 = vmatprep.mubr.msk.bf16.mxu1 %vm3735_vm0, %v3734_v0 }
 0xb20   :  { %3355 = vmatprep.subr.bf16.mxu1 %v3734_v0 }
 0xb21   :  { %v1630_v32 = vpop.permute.xlu1 %1629 }
 0xb22   :  { %3370 = vmatmul.mubr.msk.bf16.vlgmr.msra.gmra.mxu0 %vm52_vm2, %v1630_v32  ;;  %v3574_v32 = vld [vmem:[%s4610_s5] sm:$0xff]  }
 0xb23   :  { %3356 = vmatpush3.bf16.msra.mxu1 %v3563_v30  ;;  %3374 = vmatpush3.bf16.msra.mxu0 %v3564_v31  ;;  %v3571_v30 = vld [vmem:[%s4609_s2] sm:$0xff]  }
 0xb24   :  { %3357 = vmatprep.subr.bf16.mxu1 %v3734_v0  ;;  %3375 = vmatprep.subr.bf16.mxu0 %v3734_v0 }
 0xb25   :  { %3381 = vmatprep.mubr.msk.bf16.mxu0 %vm3735_vm0, %v3734_v0 }
 0xb27   :  { %3358 = vmatpush3.bf16.msra.mxu1 %v3565_v33  ;;  %3376 = vmatpush3.bf16.msra.mxu0 %v3566_v34 }
 0xb28   :  { %3359 = vmatprep.subr.bf16.mxu1 %v3734_v0  ;;  %3377 = vmatprep.subr.bf16.mxu0 %v3734_v0 }
 0xb2b   :  { %3360 = vmatpush3.bf16.msra.mxu1 %v3567_v35  ;;  %3378 = vmatpush3.bf16.msra.mxu0 %v3568_v36 }
 0xb2c   :  { %3379 = vmatprep.subr.bf16.mxu0 %v3734_v0  ;;  %3385 = vmatprep.subr.bf16.mxu1 %v3734_v0 }
 0xb2e   :  { %3362 = vmatmul.mubr.msk.bf16.vlgmr.msra.gmra.mxu1 %vm120_vm1, %v2961_v37 }
 0xb2f   :  { %3380 = vmatpush3.bf16.msra.mxu0 %v3569_v38  ;;  %3389 = vmatprep.mubr.msk.bf16.mxu1 %vm3735_vm0, %v3734_v0 }
 0xb30   :  { %3405 = vmatprep.subr.bf16.mxu0 %v3734_v0  ;;  %3386 = vmatpush3.bf16.msra.mxu1 %v3570_v28 }
 0xb31   :  { %3387 = vmatprep.subr.bf16.mxu1 %v3734_v0 }
 0xb32   :  { %3382 = vmatmul.mubr.msk.bf16.vlgmr.msra.gmra.mxu0 %vm120_vm1, %v2972_v39  ;;  %v3573_v39 = vld [vmem:[%s4611_s1 + $0x18] sm:$0xff]  }
 0xb33   :  { %3409 = vmatprep.mubr.msk.bf16.mxu0 %vm3735_vm0, %v3734_v0 }
 0xb34   :  { %3388 = vmatpush3.bf16.msra.mxu1 %v3571_v30 }
 0xb35   :  { %3393 = vmatprep.subr.bf16.mxu1 %v3734_v0 }
 0xbde   :  { %v1508_v40 = vpop.f32.mrf.mxu1 }
 0xbe0   :  { %v3351_v41 = vpop.f32.mrf.mxu1 }
 0xbe1   :  { %v3575_v41 = vld [vmem:[%s4611_s1 + $0x10] sm:$0xff]  }
 0xbe2   :  { %v1511_v42 = vpop.f32.mrf.mxu1  ;;  %v1680_v43 = vpop.f32.mrf.mxu0 }
 0xbe3   :  { %v3576_v42 = vld [vmem:[%s4612_s4 + $0x18] sm:$0xff]  }
 0xbe4   :  { %v3352_v44 = vpop.f32.mrf.mxu1  ;;  %v3371_v45 = vpop.f32.mrf.mxu0 }
 0xbe5   :  { %v3577_v44 = vld [vmem:[%s4611_s1 + $0x8] sm:$0xff]   ;;  %v3578_v45 = vld [vmem:[%s4612_s4 + $0x10] sm:$0xff]  }
 0xbe6   :  { %v1683_v46 = vpop.f32.mrf.mxu0 }
 0xbe7   :  { %v3579_v46 = vld [vmem:[%s4611_s1] sm:$0xff]  }
 0xbe8   :  { %v3372_v47 = vpop.f32.mrf.mxu0 }
 0xbe9   :  { %v3580_v47 = vld [vmem:[%s4612_s4 + $0x8] sm:$0xff]  }
 0xbee   :  { %v1575_v48 = vpop.f32.mrf.mxu1 }
 0xbef   :  { %v1576_v50 = vadd.f32 %v1575_v48, %v1508_v40  ;;  %v2985_v48 = vld [vmem:[%s4613_s0 + $0xa] sm:$0x1] }
 0xbf0   :  { %v3363_v51 = vpop.f32.mrf.mxu1 }
 0xbf1   :  { %v1588_v52 = vadd.f32 %v4228_v49, %v1576_v50  ;;  %v3581_v50 = vld [vmem:[%s4612_s4] sm:$0xff]   ;;  %v2996_v51 = vld [vmem:[%s4613_s0 + $0xb] sm:$0x1] }
 0xbf2   :  { %v1578_v53 = vpop.f32.mrf.mxu1  ;;  %v1747_v55 = vpop.f32.mrf.mxu0 }
 0xbf3   :  { %3670 = vtanh.f32 %v1588_v52  ;;  %v1748_v25 = vadd.f32 %v1747_v55, %v1680_v43  ;;  %v2971_v3 = vmul.f32 -1.442695, %v1588_v52 }
 0xbf4   :  { %v3364_v58 = vpop.f32.mrf.mxu1  ;;  %v3383_v60 = vpop.f32.mrf.mxu0 }
 0xbf5   :  { %v1760_v61 = vadd.f32 %v4234_v56, %v1748_v25 }
 0xbf6   :  { %v1750_v63 = vpop.f32.mrf.mxu0 }
 0xbf7   :  { %3672 = vtanh.f32 %v1760_v61  ;;  %v2982_v4 = vmul.f32 -1.442695, %v1760_v61 }
 0xbf8   :  { %v3384_v29 = vpop.f32.mrf.mxu0  ;;  %3674 = vpow2.f32 %v2971_v3 }
 0xbf9   :  { %3676 = vpow2.f32 %v2982_v4 }
 0xc00   :  { %v3671_v54 = vpop.eup %3670 }
 0xc01   :  { %1598 = vrot.lane.b32.xlu0 %v3671_v54, %s3737_s10 }
 0xc04   :  { %v3673_v1 = vpop.eup %3672 }
 0xc05   :  { %1770 = vrot.lane.b32.xlu1 %v3673_v1, %s3737_s10  ;;  %v3675_v8 = vpop.eup %3674 }
 0xc06   :  { %v1592_v59 = vadd.f32 1.0, %v3675_v8  ;;  %v3677_v9 = vpop.eup %3676 }
 0xc07   :  { %v1764_v11 = vadd.f32 1.0, %v3677_v9 }
 0xc08   :  { %3678 = vrcp.f32 %v1592_v59 }
 0xc09   :  { %3680 = vrcp.f32 %v1764_v11 }
 0xc15   :  { %v3679_v12 = vpop.eup %3678 }
 0xc16   :  { %v3681_v16 = vpop.eup %3680  ;;  %v1596_v19 = vmul.f32 %v3679_v12, %v4140_v62  ;;  %v3572_v62 = vld [vmem:[%s4610_s5 + $0x8] sm:$0xff]  }
 0xc17   :  { %v1768_v23 = vmul.f32 %v3681_v16, %v4144_v13  ;;  %3406 = vmatpush3.bf16.msra.mxu0 %v3572_v62 }
 0xc18   :  { %3407 = vmatprep.subr.bf16.mxu0 %v3734_v0 }
 0xc1b   :  { %3408 = vmatpush3.bf16.msra.mxu0 %v3574_v32 }
 0xc1c   :  { %3413 = vmatprep.subr.bf16.mxu0 %v3734_v0 }
 0xc73   :  { %v1599_v15 = vpop.permute.xlu0 %1598 }
 0xc74   :  { %v1601_v57 = vmul.f32 %v3679_v12, %v1599_v15 }
 0xc76   :  { %1603 = vrot.lane.b32.xlu0 %v1601_v57, %s3738_s11 }
 0xc77   :  { %v1771_v6 = vpop.permute.xlu1 %1770 }
 0xc78   :  { %v1773_v18 = vmul.f32 %v3681_v16, %v1771_v6 }
 0xc7a   :  { %1775 = vrot.lane.b32.xlu1 %v1773_v18, %s3738_s11 }
 0xce8   :  { %v1604_v20 = vpop.permute.xlu0 %1603 }
 0xce9   :  { %v4242_v22 = vadd.f32 %v1604_v20, %v1596_v19 }
 0xceb   :  { %3682 = vtanh.f32 %v4242_v22 }
 0xcec   :  { %v1776_v26 = vpop.permute.xlu1 %1775 }
 0xced   :  { %v4246_v27 = vadd.f32 %v1776_v26, %v1768_v23 }
 0xcef   :  { %3684 = vtanh.f32 %v4246_v27 }
 0xcf8   :  { %v3683_v13 = vpop.eup %3682 }
 0xcf9   :  { %1609 = vrot.lane.b32.xlu0 %v3683_v13, %s3737_s10 }
 0xcfc   :  { %v3685_v31 = vpop.eup %3684 }
 0xcfd   :  { %1781 = vrot.lane.b32.xlu1 %v3685_v31, %s3737_s10 }
 0xd6b   :  { %v1610_v33 = vpop.permute.xlu0 %1609 }
 0xd6c   :  { %v4267_v34 = vmul.f32 %v3679_v12, %v1610_v33 }
 0xd6e   :  { %v1807_v35 = vpack.c.bf16 %v4267_v34, %v4267_v34 }
 0xd6f   :  { %v1782_v36 = vpop.permute.xlu1 %1781 }
 0xd70   :  { %v4271_v37 = vmul.f32 %v3681_v16, %v1782_v36  ;;  %1813 = vrot.lane.b32.xlu0 %v1807_v35, %s3738_s11 }
 0xd72   :  { %v1979_v38 = vpack.c.bf16 %v4271_v37, %v4271_v37 }
 0xd74   :  { %1985 = vrot.lane.b32.xlu1 %v1979_v38, %s3738_s11 }
 0xde2   :  { %v1814_v40 = vpop.permute.xlu0 %1813 }
 0xde3   :  { %3390 = vmatmul.mubr.msk.bf16.vlgmr.msra.gmra.mxu1 %vm52_vm2, %v1814_v40 }
 0xde4   :  { %3394 = vmatpush3.bf16.msra.mxu1 %v3573_v39  ;;  %3401 = vmatprep.mubr.msk.bf16.mxu1 %vm3735_vm0, %v3734_v0 }
 0xde5   :  { %3395 = vmatprep.subr.bf16.mxu1 %v3734_v0 }
 0xde6   :  { %v1986_v43 = vpop.permute.xlu1 %1985 }
 0xde7   :  { %3410 = vmatmul.mubr.msk.bf16.vlgmr.msra.gmra.mxu0 %vm52_vm2, %v1986_v43  ;;  %v3583_v43 = vld [vmem:[%s4609_s2] sm:$0xff]  }
 0xde8   :  { %3396 = vmatpush3.bf16.msra.mxu1 %v3575_v41  ;;  %3414 = vmatpush3.bf16.msra.mxu0 %v3576_v42  ;;  %v3582_v42 = vld [vmem:[%s4609_s2 + $0x8] sm:$0xff]  }
 0xde9   :  { %3397 = vmatprep.subr.bf16.mxu1 %v3734_v0  ;;  %3415 = vmatprep.subr.bf16.mxu0 %v3734_v0 }
 0xdea   :  { %3421 = vmatprep.mubr.msk.bf16.mxu0 %vm3735_vm0, %v3734_v0 }
 0xdec   :  { %3398 = vmatpush3.bf16.msra.mxu1 %v3577_v44  ;;  %3416 = vmatpush3.bf16.msra.mxu0 %v3578_v45  ;;  %v3586_v45 = vld [vmem:[%s4610_s5] sm:$0xff]  }
 0xded   :  { %3399 = vmatprep.subr.bf16.mxu1 %v3734_v0  ;;  %3417 = vmatprep.subr.bf16.mxu0 %v3734_v0 }
 0xdf0   :  { %3400 = vmatpush3.bf16.msra.mxu1 %v3579_v46  ;;  %3418 = vmatpush3.bf16.msra.mxu0 %v3580_v47 }
 0xdf1   :  { %3419 = vmatprep.subr.bf16.mxu0 %v3734_v0  ;;  %3425 = vmatprep.subr.bf16.mxu1 %v3734_v0 }
 0xdf3   :  { %3402 = vmatmul.mubr.msk.bf16.vlgmr.msra.gmra.mxu1 %vm120_vm1, %v2985_v48 }
 0xdf4   :  { %3420 = vmatpush3.bf16.msra.mxu0 %v3581_v50  ;;  %3429 = vmatprep.mubr.msk.bf16.mxu1 %vm3735_vm0, %v3734_v0 }
 0xdf5   :  { %3445 = vmatprep.subr.bf16.mxu0 %v3734_v0  ;;  %3426 = vmatpush3.bf16.msra.mxu1 %v3582_v42 }
 0xdf6   :  { %3427 = vmatprep.subr.bf16.mxu1 %v3734_v0 }
 0xdf7   :  { %3422 = vmatmul.mubr.msk.bf16.vlgmr.msra.gmra.mxu0 %vm120_vm1, %v2996_v51 }
 0xdf8   :  { %3449 = vmatprep.mubr.msk.bf16.mxu0 %vm3735_vm0, %v3734_v0 }
 0xdf9   :  { %3428 = vmatpush3.bf16.msra.mxu1 %v3583_v43 }
 0xdfa   :  { %3433 = vmatprep.subr.bf16.mxu1 %v3734_v0 }
 0xea3   :  { %v1864_v52 = vpop.f32.mrf.mxu1 }
 0xea5   :  { %v3391_v53 = vpop.f32.mrf.mxu1 }
 0xea6   :  { %v3585_v53 = vld [vmem:[%s4611_s1 + $0x18] sm:$0xff]  }
 0xea7   :  { %v1867_v55 = vpop.f32.mrf.mxu1  ;;  %v2036_v25 = vpop.f32.mrf.mxu0 }
 0xea9   :  { %v3392_v58 = vpop.f32.mrf.mxu1  ;;  %v3411_v60 = vpop.f32.mrf.mxu0 }
 0xeaa   :  { %v3588_v58 = vld [vmem:[%s4612_s4 + $0x18] sm:$0xff]  }
 0xeab   :  { %v2039_v61 = vpop.f32.mrf.mxu0 }
 0xeac   :  { %v3589_v61 = vld [vmem:[%s4611_s1 + $0x8] sm:$0xff]  }
 0xead   :  { %v3412_v63 = vpop.f32.mrf.mxu0 }
 0xeae   :  { %v3590_v63 = vld [vmem:[%s4612_s4 + $0x10] sm:$0xff]  }
 0xeb3   :  { %v1931_v29 = vpop.f32.mrf.mxu1 }
 0xeb4   :  { %v1932_v54 = vadd.f32 %v1931_v29, %v1864_v52  ;;  %v3591_v29 = vld [vmem:[%s4611_s1] sm:$0xff]  }
 0xeb5   :  { %v3403_v1 = vpop.f32.mrf.mxu1 }
 0xeb6   :  { %v1944_v3 = vadd.f32 %v4228_v49, %v1932_v54  ;;  %v3592_v54 = vld [vmem:[%s4612_s4 + $0x8] sm:$0xff]  }
 0xeb7   :  { %v1934_v4 = vpop.f32.mrf.mxu1  ;;  %v2103_v8 = vpop.f32.mrf.mxu0  ;;  %v3009_v1 = vld [vmem:[%s4613_s0 + $0xc] sm:$0x1] }
 0xeb8   :  { %3686 = vtanh.f32 %v1944_v3  ;;  %v2104_v59 = vadd.f32 %v2103_v8, %v2036_v25  ;;  %v2995_v18 = vmul.f32 -1.442695, %v1944_v3  ;;  %v3587_v25 = vld [vmem:[%s4611_s1 + $0x10] sm:$0xff]   ;;  %v3593_v3 = vld [vmem:[%s4612_s4] sm:$0xff]   ;;  %v3020_v4 = vld [vmem:[%s4613_s0 + $0xd] sm:$0x1] }
 0xeb9   :  { %v3404_v9 = vpop.f32.mrf.mxu1  ;;  %v3423_v11 = vpop.f32.mrf.mxu0 }
 0xeba   :  { %v2116_v12 = vadd.f32 %v4234_v56, %v2104_v59 }
 0xebb   :  { %v2106_v15 = vpop.f32.mrf.mxu0 }
 0xebc   :  { %3688 = vtanh.f32 %v2116_v12  ;;  %v3006_v19 = vmul.f32 -1.442695, %v2116_v12 }
 0xebd   :  { %v3424_v57 = vpop.f32.mrf.mxu0  ;;  %3690 = vpow2.f32 %v2995_v18 }
 0xebe   :  { %3692 = vpow2.f32 %v3006_v19 }
 0xec5   :  { %v3687_v16 = vpop.eup %3686 }
 0xec6   :  { %1954 = vrot.lane.b32.xlu0 %v3687_v16, %s3737_s10 }
 0xec9   :  { %v3689_v6 = vpop.eup %3688 }
 0xeca   :  { %2126 = vrot.lane.b32.xlu1 %v3689_v6, %s3737_s10  ;;  %v3691_v20 = vpop.eup %3690 }
 0xecb   :  { %v1948_v23 = vadd.f32 1.0, %v3691_v20  ;;  %v3693_v26 = vpop.eup %3692 }
 0xecc   :  { %v2120_v28 = vadd.f32 1.0, %v3693_v26 }
 0xecd   :  { %3694 = vrcp.f32 %v1948_v23 }
 0xece   :  { %3696 = vrcp.f32 %v2120_v28 }
 0xeda   :  { %v3695_v62 = vpop.eup %3694 }
 0xedb   :  { %v3697_v31 = vpop.eup %3696  ;;  %v1952_v35 = vmul.f32 %v3695_v62, %v4242_v22  ;;  %v3584_v22 = vld [vmem:[%s4610_s5 + $0x8] sm:$0xff]  }
 0xedc   :  { %v2124_v39 = vmul.f32 %v3697_v31, %v4246_v27  ;;  %3446 = vmatpush3.bf16.msra.mxu0 %v3584_v22 }
 0xedd   :  { %3447 = vmatprep.subr.bf16.mxu0 %v3734_v0 }
 0xee0   :  { %3448 = vmatpush3.bf16.msra.mxu0 %v3586_v45 }
 0xee1   :  { %3453 = vmatprep.subr.bf16.mxu0 %v3734_v0 }
 0xf38   :  { %v1955_v30 = vpop.permute.xlu0 %1954 }
 0xf39   :  { %v1957_v13 = vmul.f32 %v3695_v62, %v1955_v30 }
 0xf3b   :  { %1959 = vrot.lane.b32.xlu0 %v1957_v13, %s3738_s11 }
 0xf3c   :  { %v2127_v32 = vpop.permute.xlu1 %2126 }
 0xf3d   :  { %v2129_v33 = vmul.f32 %v3697_v31, %v2127_v32 }
 0xf3f   :  { %2131 = vrot.lane.b32.xlu1 %v2129_v33, %s3738_s11 }
 0xfad   :  { %v1960_v36 = vpop.permute.xlu0 %1959 }
 0xfae   :  { %v4334_v38 = vadd.f32 %v1960_v36, %v1952_v35 }
 0xfb0   :  { %3698 = vtanh.f32 %v4334_v38 }
 0xfb1   :  { %v2132_v40 = vpop.permute.xlu1 %2131 }
 0xfb2   :  { %v4338_v41 = vadd.f32 %v2132_v40, %v2124_v39 }
 0xfb4   :  { %3700 = vtanh.f32 %v4338_v41 }
 0xfbd   :  { %v3699_v27 = vpop.eup %3698 }
 0xfbe   :  { %1965 = vrot.lane.b32.xlu0 %v3699_v27, %s3737_s10 }
 0xfc1   :  { %v3701_v44 = vpop.eup %3700 }
 0xfc2   :  { %2137 = vrot.lane.b32.xlu1 %v3701_v44, %s3737_s10 }
0x1030   :  { %v1966_v46 = vpop.permute.xlu0 %1965 }
0x1031   :  { %v4359_v47 = vmul.f32 %v3695_v62, %v1966_v46 }
0x1033   :  { %v2163_v48 = vpack.c.bf16 %v4359_v47, %v4359_v47 }
0x1034   :  { %v2138_v50 = vpop.permute.xlu1 %2137 }
0x1035   :  { %v4363_v51 = vmul.f32 %v3697_v31, %v2138_v50  ;;  %2169 = vrot.lane.b32.xlu0 %v2163_v48, %s3738_s11 }
0x1037   :  { %v2335_v52 = vpack.c.bf16 %v4363_v51, %v4363_v51 }
0x1039   :  { %2341 = vrot.lane.b32.xlu1 %v2335_v52, %s3738_s11 }
0x10a7   :  { %v2170_v55 = vpop.permute.xlu0 %2169 }
0x10a8   :  { %3430 = vmatmul.mubr.msk.bf16.vlgmr.msra.gmra.mxu1 %vm52_vm2, %v2170_v55 }
0x10a9   :  { %3434 = vmatpush3.bf16.msra.mxu1 %v3585_v53  ;;  %3441 = vmatprep.mubr.msk.bf16.mxu1 %vm3735_vm0, %v3734_v0 }
0x10aa   :  { %3435 = vmatprep.subr.bf16.mxu1 %v3734_v0 }
0x10ab   :  { %v2342_v60 = vpop.permute.xlu1 %2341 }
0x10ac   :  { %3450 = vmatmul.mubr.msk.bf16.vlgmr.msra.gmra.mxu0 %vm52_vm2, %v2342_v60 }
0x10ad   :  { %3436 = vmatpush3.bf16.msra.mxu1 %v3587_v25  ;;  %3454 = vmatpush3.bf16.msra.mxu0 %v3588_v58 }
0x10ae   :  { %3437 = vmatprep.subr.bf16.mxu1 %v3734_v0  ;;  %3455 = vmatprep.subr.bf16.mxu0 %v3734_v0 }
0x10af   :  { %3461 = vmatprep.mubr.msk.bf16.mxu0 %vm3735_vm0, %v3734_v0 }
0x10b1   :  { %3438 = vmatpush3.bf16.msra.mxu1 %v3589_v61  ;;  %3456 = vmatpush3.bf16.msra.mxu0 %v3590_v63  ;;  %v3594_v61 = vld [vmem:[%s4609_s2 + $0x8] sm:$0xff]   ;;  %v3595_v63 = vld [vmem:[%s4609_s2] sm:$0xff]  }
0x10b2   :  { %3439 = vmatprep.subr.bf16.mxu1 %v3734_v0  ;;  %3457 = vmatprep.subr.bf16.mxu0 %v3734_v0 }
0x10b5   :  { %3440 = vmatpush3.bf16.msra.mxu1 %v3591_v29  ;;  %3458 = vmatpush3.bf16.msra.mxu0 %v3592_v54  ;;  %v3598_v54 = vld [vmem:[%s4610_s5] sm:$0xff]  }
0x10b6   :  { %3459 = vmatprep.subr.bf16.mxu0 %v3734_v0  ;;  %3465 = vmatprep.subr.bf16.mxu1 %v3734_v0 }
0x10b8   :  { %3442 = vmatmul.mubr.msk.bf16.vlgmr.msra.gmra.mxu1 %vm120_vm1, %v3009_v1 }
0x10b9   :  { %3460 = vmatpush3.bf16.msra.mxu0 %v3593_v3  ;;  %3469 = vmatprep.mubr.msk.bf16.mxu1 %vm3735_vm0, %v3734_v0 }
0x10ba   :  { %3485 = vmatprep.subr.bf16.mxu0 %v3734_v0  ;;  %3466 = vmatpush3.bf16.msra.mxu1 %v3594_v61 }
0x10bb   :  { %3467 = vmatprep.subr.bf16.mxu1 %v3734_v0 }
0x10bc   :  { %3462 = vmatmul.mubr.msk.bf16.vlgmr.msra.gmra.mxu0 %vm120_vm1, %v3020_v4 }
0x10bd   :  { %3489 = vmatprep.mubr.msk.bf16.mxu0 %vm3735_vm0, %v3734_v0 }
0x10be   :  { %3468 = vmatpush3.bf16.msra.mxu1 %v3595_v63 }
0x10bf   :  { %3473 = vmatprep.subr.bf16.mxu1 %v3734_v0 }
0x1168   :  { %v2220_v8 = vpop.f32.mrf.mxu1 }
0x116a   :  { %v3431_v59 = vpop.f32.mrf.mxu1 }
0x116c   :  { %v2223_v9 = vpop.f32.mrf.mxu1  ;;  %v2392_v11 = vpop.f32.mrf.mxu0 }
0x116e   :  { %v3432_v12 = vpop.f32.mrf.mxu1  ;;  %v3451_v15 = vpop.f32.mrf.mxu0 }
0x116f   :  { %v3599_v15 = vld [vmem:[%s4611_s1 + $0x10] sm:$0xff]  }
0x1170   :  { %v2395_v57 = vpop.f32.mrf.mxu0 }
0x1171   :  { %v3600_v57 = vld [vmem:[%s4612_s4 + $0x18] sm:$0xff]  }
0x1172   :  { %v3452_v16 = vpop.f32.mrf.mxu0 }
0x1178   :  { %v2287_v6 = vpop.f32.mrf.mxu1 }
0x1179   :  { %v2288_v18 = vadd.f32 %v2287_v6, %v2220_v8  ;;  %v3601_v6 = vld [vmem:[%s4611_s1 + $0x8] sm:$0xff]  }
0x117a   :  { %v3443_v19 = vpop.f32.mrf.mxu1 }
0x117b   :  { %v2300_v20 = vadd.f32 %v4228_v49, %v2288_v18  ;;  %v3602_v18 = vld [vmem:[%s4612_s4 + $0x10] sm:$0xff]   ;;  %v3603_v19 = vld [vmem:[%s4611_s1] sm:$0xff]  }
0x117c   :  { %v2290_v23 = vpop.f32.mrf.mxu1  ;;  %v2459_v26 = vpop.f32.mrf.mxu0 }
0x117d   :  { %3702 = vtanh.f32 %v2300_v20  ;;  %v2460_v28 = vadd.f32 %v2459_v26, %v2392_v11  ;;  %v3019_v36 = vmul.f32 -1.442695, %v2300_v20  ;;  %v3597_v11 = vld [vmem:[%s4611_s1 + $0x18] sm:$0xff]   ;;  %v3604_v20 = vld [vmem:[%s4612_s4 + $0x8] sm:$0xff]   ;;  %v3605_v26 = vld [vmem:[%s4612_s4] sm:$0xff]  }
0x117e   :  { %v3444_v62 = vpop.f32.mrf.mxu1  ;;  %v3463_v30 = vpop.f32.mrf.mxu0  ;;  %v3033_v23 = vld [vmem:[%s4613_s0 + $0xe] sm:$0x1] }
0x117f   :  { %v2472_v13 = vadd.f32 %v4234_v56, %v2460_v28  ;;  %v3044_v28 = vld [vmem:[%s4613_s0 + $0xf] sm:$0x1] }
0x1180   :  { %v2462_v31 = vpop.f32.mrf.mxu0 }
0x1181   :  { %3704 = vtanh.f32 %v2472_v13  ;;  %v3030_v39 = vmul.f32 -1.442695, %v2472_v13 }
0x1182   :  { %v3464_v32 = vpop.f32.mrf.mxu0  ;;  %3706 = vpow2.f32 %v3019_v36 }
0x1183   :  { %3708 = vpow2.f32 %v3030_v39 }
0x118a   :  { %v3703_v33 = vpop.eup %3702 }
0x118b   :  { %2310 = vrot.lane.b32.xlu0 %v3703_v33, %s3737_s10 }
0x118e   :  { %v3705_v35 = vpop.eup %3704 }
0x118f   :  { %2482 = vrot.lane.b32.xlu1 %v3705_v35, %s3737_s10  ;;  %v3707_v40 = vpop.eup %3706 }
0x1190   :  { %v2304_v42 = vadd.f32 1.0, %v3707_v40  ;;  %v3709_v22 = vpop.eup %3708 }
0x1191   :  { %v2476_v43 = vadd.f32 1.0, %v3709_v22 }
0x1192   :  { %3710 = vrcp.f32 %v2304_v42 }
0x1193   :  { %3712 = vrcp.f32 %v2476_v43 }
0x119f   :  { %v3711_v27 = vpop.eup %3710 }
0x11a0   :  { %v3713_v46 = vpop.eup %3712  ;;  %v2308_v52 = vmul.f32 %v3711_v27, %v4334_v38  ;;  %v3596_v38 = vld [vmem:[%s4610_s5 + $0x8] sm:$0xff]  }
0x11a1   :  { %v2480_v25 = vmul.f32 %v3713_v46, %v4338_v41  ;;  %3486 = vmatpush3.bf16.msra.mxu0 %v3596_v38 }
0x11a2   :  { %3487 = vmatprep.subr.bf16.mxu0 %v3734_v0 }
0x11a5   :  { %3488 = vmatpush3.bf16.msra.mxu0 %v3598_v54 }
0x11a6   :  { %3493 = vmatprep.subr.bf16.mxu0 %v3734_v0 }
0x11fd   :  { %v2311_v44 = vpop.permute.xlu0 %2310 }
0x11fe   :  { %v2313_v45 = vmul.f32 %v3711_v27, %v2311_v44 }
0x1200   :  { %2315 = vrot.lane.b32.xlu0 %v2313_v45, %s3738_s11 }
0x1201   :  { %v2483_v48 = vpop.permute.xlu1 %2482 }
0x1202   :  { %v2485_v50 = vmul.f32 %v3713_v46, %v2483_v48 }
0x1204   :  { %2487 = vrot.lane.b32.xlu1 %v2485_v50, %s3738_s11 }
0x1272   :  { %v2316_v53 = vpop.permute.xlu0 %2315 }
0x1273   :  { %v4426_v55 = vadd.f32 %v2316_v53, %v2308_v52 }
0x1275   :  { %3714 = vtanh.f32 %v4426_v55 }
0x1276   :  { %v2488_v58 = vpop.permute.xlu1 %2487 }
0x1277   :  { %v4430_v60 = vadd.f32 %v2488_v58, %v2480_v25 }
0x1279   :  { %3716 = vtanh.f32 %v4430_v60 }
0x1282   :  { %v3715_v41 = vpop.eup %3714 }
0x1283   :  { %2321 = vrot.lane.b32.xlu0 %v3715_v41, %s3737_s10 }
0x1286   :  { %v3717_v29 = vpop.eup %3716 }
0x1287   :  { %2493 = vrot.lane.b32.xlu1 %v3717_v29, %s3737_s10 }
0x12f5   :  { %v2322_v1 = vpop.permute.xlu0 %2321 }
0x12f6   :  { %v4451_v3 = vmul.f32 %v3711_v27, %v2322_v1 }
0x12f8   :  { %v2519_v4 = vpack.c.bf16 %v4451_v3, %v4451_v3 }
0x12f9   :  { %v2494_v8 = vpop.permute.xlu1 %2493 }
0x12fa   :  { %v4455_v59 = vmul.f32 %v3713_v46, %v2494_v8  ;;  %2525 = vrot.lane.b32.xlu0 %v2519_v4, %s3738_s11 }
0x12fc   :  { %v2691_v9 = vpack.c.bf16 %v4455_v59, %v4455_v59 }
0x12fe   :  { %2697 = vrot.lane.b32.xlu1 %v2691_v9, %s3738_s11 }
0x136c   :  { %v2526_v12 = vpop.permute.xlu0 %2525 }
0x136d   :  { %3470 = vmatmul.mubr.msk.bf16.vlgmr.msra.gmra.mxu1 %vm52_vm2, %v2526_v12 }
0x136e   :  { %3474 = vmatpush3.bf16.msra.mxu1 %v3597_v11  ;;  %3481 = vmatprep.mubr.msk.bf16.mxu1 %vm3735_vm0, %v3734_v0 }
0x136f   :  { %3475 = vmatprep.subr.bf16.mxu1 %v3734_v0 }
0x1370   :  { %v2698_v16 = vpop.permute.xlu1 %2697 }
0x1371   :  { %3490 = vmatmul.mubr.msk.bf16.vlgmr.msra.gmra.mxu0 %vm52_vm2, %v2698_v16 }
0x1372   :  { %3476 = vmatpush3.bf16.msra.mxu1 %v3599_v15  ;;  %3494 = vmatpush3.bf16.msra.mxu0 %v3600_v57 }
0x1373   :  { %3477 = vmatprep.subr.bf16.mxu1 %v3734_v0  ;;  %3495 = vmatprep.subr.bf16.mxu0 %v3734_v0 }
0x1374   :  { %3501 = vmatprep.mubr.msk.bf16.mxu0 %vm3735_vm0, %v3734_v0 }
0x1376   :  { %3478 = vmatpush3.bf16.msra.mxu1 %v3601_v6  ;;  %3496 = vmatpush3.bf16.msra.mxu0 %v3602_v18 }
0x1377   :  { %3479 = vmatprep.subr.bf16.mxu1 %v3734_v0  ;;  %3497 = vmatprep.subr.bf16.mxu0 %v3734_v0 }
0x137a   :  { %3480 = vmatpush3.bf16.msra.mxu1 %v3603_v19  ;;  %3498 = vmatpush3.bf16.msra.mxu0 %v3604_v20 }
0x137b   :  { %3499 = vmatprep.subr.bf16.mxu0 %v3734_v0 }
0x137d   :  { %3482 = vmatmul.mubr.msk.bf16.vlgmr.msra.gmra.mxu1 %vm120_vm1, %v3033_v23 }
0x137e   :  { %3500 = vmatpush3.bf16.msra.mxu0 %v3605_v26 }
0x1381   :  { %3502 = vmatmul.mubr.msk.bf16.vlgmr.msra.gmra.mxu0 %vm120_vm1, %v3044_v28 }
0x142d   :  { %v2576_v62 = vpop.f32.mrf.mxu1 }
0x142f   :  { %v3471_v30 = vpop.f32.mrf.mxu1 }
0x1431   :  { %v2579_v13 = vpop.f32.mrf.mxu1  ;;  %v2748_v31 = vpop.f32.mrf.mxu0 }
0x1433   :  { %v3472_v32 = vpop.f32.mrf.mxu1  ;;  %v3491_v33 = vpop.f32.mrf.mxu0 }
0x1435   :  { %v2751_v35 = vpop.f32.mrf.mxu0 }
0x1437   :  { %v3492_v36 = vpop.f32.mrf.mxu0 }
0x143d   :  { %v2643_v39 = vpop.f32.mrf.mxu1 }
0x143e   :  { %v2644_v40 = vadd.f32 %v2643_v39, %v2576_v62 }
0x143f   :  { %v3483_v0 = vpop.f32.mrf.mxu1 }
0x1440   :  { %v2656_v42 = vadd.f32 %v4228_v49, %v2644_v40 }
0x1441   :  { %v2646_v22 = vpop.f32.mrf.mxu1  ;;  %v2815_v43 = vpop.f32.mrf.mxu0 }
0x1442   :  { %3718 = vtanh.f32 %v2656_v42  ;;  %v2816_v27 = vadd.f32 %v2815_v43, %v2748_v31  ;;  %v3043_v25 = vmul.f32 -1.442695, %v2656_v42 }
0x1443   :  { %v3484_v44 = vpop.f32.mrf.mxu1  ;;  %v3503_v45 = vpop.f32.mrf.mxu0 }
0x1444   :  { %v2828_v46 = vadd.f32 %v4234_v56, %v2816_v27 }
0x1445   :  { %v2818_v48 = vpop.f32.mrf.mxu0 }
0x1446   :  { %3720 = vtanh.f32 %v2828_v46  ;;  %v3054_v49 = vmul.f32 -1.442695, %v2828_v46 }
0x1447   :  { %v3504_v50 = vpop.f32.mrf.mxu0  ;;  %3722 = vpow2.f32 %v3043_v25 }
0x1448   :  { %3724 = vpow2.f32 %v3054_v49 }
0x144f   :  { %v3719_v52 = vpop.eup %3718 }
0x1450   :  { %2666 = vrot.lane.b32.xlu0 %v3719_v52, %s3737_s10 }
0x1453   :  { %v3721_v53 = vpop.eup %3720 }
0x1454   :  { %2838 = vrot.lane.b32.xlu1 %v3721_v53, %s3737_s10  ;;  %v3723_v58 = vpop.eup %3722 }
0x1455   :  { %v2660_v61 = vadd.f32 1.0, %v3723_v58  ;;  %v3725_v38 = vpop.eup %3724 }
0x1456   :  { %v2832_v63 = vadd.f32 1.0, %v3725_v38 }
0x1457   :  { %3726 = vrcp.f32 %v2660_v61 }
0x1458   :  { %3728 = vrcp.f32 %v2832_v63 }
0x1464   :  { %v3727_v56 = vpop.eup %3726 }
0x1465   :  { %v3729_v54 = vpop.eup %3728  ;;  %v2664_v8 = vmul.f32 %v3727_v56, %v4426_v55 }
0x1466   :  { %v2836_v12 = vmul.f32 %v3729_v54, %v4430_v60 }
0x14c2   :  { %v2667_v41 = vpop.permute.xlu0 %2666 }
0x14c3   :  { %v2669_v29 = vmul.f32 %v3727_v56, %v2667_v41 }
0x14c5   :  { %2671 = vrot.lane.b32.xlu0 %v2669_v29, %s3738_s11 }
0x14c6   :  { %v2839_v1 = vpop.permute.xlu1 %2838 }
0x14c7   :  { %v2841_v4 = vmul.f32 %v3729_v54, %v2839_v1 }
0x14c9   :  { %2843 = vrot.lane.b32.xlu1 %v2841_v4, %s3738_s11 }
0x1537   :  { %v2672_v9 = vpop.permute.xlu0 %2671 }
0x1538   :  { %v2674_v11 = vadd.f32 %v2672_v9, %v2664_v8 }
0x153a   :  { %3730 = vtanh.f32 %v2674_v11 }
0x153b   :  { %v2844_v15 = vpop.permute.xlu1 %2843 }
0x153c   :  { %v2846_v57 = vadd.f32 %v2844_v15, %v2836_v12 }
0x153e   :  { %3732 = vtanh.f32 %v2846_v57 }
0x1547   :  { %v3731_v16 = vpop.eup %3730 }
0x1548   :  { %2677 = vrot.lane.b32.xlu0 %v3731_v16, %s3737_s10 }
0x154b   :  { %v3733_v6 = vpop.eup %3732 }
0x154c   :  { %2849 = vrot.lane.b32.xlu1 %v3733_v6, %s3737_s10  ;;  %362 = vrot.lane.b32.xlu0 %v3889_v2, %s3738_s11 }
0x1550   :  { %368 = vrot.lane.b32.xlu1 %v3893_v5, %s3738_s11  ;;  %718 = vrot.lane.b32.xlu0 %v3981_v7, %s3738_s11 }
0x1554   :  { %724 = vrot.lane.b32.xlu1 %v3985_v10, %s3738_s11  ;;  %1074 = vrot.lane.b32.xlu0 %v4073_v14, %s3738_s11 }
0x1558   :  { %1080 = vrot.lane.b32.xlu1 %v4077_v17, %s3738_s11  ;;  %1430 = vrot.lane.b32.xlu0 %v4165_v21, %s3738_s11 }
0x155c   :  { %1436 = vrot.lane.b32.xlu1 %v4169_v24, %s3738_s11  ;;  %1786 = vrot.lane.b32.xlu0 %v4267_v34, %s3738_s11 }
0x1560   :  { %1792 = vrot.lane.b32.xlu1 %v4271_v37, %s3738_s11  ;;  %2142 = vrot.lane.b32.xlu0 %v4359_v47, %s3738_s11 }
0x1564   :  { %2148 = vrot.lane.b32.xlu1 %v4363_v51, %s3738_s11  ;;  %2498 = vrot.lane.b32.xlu0 %v4451_v3, %s3738_s11 }
0x1568   :  { %2504 = vrot.lane.b32.xlu1 %v4455_v59, %s3738_s11 }
0x15ba   :  { %v2678_v2 = vpop.permute.xlu0 %2677 }
0x15bb   :  { %v2680_v5 = vmul.f32 %v3727_v56, %v2678_v2 }
0x15bd   :  { %2854 = vrot.lane.b32.xlu0 %v2680_v5, %s3738_s11 }
0x15be   :  { %v2850_v7 = vpop.permute.xlu1 %2849  ;;  %v363_v10 = vpop.permute.xlu0 %362 }
0x15bf   :  { %v2852_v14 = vmul.f32 %v3729_v54, %v2850_v7  ;;  %366 = vst.msk [vmem:[%s4616_s7] sm:$0x3] %vm365_vm3, %v363_v10 }
0x15c1   :  { %2860 = vrot.lane.b32.xlu1 %v2852_v14, %s3738_s11 }
0x15c2   :  { %v369_v17 = vpop.permute.xlu1 %368  ;;  %v719_v21 = vpop.permute.xlu0 %718 }
0x15c3   :  { %2888 = vst.msk [vmem:[%s4616_s7 + $0x2] sm:$0x3] %vm365_vm3, %v369_v17  ;;  %2911 = vst.msk [vmem:[%s4616_s7 + $0x4] sm:$0x3] %vm365_vm3, %v719_v21 }
0x15c6   :  { %v725_v24 = vpop.permute.xlu1 %724  ;;  %v1075_v34 = vpop.permute.xlu0 %1074 }
0x15c7   :  { %2912 = vst.msk [vmem:[%s4616_s7 + $0x6] sm:$0x3] %vm365_vm3, %v725_v24  ;;  %2935 = vst.msk [vmem:[%s4616_s7 + $0x8] sm:$0x3] %vm365_vm3, %v1075_v34 }
0x15ca   :  { %v1081_v37 = vpop.permute.xlu1 %1080  ;;  %v1431_v47 = vpop.permute.xlu0 %1430 }
0x15cb   :  { %2936 = vst.msk [vmem:[%s4616_s7 + $0xa] sm:$0x3] %vm365_vm3, %v1081_v37  ;;  %2959 = vst.msk [vmem:[%s4616_s7 + $0xc] sm:$0x3] %vm365_vm3, %v1431_v47 }
0x15ce   :  { %v1437_v51 = vpop.permute.xlu1 %1436  ;;  %v1787_v55 = vpop.permute.xlu0 %1786 }
0x15cf   :  { %2960 = vst.msk [vmem:[%s4616_s7 + $0xe] sm:$0x3] %vm365_vm3, %v1437_v51  ;;  %2983 = vst.msk [vmem:[%s4616_s7 + $0x10] sm:$0x3] %vm365_vm3, %v1787_v55 }
0x15d2   :  { %v1793_v60 = vpop.permute.xlu1 %1792  ;;  %v2143_v3 = vpop.permute.xlu0 %2142 }
0x15d3   :  { %2984 = vst.msk [vmem:[%s4616_s7 + $0x12] sm:$0x3] %vm365_vm3, %v1793_v60  ;;  %3007 = vst.msk [vmem:[%s4616_s7 + $0x14] sm:$0x3] %vm365_vm3, %v2143_v3 }
0x15d6   :  { %v2149_v59 = vpop.permute.xlu1 %2148  ;;  %v2499_v18 = vpop.permute.xlu0 %2498 }
0x15d7   :  { %3008 = vst.msk [vmem:[%s4616_s7 + $0x16] sm:$0x3] %vm365_vm3, %v2149_v59  ;;  %3031 = vst.msk [vmem:[%s4616_s7 + $0x18] sm:$0x3] %vm365_vm3, %v2499_v18 }
0x15da   :  { %v2505_v19 = vpop.permute.xlu1 %2504 }
0x15db   :  { %3032 = vst.msk [vmem:[%s4616_s7 + $0x1a] sm:$0x3] %vm365_vm3, %v2505_v19 }
0x162f   :  { %v2855_v20 = vpop.permute.xlu0 %2854 }
0x1630   :  { %3055 = vst.msk [vmem:[%s4616_s7 + $0x1c] sm:$0x3] %vm365_vm3, %v2855_v20 }
0x1633   :  { %v2861_v23 = vpop.permute.xlu1 %2860 }
0x1634   :  { %3056 = vst.msk [vmem:[%s4616_s7 + $0x1e] sm:$0x3] %vm365_vm3, %v2861_v23 }

</bundles_post_ra>
